<compile_context>
chip_gen: v7x
topology: tpu7x:2x2x1
jax: 0.10.0
libtpu: 0.0.40
codegen_flags: <defaults>
</compile_context>

<pallas_src>
import functools

import jax
import jax.numpy as jnp
from jax import lax
from jax.experimental import pallas as pl
from jax.experimental.pallas import tpu as pltpu


def _layernorm(x, gamma, beta, eps=1e-5):
    mu = jnp.mean(x, axis=-1, keepdims=True)
    xc = x - mu
    var = jnp.mean(xc * xc, axis=-1, keepdims=True)
    return xc * lax.rsqrt(var + eps) * gamma + beta


def block_kernel(x_ref, g1_ref, b1_ref, wqkv_ref, wproj_ref, bproj_ref,
                 g2_ref, b2_ref, wg_ref, bg_ref,
                 we1_ref, be1_ref, we2_ref, be2_ref, mask_ref,
                 out_ref, stats_ref, *, num_heads, num_experts):
    Bt, T, C = x_ref.shape
    H = num_heads
    hd = C // H
    E = num_experts
    M = Bt * T

    # Flatten batch*time so every projection / FFN matmul has M = Bt*T rows
    # (fills the MXU instead of M = T).
    x = x_ref[...].reshape(M, C)

    # ---- LN1 + fused QKV projection (Q|K|V contiguous, head-major cols) ----
    ln1 = _layernorm(x, g1_ref[...], b1_ref[...])
    qkv = jnp.dot(ln1.astype(jnp.bfloat16), wqkv_ref[...],
                  preferred_element_type=jnp.float32)            # (M, 3C) f32

    # ---- causal attention (per packed batch row; 3-D leading-batch einsums) --
    mask_bias = mask_ref[...]                                    # (T, T) f32
    scale = float(hd) ** -0.5
    o_rows = []
    for b in range(Bt):                       # Bt is small & static (unrolled)
        lo, hi = b * T, (b + 1) * T
        q = jnp.transpose(qkv[lo:hi, 0 * C:1 * C].reshape(T, H, hd), (1, 0, 2))
        k = jnp.transpose(qkv[lo:hi, 1 * C:2 * C].reshape(T, H, hd), (1, 0, 2))
        v = jnp.transpose(qkv[lo:hi, 2 * C:3 * C].reshape(T, H, hd), (1, 0, 2))
        att = jnp.einsum('hqd,hkd->hqk',
                         q.astype(jnp.bfloat16), k.astype(jnp.bfloat16),
                         preferred_element_type=jnp.float32) * scale
        att = att + mask_bias[None, :, :]
        att = att - jnp.max(att, axis=-1, keepdims=True)
        p = jnp.exp(att)
        p = p / jnp.sum(p, axis=-1, keepdims=True)
        # TODO(synk): Dropout(0.1) on attention/proj/expert outputs is identity (eval mode).
        o = jnp.einsum('hqk,hkd->hqd',
                       p.astype(jnp.bfloat16), v.astype(jnp.bfloat16),
                       preferred_element_type=jnp.float32)       # (H, T, hd)
        o_rows.append(jnp.transpose(o, (1, 0, 2)).reshape(T, C))
    # TODO(synk): for long T, replace the materialized (H,T,T) scores with a
    # KV-tiled online-softmax (flash) loop to bound VMEM on v7x.
    o_all = jnp.concatenate(o_rows, axis=0) if Bt > 1 else o_rows[0]   # (M, C)

    sa = jnp.dot(o_all.astype(jnp.bfloat16), wproj_ref[...],
                 preferred_element_type=jnp.float32) + bproj_ref[...]
    h1 = x + sa                                                  # (M, C)

    # ---- LN2 + gate softmax (f32) + vectorized top-1 routing ----
    ln2 = _layernorm(h1, g2_ref[...], b2_ref[...])
    ln2b = ln2.astype(jnp.bfloat16)

    logits = (jnp.dot(ln2, wg_ref[...], preferred_element_type=jnp.float32)
              + bg_ref[...])                                     # (M, E)
    logits = logits - jnp.max(logits, axis=-1, keepdims=True)
    ge = jnp.exp(logits)
    gate = ge / jnp.sum(ge, axis=-1, keepdims=True)

    best = jnp.max(gate, axis=-1, keepdims=True)                 # (M, 1)
    eids = lax.broadcasted_iota(jnp.int32, (M, E), 1)
    # first-max tie-break (matches torch.max / argmax semantics)
    idx = jnp.min(jnp.where(gate == best, eids.astype(jnp.float32), float(E)),
                  axis=-1, keepdims=True).astype(jnp.int32)      # (M, 1)

    # packed aux-loss partials: row 0 = importance, row 1 = load
    onehot = (eids == idx).astype(jnp.float32)                   # (M, E)
    stats = jnp.concatenate([jnp.sum(gate, axis=0, keepdims=True),
                             jnp.sum(onehot, axis=0, keepdims=True)], axis=0)
    stats_ref[...] = stats[None]                                 # (1, 2, E)

    # ---- top-1 MoE FFN: resident bf16 expert weights, dense compute + mask ----
    # TODO(synk): for large E, switch to grouped dispatch (two-pass kernel with
    # scalar-prefetched per-expert token offsets) to avoid the E x masked FLOPs.
    acc = h1
    for e in range(E):
        hmid = jnp.maximum(
            jnp.dot(ln2b, we1_ref[e], preferred_element_type=jnp.float32)
            + be1_ref[e], 0.0)                                   # (M, 4C) f32
        ye = (jnp.dot(hmid.astype(jnp.bfloat16), we2_ref[e],
                      preferred_element_type=jnp.float32) + be2_ref[e])  # (M, C)
        w = jnp.where(idx == e, best, 0.0)                       # (M, 1)
        acc = acc + w * ye
    out_ref[...] = acc.reshape(Bt, T, C)


def _pick_vmem_limit():
    """~0.8 of physical VMEM per core; None -> compiler default if query fails."""
    try:
        return int(pltpu.get_tpu_info().vmem_capacity_bytes * 0.8)
    except Exception:
        return None


def block_forward(x, params, *, num_heads, block_b=None):
    (g1, b1, wqkv, wproj, bproj, g2, b2, wg, bg, we1, be1, we2, be2) = params
    B, T, C = x.shape
    H = num_heads
    hd = C // H
    E = wg.shape[1]
    Hf = we1.shape[2]

    # Batch packing: target ~256 tokens / grid step (fills the 256x256 MXU on
    # v6e/v7x) while keeping >= 2 grid steps when B allows so the "parallel"
    # axis can still shard across the two v7x TensorCores.
    if block_b is None:
        bt = min(B, max(1, 256 // T))
        if B >= 2 and B // max(bt, 1) < 2:
            bt = max(1, B // 2)
    else:
        bt = block_b
    while B % bt != 0:
        bt -= 1
    nb = B // bt

    # Host-side: reorder fused-QKV columns from per-head [q|k|v] interleave to
    # contiguous Q|K|V blocks (head-major inside each) so the kernel slices the
    # lane axis only at C-aligned offsets.
    wqkv_r = wqkv.reshape(C, H, 3, hd).transpose(0, 2, 1, 3).reshape(C, 3 * C)

    # Big matmul operands as bf16 (f32 accumulation inside the kernel); halves
    # the HBM traffic of the (now one-shot) weight DMAs.
    wqkv_b = wqkv_r.astype(jnp.bfloat16)
    wproj_b = wproj.astype(jnp.bfloat16)
    we1_b = we1.astype(jnp.bfloat16)
    we2_b = we2.astype(jnp.bfloat16)

    # Precomputed additive causal bias (hoists the per-tile iota/compare work).
    tri = jnp.tril(jnp.ones((T, T), dtype=bool))
    mask_bias = jnp.where(tri, 0.0, -1e30).astype(jnp.float32)

    const2 = lambda i: (0, 0)
    const3 = lambda i: (0, 0, 0)
    batch3 = lambda i: (i, 0, 0)

    grid_spec = pltpu.PrefetchScalarGridSpec(
        num_scalar_prefetch=0,
        grid=(nb,),
        in_specs=[
            pl.BlockSpec((bt, T, C), batch3),       # x (one packed batch tile)
            pl.BlockSpec((1, C), const2),           # ln1 gamma
            pl.BlockSpec((1, C), const2),           # ln1 beta
            pl.BlockSpec((C, 3 * C), const2),       # wqkv (bf16, reordered, resident)
            pl.BlockSpec((C, C), const2),           # wproj (bf16, resident)
            pl.BlockSpec((1, C), const2),           # proj bias
            pl.BlockSpec((1, C), const2),           # ln2 gamma
            pl.BlockSpec((1, C), const2),           # ln2 beta
            pl.BlockSpec((C, E), const2),           # gate W (f32)
            pl.BlockSpec((1, E), const2),           # gate b
            pl.BlockSpec((E, C, Hf), const3),       # all expert W1 (bf16, resident)
            pl.BlockSpec((E, 1, Hf), const3),       # all expert b1
            pl.BlockSpec((E, Hf, C), const3),       # all expert W2 (bf16, resident)
            pl.BlockSpec((E, 1, C), const3),        # all expert b2
            pl.BlockSpec((T, T), const2),           # additive causal bias
        ],
        out_specs=(
            pl.BlockSpec((bt, T, C), batch3),       # block output (lane-dense)
            pl.BlockSpec((1, 2, E), batch3),        # [importance; load] partials
        ),
    )

    flops = B * (2 * T * C * 3 * C              # qkv
                 + 4 * H * T * T * hd           # q@k^T and att@v
                 + 2 * T * C * C                # output projection
                 + 2 * T * C * E                # gate
                 + E * 4 * T * C * Hf)          # experts (dense + mask)
    transcendentals = B * (H * T * T + T * E)
    bytes_accessed = (2 * x.size * 4
                      + nb * 2 * E * 4
                      + (wqkv_b.size + wproj_b.size + we1_b.size + we2_b.size) * 2
                      + (g1.size + b1.size + g2.size + b2.size + bproj.size
                         + wg.size + bg.size + be1.size + be2.size
                         + mask_bias.size) * 4)

    out, stats = pl.pallas_call(
        functools.partial(block_kernel, num_heads=H, num_experts=E),
        out_shape=(jax.ShapeDtypeStruct((B, T, C), jnp.float32),
                   jax.ShapeDtypeStruct((nb, 2, E), jnp.float32)),
        grid_spec=grid_spec,
        compiler_params=pltpu.CompilerParams(
            dimension_semantics=("parallel",),
            vmem_limit_bytes=_pick_vmem_limit()),
        cost_estimate=pl.CostEstimate(flops=flops,
                                      transcendentals=transcendentals,
                                      bytes_accessed=bytes_accessed),
    )(x, g1, b1, wqkv_b, wproj_b, bproj, g2, b2, wg, bg,
      we1_b, be1, we2_b, be2, mask_bias)

    # Reduce the per-tile aux-loss partials outside the kernel (keeps the grid
    # axis truly parallel / megacore-safe).
    total = float(B * T)
    tot = jnp.sum(stats, axis=0)                # (2, E)
    imp, load = tot[0], tot[1]
    aux = E * jnp.sum((imp / total) * (load / total))
    return out, aux


def block_ref(x, params, num_heads):
    """Pure-JAX f32 reference mirroring the PyTorch module (eval mode)."""
    (g1, b1, wqkv, wproj, bproj, g2, b2, wg, bg, we1, be1, we2, be2) = params
    B, T, C = x.shape
    H = num_heads
    hd = C // H
    E = we1.shape[0]

    def ln(z, g, b):
        mu = z.mean(-1, keepdims=True)
        var = ((z - mu) ** 2).mean(-1, keepdims=True)
        return (z - mu) / jnp.sqrt(var + 1e-5) * g + b

    l1 = ln(x, g1, b1)
    qkv = (l1 @ wqkv).reshape(B, T, H, 3 * hd)
    q, k, v = jnp.split(qkv, 3, axis=-1)
    q, k, v = [jnp.transpose(t, (0, 2, 1, 3)) for t in (q, k, v)]
    att = jnp.einsum('bhqd,bhkd->bhqk', q, k) * hd ** -0.5
    mask = jnp.tril(jnp.ones((T, T), bool))
    att = jnp.where(mask, att, -jnp.inf)
    att = jax.nn.softmax(att, axis=-1)
    o = jnp.einsum('bhqk,bhkd->bhqd', att, v)
    o = jnp.transpose(o, (0, 2, 1, 3)).reshape(B, T, C)
    h = x + (o @ wproj + bproj)

    l2 = ln(h, g2, b2)
    gate = jax.nn.softmax(l2 @ wg + bg, axis=-1)
    top = jnp.max(gate, axis=-1)
    idx = jnp.argmax(gate, axis=-1)
    imp = gate.sum((0, 1))
    load = jnp.array([(idx == e).sum() for e in range(E)], jnp.float32)
    total = B * T
    aux = E * jnp.sum((imp / total) * (load / total))
    out = jnp.zeros_like(x)
    for e in range(E):
        hm = jax.nn.relu(l2 @ we1[e] + be1[e])
        ye = hm @ we2[e] + be2[e]
        w = jnp.where(idx == e, top, 0.0)[..., None]
        out = out + w * ye
    return h + out, aux


if __name__ == "__main__":
    # small but TPU-aligned config: n_embd=128 (lane-dense), n_head=4 (head_dim
    # 32, same as the real 256/8 config), n_experts=4, hidden=4*n_embd.
    B, T, C, H, E = 2, 16, 128, 4, 4
    hidden = 4 * C

    key = jax.random.PRNGKey(0)
    ks = jax.random.split(key, 14)

    g1 = 1.0 + 0.1 * jax.random.normal(ks[10], (1, C), jnp.float32)
    b1 = 0.1 * jax.random.normal(ks[11], (1, C), jnp.float32)
    g2 = 1.0 + 0.1 * jax.random.normal(ks[12], (1, C), jnp.float32)
    b2 = 0.1 * jax.random.normal(ks[13], (1, C), jnp.float32)
    wqkv = 0.01 * jax.random.normal(ks[0], (C, 3 * C), jnp.float32)
    wproj = 0.01 * jax.random.normal(ks[1], (C, C), jnp.float32)
    bproj = 0.02 * jax.random.normal(ks[2], (1, C), jnp.float32)
    wg = 0.25 * jax.random.normal(ks[3], (C, E), jnp.float32)
    bg = 0.05 * jax.random.normal(ks[4], (1, E), jnp.float32)
    we1 = 0.02 * jax.random.normal(ks[5], (E, C, hidden), jnp.float32)
    be1 = 0.02 * jax.random.normal(ks[6], (E, 1, hidden), jnp.float32)
    we2 = 0.02 * jax.random.normal(ks[7], (E, hidden, C), jnp.float32)
    be2 = 0.02 * jax.random.normal(ks[8], (E, 1, C), jnp.float32)
    x = jax.random.normal(ks[9], (B, T, C), jnp.float32)

    params = (g1, b1, wqkv, wproj, bproj, g2, b2, wg, bg, we1, be1, we2, be2)

    out, aux = block_forward(x, params, num_heads=H)
    (out, aux) = jax.block_until_ready((out, aux))

    out_r, aux_r = block_ref(x, params, H)
    # bf16 matmul operands with f32 accumulation -> slightly looser tolerances
    assert jnp.allclose(out, out_r, atol=2e-3, rtol=2e-3), \
        float(jnp.max(jnp.abs(out - out_r)))
    assert jnp.allclose(aux, aux_r, atol=1e-3, rtol=1e-2), (float(aux), float(aux_r))

    print("KERNEL_OK")
</pallas_src>

<mosaic_0001>
module attributes {stable_mosaic.version = 11 : i64} {
  func.func @block_kernel(%arg0: i32, %arg1: memref<1x16x128xf32, #tpu.memory_space<vmem>>, %arg2: memref<1x128xf32, #tpu.memory_space<vmem>>, %arg3: memref<1x128xf32, #tpu.memory_space<vmem>>, %arg4: memref<128x384xbf16, #tpu.memory_space<vmem>>, %arg5: memref<128x128xbf16, #tpu.memory_space<vmem>>, %arg6: memref<1x128xf32, #tpu.memory_space<vmem>>, %arg7: memref<1x128xf32, #tpu.memory_space<vmem>>, %arg8: memref<1x128xf32, #tpu.memory_space<vmem>>, %arg9: memref<128x4xf32, #tpu.memory_space<vmem>>, %arg10: memref<1x4xf32, #tpu.memory_space<vmem>>, %arg11: memref<4x128x512xbf16, #tpu.memory_space<vmem>>, %arg12: memref<4x1x512xf32, #tpu.memory_space<vmem>>, %arg13: memref<4x512x128xbf16, #tpu.memory_space<vmem>>, %arg14: memref<4x1x128xf32, #tpu.memory_space<vmem>>, %arg15: memref<16x16xf32, #tpu.memory_space<vmem>>, %arg16: memref<1x16x128xf32, #tpu.memory_space<vmem>>, %arg17: memref<1x2x4xf32, #tpu.memory_space<vmem>>) attributes {dimension_semantics = [#tpu.dimension_semantics<parallel>], iteration_bounds = array<i64: 2>, scalar_prefetch = 0 : i64, scratch_operands = 0 : i64, tpu.core_type = #tpu.core_type<tc>, window_params = [{transform_indices = @transform_0, window_bounds = array<i64: 1, 16, 128>}, {pipeline_mode = #tpu.pipeline_mode<synchronous>, transform_indices = @transform_1, window_bounds = array<i64: 1, 128>}, {pipeline_mode = #tpu.pipeline_mode<synchronous>, transform_indices = @transform_2, window_bounds = array<i64: 1, 128>}, {pipeline_mode = #tpu.pipeline_mode<synchronous>, transform_indices = @transform_3, window_bounds = array<i64: 128, 384>}, {pipeline_mode = #tpu.pipeline_mode<synchronous>, transform_indices = @transform_4, window_bounds = array<i64: 128, 128>}, {pipeline_mode = #tpu.pipeline_mode<synchronous>, transform_indices = @transform_5, window_bounds = array<i64: 1, 128>}, {pipeline_mode = #tpu.pipeline_mode<synchronous>, transform_indices = @transform_6, window_bounds = array<i64: 1, 128>}, {pipeline_mode = #tpu.pipeline_mode<synchronous>, transform_indices = @transform_7, window_bounds = array<i64: 1, 128>}, {pipeline_mode = #tpu.pipeline_mode<synchronous>, transform_indices = @transform_8, window_bounds = array<i64: 128, 4>}, {pipeline_mode = #tpu.pipeline_mode<synchronous>, transform_indices = @transform_9, window_bounds = array<i64: 1, 4>}, {pipeline_mode = #tpu.pipeline_mode<synchronous>, transform_indices = @transform_10, window_bounds = array<i64: 4, 128, 512>}, {pipeline_mode = #tpu.pipeline_mode<synchronous>, transform_indices = @transform_11, window_bounds = array<i64: 4, 1, 512>}, {pipeline_mode = #tpu.pipeline_mode<synchronous>, transform_indices = @transform_12, window_bounds = array<i64: 4, 512, 128>}, {pipeline_mode = #tpu.pipeline_mode<synchronous>, transform_indices = @transform_13, window_bounds = array<i64: 4, 1, 128>}, {pipeline_mode = #tpu.pipeline_mode<synchronous>, transform_indices = @transform_14, window_bounds = array<i64: 16, 16>}, {transform_indices = @transform_15, window_bounds = array<i64: 1, 16, 128>}, {transform_indices = @transform_16, window_bounds = array<i64: 1, 2, 4>}]} {
    %c0 = arith.constant 0 : index
    %c0_0 = arith.constant 0 : index
    %c0_1 = arith.constant 0 : index
    %0 = vector.load %arg1[%c0, %c0_0, %c0_1] : memref<1x16x128xf32, #tpu.memory_space<vmem>>, vector<1x16x128xf32>
    %1 = vector.shape_cast %0 : vector<1x16x128xf32> to vector<16x128xf32>
    %c0_2 = arith.constant 0 : index
    %c0_3 = arith.constant 0 : index
    %2 = vector.load %arg2[%c0_2, %c0_3] : memref<1x128xf32, #tpu.memory_space<vmem>>, vector<1x128xf32>
    %c0_4 = arith.constant 0 : index
    %c0_5 = arith.constant 0 : index
    %3 = vector.load %arg3[%c0_4, %c0_5] : memref<1x128xf32, #tpu.memory_space<vmem>>, vector<1x128xf32>
    %cst = arith.constant dense<0.000000e+00> : vector<16xf32>
    %4 = vector.multi_reduction <add>, %1, %cst [1] : vector<16x128xf32> to vector<16xf32>
    %5 = vector.shape_cast %4 : vector<16xf32> to vector<16x1xf32>
    %cst_6 = arith.constant 1.280000e+02 : f32
    %6 = vector.broadcast %cst_6 : f32 to vector<16x1xf32>
    %7 = arith.divf %5, %6 : vector<16x1xf32>
    %8 = vector.broadcast %7 : vector<16x1xf32> to vector<16x128xf32>
    %9 = arith.subf %1, %8 : vector<16x128xf32>
    %10 = arith.mulf %9, %9 : vector<16x128xf32>
    %cst_7 = arith.constant dense<0.000000e+00> : vector<16xf32>
    %11 = vector.multi_reduction <add>, %10, %cst_7 [1] : vector<16x128xf32> to vector<16xf32>
    %12 = vector.shape_cast %11 : vector<16xf32> to vector<16x1xf32>
    %cst_8 = arith.constant 1.280000e+02 : f32
    %13 = vector.broadcast %cst_8 : f32 to vector<16x1xf32>
    %14 = arith.divf %12, %13 : vector<16x1xf32>
    %cst_9 = arith.constant 9.99999974E-6 : f32
    %15 = vector.broadcast %cst_9 : f32 to vector<16x1xf32>
    %16 = arith.addf %14, %15 : vector<16x1xf32>
    %17 = math.rsqrt %16 : vector<16x1xf32>
    %18 = vector.broadcast %17 : vector<16x1xf32> to vector<16x128xf32>
    %19 = arith.mulf %9, %18 : vector<16x128xf32>
    %20 = vector.broadcast %2 : vector<1x128xf32> to vector<16x128xf32>
    %21 = arith.mulf %19, %20 : vector<16x128xf32>
    %22 = vector.broadcast %3 : vector<1x128xf32> to vector<16x128xf32>
    %23 = arith.addf %21, %22 : vector<16x128xf32>
    %24 = arith.truncf %23 : vector<16x128xf32> to vector<16x128xbf16>
    %c0_10 = arith.constant 0 : index
    %c0_11 = arith.constant 0 : index
    %25 = vector.load %arg4[%c0_10, %c0_11] : memref<128x384xbf16, #tpu.memory_space<vmem>>, vector<128x384xbf16>
    %cst_12 = arith.constant dense<0.000000e+00> : vector<16x384xf32>
    %26 = tpu.matmul %24, %25, %cst_12 {dimension_numbers = #tpu.dot_dimension_numbers<[1], [0], [0], [1], [0, 0, 1, 1], [], []>} : vector<16x128xbf16>, vector<128x384xbf16>, vector<16x384xf32> -> vector<16x384xf32>
    %c0_13 = arith.constant 0 : index
    %c0_14 = arith.constant 0 : index
    %27 = vector.load %arg15[%c0_13, %c0_14] : memref<16x16xf32, #tpu.memory_space<vmem>>, vector<16x16xf32>
    %28 = vector.extract_strided_slice %26 {offsets = [0, 0], sizes = [16, 128], strides = [1, 1]} : vector<16x384xf32> to vector<16x128xf32>
    %29 = vector.shape_cast %28 : vector<16x128xf32> to vector<16x4x32xf32>
    %30 = tpu.transpose %29, [1, 0, 2] : vector<16x4x32xf32> -> vector<4x16x32xf32>
    %31 = vector.extract_strided_slice %26 {offsets = [0, 128], sizes = [16, 128], strides = [1, 1]} : vector<16x384xf32> to vector<16x128xf32>
    %32 = vector.shape_cast %31 : vector<16x128xf32> to vector<16x4x32xf32>
    %33 = tpu.transpose %32, [1, 0, 2] : vector<16x4x32xf32> -> vector<4x16x32xf32>
    %34 = vector.extract_strided_slice %26 {offsets = [0, 256], sizes = [16, 128], strides = [1, 1]} : vector<16x384xf32> to vector<16x128xf32>
    %35 = vector.shape_cast %34 : vector<16x128xf32> to vector<16x4x32xf32>
    %36 = tpu.transpose %35, [1, 0, 2] : vector<16x4x32xf32> -> vector<4x16x32xf32>
    %37 = arith.truncf %30 : vector<4x16x32xf32> to vector<4x16x32xbf16>
    %38 = arith.truncf %33 : vector<4x16x32xf32> to vector<4x16x32xbf16>
    "tpu.trace_start"() <{level = 10 : i32, message = "hqd,hkd->hqk"}> : () -> ()
    %cst_15 = arith.constant dense<0.000000e+00> : vector<4x16x16xf32>
    %39 = tpu.matmul %37, %38, %cst_15 {dimension_numbers = #tpu.dot_dimension_numbers<[2], [2], [1], [1], [0, 0, 0, 1, 1, 1], [0], [0]>} : vector<4x16x32xbf16>, vector<4x16x32xbf16>, vector<4x16x16xf32> -> vector<4x16x16xf32>
    "tpu.trace_stop"() : () -> ()
    %cst_16 = arith.constant 0.176776692 : f32
    %40 = vector.broadcast %cst_16 : f32 to vector<4x16x16xf32>
    %41 = arith.mulf %39, %40 : vector<4x16x16xf32>
    %42 = vector.shape_cast %27 : vector<16x16xf32> to vector<1x16x16xf32>
    %43 = vector.broadcast %42 : vector<1x16x16xf32> to vector<4x16x16xf32>
    %44 = arith.addf %41, %43 : vector<4x16x16xf32>
    %cst_17 = arith.constant dense<0xFF800000> : vector<4x16xf32>
    %45 = vector.multi_reduction <maximumf>, %44, %cst_17 [2] : vector<4x16x16xf32> to vector<4x16xf32>
    %46 = vector.shape_cast %45 : vector<4x16xf32> to vector<4x16x1xf32>
    %47 = vector.broadcast %46 : vector<4x16x1xf32> to vector<4x16x16xf32>
    %48 = arith.subf %44, %47 : vector<4x16x16xf32>
    %49 = math.exp %48 : vector<4x16x16xf32>
    %cst_18 = arith.constant dense<0.000000e+00> : vector<4x16xf32>
    %50 = vector.multi_reduction <add>, %49, %cst_18 [2] : vector<4x16x16xf32> to vector<4x16xf32>
    %51 = vector.shape_cast %50 : vector<4x16xf32> to vector<4x16x1xf32>
    %52 = vector.broadcast %51 : vector<4x16x1xf32> to vector<4x16x16xf32>
    %53 = arith.divf %49, %52 : vector<4x16x16xf32>
    %54 = arith.truncf %53 : vector<4x16x16xf32> to vector<4x16x16xbf16>
    %55 = arith.truncf %36 : vector<4x16x32xf32> to vector<4x16x32xbf16>
    "tpu.trace_start"() <{level = 10 : i32, message = "hqk,hkd->hqd"}> : () -> ()
    %cst_19 = arith.constant dense<0.000000e+00> : vector<4x16x32xf32>
    %56 = tpu.matmul %54, %55, %cst_19 {dimension_numbers = #tpu.dot_dimension_numbers<[2], [1], [1], [2], [0, 0, 0, 1, 1, 2], [0], [0]>} : vector<4x16x16xbf16>, vector<4x16x32xbf16>, vector<4x16x32xf32> -> vector<4x16x32xf32>
    "tpu.trace_stop"() : () -> ()
    %57 = tpu.transpose %56, [1, 0, 2] : vector<4x16x32xf32> -> vector<16x4x32xf32>
    %58 = vector.shape_cast %57 : vector<16x4x32xf32> to vector<16x128xf32>
    %59 = arith.truncf %58 : vector<16x128xf32> to vector<16x128xbf16>
    %c0_20 = arith.constant 0 : index
    %c0_21 = arith.constant 0 : index
    %60 = vector.load %arg5[%c0_20, %c0_21] : memref<128x128xbf16, #tpu.memory_space<vmem>>, vector<128x128xbf16>
    %cst_22 = arith.constant dense<0.000000e+00> : vector<16x128xf32>
    %61 = tpu.matmul %59, %60, %cst_22 {dimension_numbers = #tpu.dot_dimension_numbers<[1], [0], [0], [1], [0, 0, 1, 1], [], []>} : vector<16x128xbf16>, vector<128x128xbf16>, vector<16x128xf32> -> vector<16x128xf32>
    %c0_23 = arith.constant 0 : index
    %c0_24 = arith.constant 0 : index
    %62 = vector.load %arg6[%c0_23, %c0_24] : memref<1x128xf32, #tpu.memory_space<vmem>>, vector<1x128xf32>
    %63 = vector.broadcast %62 : vector<1x128xf32> to vector<16x128xf32>
    %64 = arith.addf %61, %63 : vector<16x128xf32>
    %65 = arith.addf %1, %64 : vector<16x128xf32>
    %c0_25 = arith.constant 0 : index
    %c0_26 = arith.constant 0 : index
    %66 = vector.load %arg7[%c0_25, %c0_26] : memref<1x128xf32, #tpu.memory_space<vmem>>, vector<1x128xf32>
    %c0_27 = arith.constant 0 : index
    %c0_28 = arith.constant 0 : index
    %67 = vector.load %arg8[%c0_27, %c0_28] : memref<1x128xf32, #tpu.memory_space<vmem>>, vector<1x128xf32>
    %cst_29 = arith.constant dense<0.000000e+00> : vector<16xf32>
    %68 = vector.multi_reduction <add>, %65, %cst_29 [1] : vector<16x128xf32> to vector<16xf32>
    %69 = vector.shape_cast %68 : vector<16xf32> to vector<16x1xf32>
    %cst_30 = arith.constant 1.280000e+02 : f32
    %70 = vector.broadcast %cst_30 : f32 to vector<16x1xf32>
    %71 = arith.divf %69, %70 : vector<16x1xf32>
    %72 = vector.broadcast %71 : vector<16x1xf32> to vector<16x128xf32>
    %73 = arith.subf %65, %72 : vector<16x128xf32>
    %74 = arith.mulf %73, %73 : vector<16x128xf32>
    %cst_31 = arith.constant dense<0.000000e+00> : vector<16xf32>
    %75 = vector.multi_reduction <add>, %74, %cst_31 [1] : vector<16x128xf32> to vector<16xf32>
    %76 = vector.shape_cast %75 : vector<16xf32> to vector<16x1xf32>
    %cst_32 = arith.constant 1.280000e+02 : f32
    %77 = vector.broadcast %cst_32 : f32 to vector<16x1xf32>
    %78 = arith.divf %76, %77 : vector<16x1xf32>
    %cst_33 = arith.constant 9.99999974E-6 : f32
    %79 = vector.broadcast %cst_33 : f32 to vector<16x1xf32>
    %80 = arith.addf %78, %79 : vector<16x1xf32>
    %81 = math.rsqrt %80 : vector<16x1xf32>
    %82 = vector.broadcast %81 : vector<16x1xf32> to vector<16x128xf32>
    %83 = arith.mulf %73, %82 : vector<16x128xf32>
    %84 = vector.broadcast %66 : vector<1x128xf32> to vector<16x128xf32>
    %85 = arith.mulf %83, %84 : vector<16x128xf32>
    %86 = vector.broadcast %67 : vector<1x128xf32> to vector<16x128xf32>
    %87 = arith.addf %85, %86 : vector<16x128xf32>
    %88 = arith.truncf %87 : vector<16x128xf32> to vector<16x128xbf16>
    %c0_34 = arith.constant 0 : index
    %c0_35 = arith.constant 0 : index
    %89 = vector.load %arg9[%c0_34, %c0_35] : memref<128x4xf32, #tpu.memory_space<vmem>>, vector<128x4xf32>
    %cst_36 = arith.constant dense<0.000000e+00> : vector<16x4xf32>
    %90 = tpu.matmul %87, %89, %cst_36 {dimension_numbers = #tpu.dot_dimension_numbers<[1], [0], [0], [1], [0, 0, 1, 1], [], []>} : vector<16x128xf32>, vector<128x4xf32>, vector<16x4xf32> -> vector<16x4xf32>
    %c0_37 = arith.constant 0 : index
    %c0_38 = arith.constant 0 : index
    %91 = vector.load %arg10[%c0_37, %c0_38] : memref<1x4xf32, #tpu.memory_space<vmem>>, vector<1x4xf32>
    %92 = vector.broadcast %91 : vector<1x4xf32> to vector<16x4xf32>
    %93 = arith.addf %90, %92 : vector<16x4xf32>
    %cst_39 = arith.constant dense<0xFF800000> : vector<16xf32>
    %94 = vector.multi_reduction <maximumf>, %93, %cst_39 [1] : vector<16x4xf32> to vector<16xf32>
    %95 = vector.shape_cast %94 : vector<16xf32> to vector<16x1xf32>
    %96 = vector.broadcast %95 : vector<16x1xf32> to vector<16x4xf32>
    %97 = arith.subf %93, %96 : vector<16x4xf32>
    %98 = math.exp %97 : vector<16x4xf32>
    %cst_40 = arith.constant dense<0.000000e+00> : vector<16xf32>
    %99 = vector.multi_reduction <add>, %98, %cst_40 [1] : vector<16x4xf32> to vector<16xf32>
    %100 = vector.shape_cast %99 : vector<16xf32> to vector<16x1xf32>
    %101 = vector.broadcast %100 : vector<16x1xf32> to vector<16x4xf32>
    %102 = arith.divf %98, %101 : vector<16x4xf32>
    %cst_41 = arith.constant dense<0xFF800000> : vector<16xf32>
    %103 = vector.multi_reduction <maximumf>, %102, %cst_41 [1] : vector<16x4xf32> to vector<16xf32>
    %104 = vector.shape_cast %103 : vector<16xf32> to vector<16x1xf32>
    %105 = tpu.iota {dimensions = array<i32: 1>} : vector<16x4xi32>
    %106 = vector.broadcast %104 : vector<16x1xf32> to vector<16x4xf32>
    %107 = arith.cmpf oeq, %102, %106 : vector<16x4xf32>
    %108 = arith.sitofp %105 : vector<16x4xi32> to vector<16x4xf32>
    %cst_42 = arith.constant 4.000000e+00 : f32
    %109 = vector.broadcast %cst_42 : f32 to vector<16x4xf32>
    %110 = arith.select %107, %108, %109 : vector<16x4xi1>, vector<16x4xf32>
    %cst_43 = arith.constant dense<0x7F800000> : vector<16xf32>
    %111 = vector.multi_reduction <minimumf>, %110, %cst_43 [1] : vector<16x4xf32> to vector<16xf32>
    %112 = vector.shape_cast %111 : vector<16xf32> to vector<16x1xf32>
    %113 = arith.fptosi %112 : vector<16x1xf32> to vector<16x1xi32>
    %114 = vector.broadcast %113 : vector<16x1xi32> to vector<16x4xi32>
    %115 = arith.cmpi eq, %105, %114 : vector<16x4xi32>
    %116 = arith.extui %115 : vector<16x4xi1> to vector<16x4xi32>
    %117 = arith.sitofp %116 : vector<16x4xi32> to vector<16x4xf32>
    %cst_44 = arith.constant dense<0.000000e+00> : vector<4xf32>
    %118 = vector.multi_reduction <add>, %102, %cst_44 [0] : vector<16x4xf32> to vector<4xf32>
    %119 = vector.shape_cast %118 : vector<4xf32> to vector<1x4xf32>
    %cst_45 = arith.constant dense<0.000000e+00> : vector<4xf32>
    %120 = vector.multi_reduction <add>, %117, %cst_45 [0] : vector<16x4xf32> to vector<4xf32>
    %121 = vector.shape_cast %120 : vector<4xf32> to vector<1x4xf32>
    %122 = tpu.concatenate %119, %121 in 0 : vector<1x4xf32>, vector<1x4xf32> -> vector<2x4xf32>
    %123 = vector.shape_cast %122 : vector<2x4xf32> to vector<1x2x4xf32>
    %c0_46 = arith.constant 0 : index
    %c0_47 = arith.constant 0 : index
    %c0_48 = arith.constant 0 : index
    %124 = vector.load %arg17[%c0_46, %c0_47, %c0_48] : memref<1x2x4xf32, #tpu.memory_space<vmem>>, vector<1x2x4xf32>
    tpu.vector_store %arg17[%c0_46, %c0_47, %c0_48], %123 {strides = array<i32>} : memref<1x2x4xf32, #tpu.memory_space<vmem>>, vector<1x2x4xf32>,
    %c0_49 = arith.constant 0 : index
    %c0_50 = arith.constant 0 : index
    %c0_51 = arith.constant 0 : index
    %125 = vector.load %arg11[%c0_49, %c0_50, %c0_51] : memref<4x128x512xbf16, #tpu.memory_space<vmem>>, vector<1x128x512xbf16>
    %126 = vector.shape_cast %125 : vector<1x128x512xbf16> to vector<128x512xbf16>
    %cst_52 = arith.constant dense<0.000000e+00> : vector<16x512xf32>
    %127 = tpu.matmul %88, %126, %cst_52 {dimension_numbers = #tpu.dot_dimension_numbers<[1], [0], [0], [1], [0, 0, 1, 1], [], []>} : vector<16x128xbf16>, vector<128x512xbf16>, vector<16x512xf32> -> vector<16x512xf32>
    %c0_53 = arith.constant 0 : index
    %c0_54 = arith.constant 0 : index
    %c0_55 = arith.constant 0 : index
    %128 = vector.load %arg12[%c0_53, %c0_54, %c0_55] : memref<4x1x512xf32, #tpu.memory_space<vmem>>, vector<1x1x512xf32>
    %129 = vector.shape_cast %128 : vector<1x1x512xf32> to vector<1x512xf32>
    %130 = vector.broadcast %129 : vector<1x512xf32> to vector<16x512xf32>
    %131 = arith.addf %127, %130 : vector<16x512xf32>
    %cst_56 = arith.constant 0.000000e+00 : f32
    %132 = vector.broadcast %cst_56 : f32 to vector<16x512xf32>
    %133 = arith.maximumf %131, %132 : vector<16x512xf32>
    %134 = arith.truncf %133 : vector<16x512xf32> to vector<16x512xbf16>
    %c0_57 = arith.constant 0 : index
    %c0_58 = arith.constant 0 : index
    %c0_59 = arith.constant 0 : index
    %135 = vector.load %arg13[%c0_57, %c0_58, %c0_59] : memref<4x512x128xbf16, #tpu.memory_space<vmem>>, vector<1x512x128xbf16>
    %136 = vector.shape_cast %135 : vector<1x512x128xbf16> to vector<512x128xbf16>
    %cst_60 = arith.constant dense<0.000000e+00> : vector<16x128xf32>
    %137 = tpu.matmul %134, %136, %cst_60 {dimension_numbers = #tpu.dot_dimension_numbers<[1], [0], [0], [1], [0, 0, 1, 1], [], []>} : vector<16x512xbf16>, vector<512x128xbf16>, vector<16x128xf32> -> vector<16x128xf32>
    %c0_61 = arith.constant 0 : index
    %c0_62 = arith.constant 0 : index
    %c0_63 = arith.constant 0 : index
    %138 = vector.load %arg14[%c0_61, %c0_62, %c0_63] : memref<4x1x128xf32, #tpu.memory_space<vmem>>, vector<1x1x128xf32>
    %139 = vector.shape_cast %138 : vector<1x1x128xf32> to vector<1x128xf32>
    %140 = vector.broadcast %139 : vector<1x128xf32> to vector<16x128xf32>
    %141 = arith.addf %137, %140 : vector<16x128xf32>
    %c0_i32 = arith.constant 0 : i32
    %142 = vector.broadcast %c0_i32 : i32 to vector<16x1xi32>
    %143 = arith.cmpi eq, %113, %142 : vector<16x1xi32>
    %cst_64 = arith.constant 0.000000e+00 : f32
    %144 = vector.broadcast %cst_64 : f32 to vector<16x1xf32>
    %145 = arith.select %143, %104, %144 : vector<16x1xi1>, vector<16x1xf32>
    %146 = vector.broadcast %145 : vector<16x1xf32> to vector<16x128xf32>
    %147 = arith.mulf %146, %141 : vector<16x128xf32>
    %148 = arith.addf %65, %147 : vector<16x128xf32>
    %c1 = arith.constant 1 : index
    %c0_65 = arith.constant 0 : index
    %c0_66 = arith.constant 0 : index
    %149 = vector.load %arg11[%c1, %c0_65, %c0_66] : memref<4x128x512xbf16, #tpu.memory_space<vmem>>, vector<1x128x512xbf16>
    %150 = vector.shape_cast %149 : vector<1x128x512xbf16> to vector<128x512xbf16>
    %cst_67 = arith.constant dense<0.000000e+00> : vector<16x512xf32>
    %151 = tpu.matmul %88, %150, %cst_67 {dimension_numbers = #tpu.dot_dimension_numbers<[1], [0], [0], [1], [0, 0, 1, 1], [], []>} : vector<16x128xbf16>, vector<128x512xbf16>, vector<16x512xf32> -> vector<16x512xf32>
    %c1_68 = arith.constant 1 : index
    %c0_69 = arith.constant 0 : index
    %c0_70 = arith.constant 0 : index
    %152 = vector.load %arg12[%c1_68, %c0_69, %c0_70] : memref<4x1x512xf32, #tpu.memory_space<vmem>>, vector<1x1x512xf32>
    %153 = vector.shape_cast %152 : vector<1x1x512xf32> to vector<1x512xf32>
    %154 = vector.broadcast %153 : vector<1x512xf32> to vector<16x512xf32>
    %155 = arith.addf %151, %154 : vector<16x512xf32>
    %cst_71 = arith.constant 0.000000e+00 : f32
    %156 = vector.broadcast %cst_71 : f32 to vector<16x512xf32>
    %157 = arith.maximumf %155, %156 : vector<16x512xf32>
    %158 = arith.truncf %157 : vector<16x512xf32> to vector<16x512xbf16>
    %c1_72 = arith.constant 1 : index
    %c0_73 = arith.constant 0 : index
    %c0_74 = arith.constant 0 : index
    %159 = vector.load %arg13[%c1_72, %c0_73, %c0_74] : memref<4x512x128xbf16, #tpu.memory_space<vmem>>, vector<1x512x128xbf16>
    %160 = vector.shape_cast %159 : vector<1x512x128xbf16> to vector<512x128xbf16>
    %cst_75 = arith.constant dense<0.000000e+00> : vector<16x128xf32>
    %161 = tpu.matmul %158, %160, %cst_75 {dimension_numbers = #tpu.dot_dimension_numbers<[1], [0], [0], [1], [0, 0, 1, 1], [], []>} : vector<16x512xbf16>, vector<512x128xbf16>, vector<16x128xf32> -> vector<16x128xf32>
    %c1_76 = arith.constant 1 : index
    %c0_77 = arith.constant 0 : index
    %c0_78 = arith.constant 0 : index
    %162 = vector.load %arg14[%c1_76, %c0_77, %c0_78] : memref<4x1x128xf32, #tpu.memory_space<vmem>>, vector<1x1x128xf32>
    %163 = vector.shape_cast %162 : vector<1x1x128xf32> to vector<1x128xf32>
    %164 = vector.broadcast %163 : vector<1x128xf32> to vector<16x128xf32>
    %165 = arith.addf %161, %164 : vector<16x128xf32>
    %c1_i32 = arith.constant 1 : i32
    %166 = vector.broadcast %c1_i32 : i32 to vector<16x1xi32>
    %167 = arith.cmpi eq, %113, %166 : vector<16x1xi32>
    %cst_79 = arith.constant 0.000000e+00 : f32
    %168 = vector.broadcast %cst_79 : f32 to vector<16x1xf32>
    %169 = arith.select %167, %104, %168 : vector<16x1xi1>, vector<16x1xf32>
    %170 = vector.broadcast %169 : vector<16x1xf32> to vector<16x128xf32>
    %171 = arith.mulf %170, %165 : vector<16x128xf32>
    %172 = arith.addf %148, %171 : vector<16x128xf32>
    %c2 = arith.constant 2 : index
    %c0_80 = arith.constant 0 : index
    %c0_81 = arith.constant 0 : index
    %173 = vector.load %arg11[%c2, %c0_80, %c0_81] : memref<4x128x512xbf16, #tpu.memory_space<vmem>>, vector<1x128x512xbf16>
    %174 = vector.shape_cast %173 : vector<1x128x512xbf16> to vector<128x512xbf16>
    %cst_82 = arith.constant dense<0.000000e+00> : vector<16x512xf32>
    %175 = tpu.matmul %88, %174, %cst_82 {dimension_numbers = #tpu.dot_dimension_numbers<[1], [0], [0], [1], [0, 0, 1, 1], [], []>} : vector<16x128xbf16>, vector<128x512xbf16>, vector<16x512xf32> -> vector<16x512xf32>
    %c2_83 = arith.constant 2 : index
    %c0_84 = arith.constant 0 : index
    %c0_85 = arith.constant 0 : index
    %176 = vector.load %arg12[%c2_83, %c0_84, %c0_85] : memref<4x1x512xf32, #tpu.memory_space<vmem>>, vector<1x1x512xf32>
    %177 = vector.shape_cast %176 : vector<1x1x512xf32> to vector<1x512xf32>
    %178 = vector.broadcast %177 : vector<1x512xf32> to vector<16x512xf32>
    %179 = arith.addf %175, %178 : vector<16x512xf32>
    %cst_86 = arith.constant 0.000000e+00 : f32
    %180 = vector.broadcast %cst_86 : f32 to vector<16x512xf32>
    %181 = arith.maximumf %179, %180 : vector<16x512xf32>
    %182 = arith.truncf %181 : vector<16x512xf32> to vector<16x512xbf16>
    %c2_87 = arith.constant 2 : index
    %c0_88 = arith.constant 0 : index
    %c0_89 = arith.constant 0 : index
    %183 = vector.load %arg13[%c2_87, %c0_88, %c0_89] : memref<4x512x128xbf16, #tpu.memory_space<vmem>>, vector<1x512x128xbf16>
    %184 = vector.shape_cast %183 : vector<1x512x128xbf16> to vector<512x128xbf16>
    %cst_90 = arith.constant dense<0.000000e+00> : vector<16x128xf32>
    %185 = tpu.matmul %182, %184, %cst_90 {dimension_numbers = #tpu.dot_dimension_numbers<[1], [0], [0], [1], [0, 0, 1, 1], [], []>} : vector<16x512xbf16>, vector<512x128xbf16>, vector<16x128xf32> -> vector<16x128xf32>
    %c2_91 = arith.constant 2 : index
    %c0_92 = arith.constant 0 : index
    %c0_93 = arith.constant 0 : index
    %186 = vector.load %arg14[%c2_91, %c0_92, %c0_93] : memref<4x1x128xf32, #tpu.memory_space<vmem>>, vector<1x1x128xf32>
    %187 = vector.shape_cast %186 : vector<1x1x128xf32> to vector<1x128xf32>
    %188 = vector.broadcast %187 : vector<1x128xf32> to vector<16x128xf32>
    %189 = arith.addf %185, %188 : vector<16x128xf32>
    %c2_i32 = arith.constant 2 : i32
    %190 = vector.broadcast %c2_i32 : i32 to vector<16x1xi32>
    %191 = arith.cmpi eq, %113, %190 : vector<16x1xi32>
    %cst_94 = arith.constant 0.000000e+00 : f32
    %192 = vector.broadcast %cst_94 : f32 to vector<16x1xf32>
    %193 = arith.select %191, %104, %192 : vector<16x1xi1>, vector<16x1xf32>
    %194 = vector.broadcast %193 : vector<16x1xf32> to vector<16x128xf32>
    %195 = arith.mulf %194, %189 : vector<16x128xf32>
    %196 = arith.addf %172, %195 : vector<16x128xf32>
    %c3 = arith.constant 3 : index
    %c0_95 = arith.constant 0 : index
    %c0_96 = arith.constant 0 : index
    %197 = vector.load %arg11[%c3, %c0_95, %c0_96] : memref<4x128x512xbf16, #tpu.memory_space<vmem>>, vector<1x128x512xbf16>
    %198 = vector.shape_cast %197 : vector<1x128x512xbf16> to vector<128x512xbf16>
    %cst_97 = arith.constant dense<0.000000e+00> : vector<16x512xf32>
    %199 = tpu.matmul %88, %198, %cst_97 {dimension_numbers = #tpu.dot_dimension_numbers<[1], [0], [0], [1], [0, 0, 1, 1], [], []>} : vector<16x128xbf16>, vector<128x512xbf16>, vector<16x512xf32> -> vector<16x512xf32>
    %c3_98 = arith.constant 3 : index
    %c0_99 = arith.constant 0 : index
    %c0_100 = arith.constant 0 : index
    %200 = vector.load %arg12[%c3_98, %c0_99, %c0_100] : memref<4x1x512xf32, #tpu.memory_space<vmem>>, vector<1x1x512xf32>
    %201 = vector.shape_cast %200 : vector<1x1x512xf32> to vector<1x512xf32>
    %202 = vector.broadcast %201 : vector<1x512xf32> to vector<16x512xf32>
    %203 = arith.addf %199, %202 : vector<16x512xf32>
    %cst_101 = arith.constant 0.000000e+00 : f32
    %204 = vector.broadcast %cst_101 : f32 to vector<16x512xf32>
    %205 = arith.maximumf %203, %204 : vector<16x512xf32>
    %206 = arith.truncf %205 : vector<16x512xf32> to vector<16x512xbf16>
    %c3_102 = arith.constant 3 : index
    %c0_103 = arith.constant 0 : index
    %c0_104 = arith.constant 0 : index
    %207 = vector.load %arg13[%c3_102, %c0_103, %c0_104] : memref<4x512x128xbf16, #tpu.memory_space<vmem>>, vector<1x512x128xbf16>
    %208 = vector.shape_cast %207 : vector<1x512x128xbf16> to vector<512x128xbf16>
    %cst_105 = arith.constant dense<0.000000e+00> : vector<16x128xf32>
    %209 = tpu.matmul %206, %208, %cst_105 {dimension_numbers = #tpu.dot_dimension_numbers<[1], [0], [0], [1], [0, 0, 1, 1], [], []>} : vector<16x512xbf16>, vector<512x128xbf16>, vector<16x128xf32> -> vector<16x128xf32>
    %c3_106 = arith.constant 3 : index
    %c0_107 = arith.constant 0 : index
    %c0_108 = arith.constant 0 : index
    %210 = vector.load %arg14[%c3_106, %c0_107, %c0_108] : memref<4x1x128xf32, #tpu.memory_space<vmem>>, vector<1x1x128xf32>
    %211 = vector.shape_cast %210 : vector<1x1x128xf32> to vector<1x128xf32>
    %212 = vector.broadcast %211 : vector<1x128xf32> to vector<16x128xf32>
    %213 = arith.addf %209, %212 : vector<16x128xf32>
    %c3_i32 = arith.constant 3 : i32
    %214 = vector.broadcast %c3_i32 : i32 to vector<16x1xi32>
    %215 = arith.cmpi eq, %113, %214 : vector<16x1xi32>
    %cst_109 = arith.constant 0.000000e+00 : f32
    %216 = vector.broadcast %cst_109 : f32 to vector<16x1xf32>
    %217 = arith.select %215, %104, %216 : vector<16x1xi1>, vector<16x1xf32>
    %218 = vector.broadcast %217 : vector<16x1xf32> to vector<16x128xf32>
    %219 = arith.mulf %218, %213 : vector<16x128xf32>
    %220 = arith.addf %196, %219 : vector<16x128xf32>
    %221 = vector.shape_cast %220 : vector<16x128xf32> to vector<1x16x128xf32>
    %c0_110 = arith.constant 0 : index
    %c0_111 = arith.constant 0 : index
    %c0_112 = arith.constant 0 : index
    %222 = vector.load %arg16[%c0_110, %c0_111, %c0_112] : memref<1x16x128xf32, #tpu.memory_space<vmem>>, vector<1x16x128xf32>
    tpu.vector_store %arg16[%c0_110, %c0_111, %c0_112], %221 {strides = array<i32>} : memref<1x16x128xf32, #tpu.memory_space<vmem>>, vector<1x16x128xf32>,
    return
  }
  func.func @transform_0(%arg0: i32) -> (i32, i32, i32) {
    %c0_i32 = arith.constant 0 : i32
    %c0_i32_0 = arith.constant 0 : i32
    %c0_i32_1 = arith.constant 0 : i32
    return %arg0, %c0_i32, %c0_i32_0 : i32, i32, i32
  }
  func.func @transform_1(%arg0: i32) -> (i32, i32) {
    %c0_i32 = arith.constant 0 : i32
    %c0_i32_0 = arith.constant 0 : i32
    %c0_i32_1 = arith.constant 0 : i32
    return %c0_i32, %c0_i32_0 : i32, i32
  }
  func.func @transform_2(%arg0: i32) -> (i32, i32) {
    %c0_i32 = arith.constant 0 : i32
    %c0_i32_0 = arith.constant 0 : i32
    %c0_i32_1 = arith.constant 0 : i32
    return %c0_i32, %c0_i32_0 : i32, i32
  }
  func.func @transform_3(%arg0: i32) -> (i32, i32) {
    %c0_i32 = arith.constant 0 : i32
    %c0_i32_0 = arith.constant 0 : i32
    %c0_i32_1 = arith.constant 0 : i32
    return %c0_i32, %c0_i32_0 : i32, i32
  }
  func.func @transform_4(%arg0: i32) -> (i32, i32) {
    %c0_i32 = arith.constant 0 : i32
    %c0_i32_0 = arith.constant 0 : i32
    %c0_i32_1 = arith.constant 0 : i32
    return %c0_i32, %c0_i32_0 : i32, i32
  }
  func.func @transform_5(%arg0: i32) -> (i32, i32) {
    %c0_i32 = arith.constant 0 : i32
    %c0_i32_0 = arith.constant 0 : i32
    %c0_i32_1 = arith.constant 0 : i32
    return %c0_i32, %c0_i32_0 : i32, i32
  }
  func.func @transform_6(%arg0: i32) -> (i32, i32) {
    %c0_i32 = arith.constant 0 : i32
    %c0_i32_0 = arith.constant 0 : i32
    %c0_i32_1 = arith.constant 0 : i32
    return %c0_i32, %c0_i32_0 : i32, i32
  }
  func.func @transform_7(%arg0: i32) -> (i32, i32) {
    %c0_i32 = arith.constant 0 : i32
    %c0_i32_0 = arith.constant 0 : i32
    %c0_i32_1 = arith.constant 0 : i32
    return %c0_i32, %c0_i32_0 : i32, i32
  }
  func.func @transform_8(%arg0: i32) -> (i32, i32) {
    %c0_i32 = arith.constant 0 : i32
    %c0_i32_0 = arith.constant 0 : i32
    %c0_i32_1 = arith.constant 0 : i32
    return %c0_i32, %c0_i32_0 : i32, i32
  }
  func.func @transform_9(%arg0: i32) -> (i32, i32) {
    %c0_i32 = arith.constant 0 : i32
    %c0_i32_0 = arith.constant 0 : i32
    %c0_i32_1 = arith.constant 0 : i32
    return %c0_i32, %c0_i32_0 : i32, i32
  }
  func.func @transform_10(%arg0: i32) -> (i32, i32, i32) {
    %c0_i32 = arith.constant 0 : i32
    %c0_i32_0 = arith.constant 0 : i32
    %c0_i32_1 = arith.constant 0 : i32
    %c0_i32_2 = arith.constant 0 : i32
    return %c0_i32, %c0_i32_0, %c0_i32_1 : i32, i32, i32
  }
  func.func @transform_11(%arg0: i32) -> (i32, i32, i32) {
    %c0_i32 = arith.constant 0 : i32
    %c0_i32_0 = arith.constant 0 : i32
    %c0_i32_1 = arith.constant 0 : i32
    %c0_i32_2 = arith.constant 0 : i32
    return %c0_i32, %c0_i32_0, %c0_i32_1 : i32, i32, i32
  }
  func.func @transform_12(%arg0: i32) -> (i32, i32, i32) {
    %c0_i32 = arith.constant 0 : i32
    %c0_i32_0 = arith.constant 0 : i32
    %c0_i32_1 = arith.constant 0 : i32
    %c0_i32_2 = arith.constant 0 : i32
    return %c0_i32, %c0_i32_0, %c0_i32_1 : i32, i32, i32
  }
  func.func @transform_13(%arg0: i32) -> (i32, i32, i32) {
    %c0_i32 = arith.constant 0 : i32
    %c0_i32_0 = arith.constant 0 : i32
    %c0_i32_1 = arith.constant 0 : i32
    %c0_i32_2 = arith.constant 0 : i32
    return %c0_i32, %c0_i32_0, %c0_i32_1 : i32, i32, i32
  }
  func.func @transform_14(%arg0: i32) -> (i32, i32) {
    %c0_i32 = arith.constant 0 : i32
    %c0_i32_0 = arith.constant 0 : i32
    %c0_i32_1 = arith.constant 0 : i32
    return %c0_i32, %c0_i32_0 : i32, i32
  }
  func.func @transform_15(%arg0: i32) -> (i32, i32, i32) {
    %c0_i32 = arith.constant 0 : i32
    %c0_i32_0 = arith.constant 0 : i32
    %c0_i32_1 = arith.constant 0 : i32
    return %arg0, %c0_i32, %c0_i32_0 : i32, i32, i32
  }
  func.func @transform_16(%arg0: i32) -> (i32, i32, i32) {
    %c0_i32 = arith.constant 0 : i32
    %c0_i32_0 = arith.constant 0 : i32
    %c0_i32_1 = arith.constant 0 : i32
    return %arg0, %c0_i32, %c0_i32_0 : i32, i32, i32
  }
}

</mosaic_0001>

<bundles_post_ra>
// kernel: tpu_custom_call.1
= control target key start
LH: loop header
LB: loop body
LE: loop exit
PB: predicated region body
PF: predicated region fallthrough
CT: control target
= control target key end

     0   :  { %s8142_s0 = inlined_call_operand.vmem [shape: f32[2,16,128], index: 0, kind: input, shape index: {}]   ;;  %s8143_s1 = inlined_call_operand.vmem [shape: f32[1,128], index: 1, kind: input, shape index: {}]   ;;  %s8144_s2 = inlined_call_operand.vmem [shape: f32[1,128], index: 2, kind: input, shape index: {}]   ;;  %s8145_s3 = inlined_call_operand.hbm [shape: bf16[128,384], index: 3, kind: input, shape index: {}]   ;;  %s8146_s4 = inlined_call_operand.vmem [shape: bf16[128,128], index: 4, kind: input, shape index: {}]   ;;  %s8147_s5 = inlined_call_operand.vmem [shape: f32[1,128], index: 5, kind: input, shape index: {}]   ;;  %s8148_s6 = inlined_call_operand.vmem [shape: f32[1,128], index: 6, kind: input, shape index: {}]   ;;  %s8149_s7 = inlined_call_operand.vmem [shape: f32[1,128], index: 7, kind: input, shape index: {}]   ;;  %s8150_s8 = inlined_call_operand.vmem [shape: f32[128,4], index: 8, kind: input, shape index: {}]   ;;  %s8151_s9 = inlined_call_operand.vmem [shape: f32[1,4], index: 9, kind: input, shape index: {}]   ;;  %s8152_s10 = inlined_call_operand.hbm [shape: bf16[4,128,512], index: 10, kind: input, shape index: {}]   ;;  %s8153_s11 = inlined_call_operand.vmem [shape: f32[4,1,512], index: 11, kind: input, shape index: {}]   ;;  %s8154_s12 = inlined_call_operand.hbm [shape: bf16[4,512,128], index: 12, kind: input, shape index: {}]   ;;  %s8155_s13 = inlined_call_operand.vmem [shape: f32[4,1,128], index: 13, kind: input, shape index: {}]   ;;  %s8156_s14 = inlined_call_operand.vmem [shape: f32[16,16], index: 14, kind: input, shape index: {}]   ;;  %s8157_s15 = inlined_call_operand.hbm [shape: f32[2,16,128], index: 15, kind: output, shape index: {0}]   ;;  %s8158_s16 = inlined_call_operand.hbm [shape: f32[2,2,4], index: 16, kind: output, shape index: {1}]  }
   0x1   :  { %8173 = sst [smem:[#allocation23_spill]] %s8142_s0 }
   0x2   :  { %8174 = sst [smem:[#allocation24_spill]] %s8152_s10 }
   0x3   :  { %8175 = sst [smem:[#allocation25_spill]] %s8157_s15 }
   0x4   :  { %8176 = sst [smem:[#allocation26_spill]] %s8158_s16 }
   0x5   :  { %22 = vsyncpa [#allocation3], 0 }
   0x6   :  { %23 = vsyncpa [#allocation6], 0 }
   0x7   :  { %24 = vsyncpa [#allocation4], 0 }
   0x8   :  { %26 = vsyncpa [#allocation4 + $0x1], 0 }
   0x9   :  { %27 = vsyncpa [#allocation10], 0 }
   0xa   :  { %29 = vsyncpa [#allocation10 + $0x1], 0  ;;  %s7239_s21 = smov 0   ;;  %s7241_s22 = smov 0  }
   0xb   :  { %s7243_s23 = smov 0   ;;  %s7245_s24 = smov 0  }
   0xc LB: > { %8177 = sst [smem:[#allocation15_spill]] %s7119_s21  ;;  %s7260_s25 = sadd.s32 4294967295, %s7131_s24   ;;  %s7131_s24 = sphi %s7245_s24, %s8206_s24   ;;  %s7127_s23 = sphi %s7243_s23, %s8209_s23   ;;  %s7123_s22 = sphi %s7241_s22, %s8208_s22   ;;  %s7119_s21 = sphi %s7239_s21, %s8207_s21  }
   0xd   : > { %8178 = sst [smem:[#allocation16_spill]] %s7123_s22  ;;  %s5689_s26 = sadd.s32 4294967294, %s7131_s24  }
   0xe   : > { %8179 = sst [smem:[#allocation17_spill]] %s7127_s23  ;;  %s7264_s27 = sadd.s32 1, %s7131_s24  }
   0xf   : > { %8180 = sst [smem:[#allocation18_spill]] %s7131_s24  ;;  %s362_s28 = sadd.s32 1, %s7127_s23 }
  0x10   : > { %8181 = sst [smem:[#allocation19_spill]] %s7264_s27  ;;  %s359_s29 = ssub.s32 %s7131_s24, %s7264_s27 }
  0x11   : > { %p372_p0 = scmp.ne.s32.totalorder %s7127_s23, %s7123_s22  ;;  %p360_p1 = scmp.eq.s32.totalorder %s359_s29, 0 }
  0x12   : > { %p373_p2 = scmp.eq.s32.totalorder %s7260_s25, 1  ;;  %p378_p3 = scmp.ne.s32.totalorder %s7123_s22, %s7119_s21 }
  0x13   : > { %p379_p4 = scmp.eq.s32.totalorder %s5689_s26, 1  ;;  %p5690_p7 = scmp.ge.s32.totalorder %s7131_s24, 1 }
  0x14   : > { %s7275_s30 = scalar_select %p360_p1, %s7127_s23, %s362_s28  }
  0x15   : > { %p7277_p5 = por %p373_p2, %p372_p0  ;;  %p7281_p6 = por %p379_p4, %p378_p3 }
  0x16   : > { %8182 = sst [smem:[#allocation20_spill]] %s7275_s30  ;;  %p412_p8 = scmp.lt.s32.totalorder %s7131_s24, 3 }
  0x17   : > { %s8183_s0 = scalar_select %p7277_p5, 1, 0 }
  0x18   : > { %s8185_s17 = scalar_select %p7281_p6, 1, 0 }
  0x19   : > { %8184 = sst [smem:[#allocation21_spill]] %s8183_s0  ;;  %p8165_p9 = scmp.eq.s32.totalorder %s7260_s25, 0 }
  0x1a   : > { %8186 = sst [smem:[#allocation22_spill]] %s8185_s17  ;;  %p7288_p10 = pnand %p5690_p7, %p412_p8 }
  0x1b   : > { %s7133_s19 = smov [#allocation5]   ;;  %s7134_s28 = smov [#allocation2]  }
  0x1c   : > { %s8187_s18 = scalar_select %p7288_p10, 1, 0 }
  0x1d   : > { %s461_s20 = sshll.u32 %s7133_s19, 4  ;;  %p6445_p11 = pneg %p7288_p10  ;;  %s462_s20 = int_to_ptr.vmem [resolvable:$true] %s461_s20 }
  0x1e   : > { %s430_s29 = sshll.u32 %s7134_s28, 4  ;;  %s8189_s10 = sld [smem:[#allocation24_spill]]  ;;  %s7300_s29 = int_to_ptr.vmem [resolvable:$true] %s430_s29 }
  0x1f   : > { %p7296_p12 = pnand %p8165_p9, %p6445_p11 }
  0x21   : > { %p7310_p0 = pneg %p7296_p12 }
  0x24   : > { %s6945_s27 = scalar_lea.hbm %s8189_s10, 16384 }
  0x25   : > { %p6946_p13 = scmp.ne.s32.totalorder %s8189_s10, %s6945_s27  ;;  %p6952_p3 = scmp.lt.u32.totalorder %s6945_s27, %s8189_s10 }
  0x27   : > { %p6948_p1 = pnand %p7310_p0, %p6946_p13 }
  0x29   : > { %p6949_p2 = pneg %p6948_p1 }
  0x2b   : > { %p6954_p4 = pnand %p6952_p3, %p6949_p2 }
  0x2d   : > { %6957 = shalt.err (!%p6954_p4)
}
  0x2e   : > { %s6958_s23 = scalar_lea.vmem %s462_s20, 16384  ;;  %p6966_p9 = scmp.lt.s32.totalorder %s462_s20, %s462_s20 }
  0x2f   : > { %p6959_p7 = scmp.ne.s32.totalorder %s462_s20, %s6958_s23  ;;  %p6967_p6 = scmp.lt.s32.totalorder %s6958_s23, %s6958_s23 }
  0x31   : > { %p6961_p8 = pnand %p6959_p7, %p7310_p0  ;;  %p6968_p5 = por %p6967_p6, %p6966_p9 }
  0x33   : > { %p6962_p11 = pneg %p6961_p8 }
  0x35   : > { %p6969_p10 = pnand %p6968_p5, %p6962_p11 }
  0x37   : > { %6972 = shalt.err (!%p6969_p10)
}
  0x38   : > { %s7135_s21 = smov 256   ;;  %s7136_s30 = smov 16  }
  0x39   : > { %6451 = dma.hbm_to_vmem [thread:$0]  (!%p7296_p12), %s8189_s10, 16384, %s462_s20, [#allocation6], %s7135_s21, %s7135_s21, %s7136_s30  }
  0x3a   : > { %s6973_s15 = scalar_lea.hbm %s8145_s3, 3072 }
  0x3b   : > { %p6974_p13 = scmp.ne.s32.totalorder %s8145_s3, %s6973_s15  ;;  %p6980_p9 = scmp.lt.u32.totalorder %s6973_s15, %s8145_s3 }
  0x3d   : > { %p6976_p5 = pnand %p6974_p13, %p7310_p0 }
  0x3f   : > { %p6977_p6 = pneg %p6976_p5 }
  0x41   : > { %p6982_p10 = pnand %p6980_p9, %p6977_p6 }
  0x43   : > { %6985 = shalt.err (!%p6982_p10)
}
  0x44   : > { %s6986_s20 = scalar_lea.vmem %s7300_s29, 3072  ;;  %p6994_p4 = scmp.lt.s32.totalorder %s7300_s29, %s7300_s29 }
  0x45   : > { %p6987_p1 = scmp.ne.s32.totalorder %s7300_s29, %s6986_s20  ;;  %p6995_p7 = scmp.lt.s32.totalorder %s6986_s20, %s6986_s20 }
  0x47   : > { %p6989_p2 = pnand %p6987_p1, %p7310_p0  ;;  %p6996_p8 = por %p6995_p7, %p6994_p4 }
  0x49   : > { %p6990_p3 = pneg %p6989_p2 }
  0x4b   : > { %p6997_p11 = pnand %p6996_p8, %p6990_p3 }
  0x4d   : > { %7000 = shalt.err (!%p6997_p11)
}
  0x4e   : > { %s7137_s16 = smov 192   ;;  %s7138_s15 = smov 12  }
  0x4f   : > { %6448 = dma.hbm_to_vmem [thread:$0]  (!%p7296_p12), %s8145_s3, 3072, %s7300_s29, [#allocation3], %s7137_s16, %s7137_s16, %s7138_s15  }
  0x50   : > { %s7139_s21 = smov [#allocation7]   ;;  %s7001_s17 = scalar_lea.hbm %s8154_s12, 16384 }
  0x51   : > { %s477_s30 = sshll.u32 %s7139_s21, 4  ;;  %p7002_p13 = scmp.ne.s32.totalorder %s8154_s12, %s7001_s17  ;;  %s478_s30 = int_to_ptr.vmem [resolvable:$true] %s477_s30 }
  0x52   : > { %p7008_p9 = scmp.lt.u32.totalorder %s7001_s17, %s8154_s12 }
  0x53   : > { %p7004_p5 = pnand %p7002_p13, %p7310_p0 }
  0x55   : > { %p7005_p6 = pneg %p7004_p5 }
  0x57   : > { %p7010_p10 = pnand %p7008_p9, %p7005_p6 }
  0x59   : > { %7013 = shalt.err (!%p7010_p10)
}
  0x5a   : > { %s7014_s29 = scalar_lea.vmem %s478_s30, 16384  ;;  %p7022_p4 = scmp.lt.s32.totalorder %s478_s30, %s478_s30 }
  0x5b   : > { %p7015_p1 = scmp.ne.s32.totalorder %s478_s30, %s7014_s29  ;;  %p7023_p7 = scmp.lt.s32.totalorder %s7014_s29, %s7014_s29 }
  0x5d   : > { %p7017_p2 = pnand %p7015_p1, %p7310_p0  ;;  %p7024_p8 = por %p7023_p7, %p7022_p4 }
  0x5f   : > { %p7018_p3 = pneg %p7017_p2 }
  0x61   : > { %p7025_p11 = pnand %p7024_p8, %p7018_p3 }
  0x63   : > { %7028 = shalt.err (!%p7025_p11)
}
  0x64   : > { %s7140_s16 = smov 64   ;;  %s7141_s15 = smov 4  }
  0x65   : > { %6454 = dma.hbm_to_vmem [thread:$0]  (!%p7296_p12), %s8154_s12, 16384, %s478_s30, [#allocation6], %s7140_s16, %s7140_s16, %s7141_s15  }
  0x66   : > { %p8191_p13 = scmp.ne.s32.totalorder %s8187_s18, 0 }
  0x67   : > { %p8192_p5 = scmp.eq.s32.totalorder (!%p8191_p13), %s7260_s25, 0 }
  0x68   : > { %507 = sbr.rel (%p8191_p13) target bundleno = 3556 (0xde4), region = 80 }
  0x6f   : > { %7102 = dma.done.wait (%p8192_p5), [#allocation3], 3072   ;;  %p8193_p0 = pmov %p8192_p5 }
  0x71   : > { %7104 = vsyncadd (%p8193_p0), [#allocation3], 4294964224  ;;  %p8194_p6 = pmov %p8193_p0 }
  0x72   : > { %p8195_p9 = pmov %p8193_p0 }
  0x73   : > { %7106 = dma.done.wait (%p8194_p6), [#allocation6], 32768  }
  0x74   : > { %7108 = vsyncadd (%p8195_p9), [#allocation6], 4294934528  ;;  %p570_p10 = scmp.lt.s32.totalorder %s7260_s25, 1  ;;  %s8196_s21 = sld [smem:[#allocation23_spill]]  ;;  %v6535_v2 = vld [vmem:[#allocation2 + $0x4] ss:$12 sps:$4 sm:$0xff]   ;;  %v891_v63 = vlaneseq }
  0x75   : > { %v6537_v3 = vld [vmem:[#allocation2] ss:$12 sps:$4 sm:$0xff]   ;;  %v7142_v4 = vmov 0.0   ;;  %v6538_v5 = vld [vmem:[#allocation2 + $0x8] ss:$12 sps:$4 sm:$0xff]   ;;  %780 = vmatprep.subr.bf16.mxu0 %v6535_v2  ;;  %v7143_v30 = vmov 0  }
  0x76   : > { %s571_s26 = scalar_select %p570_p10, %s7260_s25, 1  ;;  %6270 = vmatprep.subr.bf16.mxu1 %v7142_v4  ;;  %v6539_v6 = vld [vmem:[#allocation2 + $0x1c] ss:$12 sps:$4 sm:$0xff]   ;;  %781 = vmatpush1.bf16.msra.mxu0 %v6537_v3  ;;  %v6541_v15 = vld [vmem:[#allocation2 + $0x18] ss:$12 sps:$4 sm:$0xff]   ;;  %vm7144_vm0 = vmmov 0  }
  0x77   : > { %6271 = vmatpush3.bf16.msra.mxu1 %v6538_v5  ;;  %782 = vmatprep.subr.bf16.mxu0 %v6539_v6  ;;  %v6542_v16 = vld [vmem:[#allocation2 + $0x20] ss:$12 sps:$4 sm:$0xff]   ;;  %v6545_v18 = vld [vmem:[#allocation2 + $0x30] ss:$12 sps:$4 sm:$0xff]   ;;  %v6546_v19 = vld [vmem:[#allocation2 + $0x38] ss:$12 sps:$4 sm:$0xff]  }
  0x78   : > { %s6040_s19 = sshll.u32 %s571_s26, 4  ;;  %6272 = vmatprep.subr.bf16.mxu1 %v7142_v4  ;;  %v6543_v17 = vld [vmem:[#allocation2 + $0x34] ss:$12 sps:$4 sm:$0xff]   ;;  %v6547_v20 = vld [vmem:[#allocation2 + $0x4c] ss:$12 sps:$4 sm:$0xff]   ;;  %812 = vmatprep.mubr.bf16.mxu0 %v7143_v30  ;;  %s7145_s23 = smov 96  }
  0x79   : > { %v6549_v21 = vld [vmem:[#allocation2 + $0x48] ss:$12 sps:$4 sm:$0xff]   ;;  %v6550_v22 = vld [vmem:[#allocation2 + $0x50] ss:$12 sps:$4 sm:$0xff]   ;;  %v6553_v24 = vld [vmem:[#allocation2 + $0x60] ss:$12 sps:$4 sm:$0xff]   ;;  %6286 = vmatprep.mubr.msk.bf16.mxu1 %vm7144_vm0, %v7142_v4 }
  0x7a   : > { %s7382_s30 = scalar_lea.vmem %s8196_s21, %s6040_s19  ;;  %783 = vmatpush1.bf16.msra.mxu0 %v6541_v15  ;;  %v6551_v23 = vld [vmem:[#allocation2 + $0x64] ss:$12 sps:$4 sm:$0xff]   ;;  %v6554_v25 = vld [vmem:[#allocation2 + $0x68] ss:$12 sps:$4 sm:$0xff]   ;;  %v6558_v28 = vld [vmem:[#allocation2 + $0x80] ss:$12 sps:$4 sm:$0xff]  }
  0x7b   : > { %v576_v0 = vld [vmem:[%s7382_s30] sm:$0xff]  ;;  %v577_v1 = vld [vmem:[%s7382_s30 + $0x8] sm:$0xff]  ;;  %6273 = vmatpush3.bf16.msra.mxu1 %v6542_v16  ;;  %784 = vmatprep.subr.bf16.mxu0 %v6543_v17  ;;  %v6561_v31 = vld [vmem:[#allocation2 + $0x90] ss:$12 sps:$4 sm:$0xff]   ;;  %s7146_s20 = smov 64   ;;  %s7147_s29 = smov 32  }
  0x7c   : > { %580 = vadd.xlane.f32.xlu0 %v576_v0  ;;  %6274 = vmatprep.subr.bf16.mxu1 %v7142_v4  ;;  %v6555_v26 = vld [vmem:[#allocation2 + $0x7c] ss:$12 sps:$4 sm:$0xff]   ;;  %v6557_v27 = vld [vmem:[#allocation2 + $0x78] ss:$12 sps:$4 sm:$0xff]   ;;  %v6559_v29 = vld [vmem:[#allocation2 + $0x94] ss:$12 sps:$4 sm:$0xff]  }
  0x7d   : > { %v6562_v32 = vld [vmem:[#allocation2 + $0x98] ss:$12 sps:$4 sm:$0xff]   ;;  %v6565_v34 = vld [vmem:[#allocation2 + $0xa8] ss:$12 sps:$4 sm:$0xff]   ;;  %v6566_v35 = vld [vmem:[#allocation2 + $0xb0] ss:$12 sps:$4 sm:$0xff]  }
  0x7e   : > { %785 = vmatpush1.bf16.msra.mxu0 %v6545_v18  ;;  %v6563_v33 = vld [vmem:[#allocation2 + $0xac] ss:$12 sps:$4 sm:$0xff]   ;;  %v5703_v44 = vld [vmem:[%s8143_s1] ss:$0 sm:$0xff]  ;;  %v7148_v61 = vmov 1983009808  }
  0x7f   : > { %6275 = vmatpush3.bf16.msra.mxu1 %v6546_v19  ;;  %786 = vmatprep.subr.bf16.mxu0 %v6547_v20  ;;  %v5704_v48 = vld [vmem:[%s8144_s2] ss:$0 sm:$0xff]  ;;  %v889_v62 = vunpack.c.l.s4 %v7148_v61  ;;  %v7149_v2 = vmov 1934713408   ;;  %v7451_v6 = vshrl.u32 %v891_v63, 7  ;;  %vm1750_vm1 = vcmask 261120  }
  0x80   : > { %582 = vadd.xlane.f32.xlu0 %v577_v1  ;;  %6276 = vmatprep.subr.bf16.mxu1 %v7142_v4  ;;  %v921_v3 = vunpack.c.l.s4 %v7149_v2  ;;  %vm1955_vm2 = vcmask 130048   ;;  %vm2526_vm3 = vcmask 523264   ;;  %vm2529_vm4 = vcmask 785408   ;;  %s8197_s0 = sld [smem:[#allocation16_spill]]  ;;  %s8198_s17 = sld [smem:[#allocation21_spill]] }
  0x81   : > { %v890_v5 = vunpack.c.0.s8 %v889_v62  ;;  %vm2786_vm5 = vcmask 31744   ;;  %vm2854_vm14 = vcmask 1040384   ;;  %vm2856_vm15 = vcmask 25600   ;;  %s8199_s15 = sld [smem:[#allocation26_spill]] }
  0x82   : > { %787 = vmatpush1.bf16.msra.mxu0 %v6549_v21 }
  0x83   : > { %6277 = vmatpush3.bf16.msra.mxu1 %v6550_v22  ;;  %788 = vmatprep.subr.bf16.mxu0 %v6551_v23 }
  0x84   : > { %6278 = vmatprep.subr.bf16.mxu1 %v7142_v4 }
  0x86   : > { %789 = vmatpush1.bf16.msra.mxu0 %v6553_v24  ;;  %p8200_p1 = scmp.ne.s32.totalorder %s8198_s17, 0 }
  0x87   : > { %6279 = vmatpush3.bf16.msra.mxu1 %v6554_v25  ;;  %790 = vmatprep.subr.bf16.mxu0 %v6555_v26 }
  0x88   : > { %6280 = vmatprep.subr.bf16.mxu1 %v7142_v4 }
  0x8a   : > { %791 = vmatpush1.bf16.msra.mxu0 %v6557_v27 }
  0x8b   : > { %6281 = vmatpush3.bf16.msra.mxu1 %v6558_v28  ;;  %792 = vmatprep.subr.bf16.mxu0 %v6559_v29 }
  0x8c   : > { %6282 = vmatprep.subr.bf16.mxu1 %v7142_v4 }
  0x8e   : > { %793 = vmatpush1.bf16.msra.mxu0 %v6561_v31 }
  0x8f   : > { %6283 = vmatpush3.bf16.msra.mxu1 %v6562_v32  ;;  %794 = vmatprep.subr.bf16.mxu0 %v6563_v33 }
  0x90   : > { %6284 = vmatprep.subr.bf16.mxu1 %v7142_v4 }
  0x92   : > { %795 = vmatpush1.bf16.msra.mxu0 %v6565_v34 }
  0x93   : > { %6285 = vmatpush3.bf16.msra.mxu1 %v6566_v35  ;;  %6290 = vmatprep.subr.bf16.mxu0 %v7142_v4 }
  0x94   : > { %6296 = vmatprep.subr.bf16.mxu1 %v7142_v4 }
 0x109   : > { %v581_v7 = vpop.xlane.xlu0 %580 }
 0x10a   : > { %v585_v8 = vmul.f32 0.0078125, %v581_v7 }
 0x10c   : > { %v7388_v9 = vsub.f32 %v576_v0, %v585_v8 }
 0x10d   : > { %v583_v10 = vpop.xlane.xlu0 %582 }
 0x10e   : > { %v586_v11 = vmul.f32 0.0078125, %v583_v10  ;;  %v589_v12 = vmul.f32 %v7388_v9, %v7388_v9  ;;  %v7456_v10 = vsub.s32 %v890_v5, %v7451_v6 }
 0x110   : > { %v7392_v13 = vsub.f32 %v577_v1, %v586_v11  ;;  %591 = vadd.xlane.f32.xlu1 %v589_v12 }
 0x112   : > { %v590_v14 = vmul.f32 %v7392_v13, %v7392_v13 }
 0x114   : > { %593 = vadd.xlane.f32.xlu1 %v590_v14 }
 0x19d   : > { %v592_v36 = vpop.xlane.xlu1 %591 }
 0x19e   : > { %v595_v37 = vmul.f32 0.0078125, %v592_v36 }
 0x1a0   : > { %v597_v38 = vadd.f32 1e-05, %v595_v37 }
 0x1a1   : > { %v594_v39 = vpop.xlane.xlu1 %593 }
 0x1a2   : > { %6895 = vrsqrt.f32 %v597_v38  ;;  %v596_v40 = vmul.f32 0.0078125, %v594_v39 }
 0x1a4   : > { %v598_v41 = vadd.f32 1e-05, %v596_v40 }
 0x1a6   : > { %6897 = vrsqrt.f32 %v598_v41 }
 0x1ac   : > { %v6896_v42 = vpop.eup %6895 }
 0x1ad   : > { %v601_v43 = vmul.f32 %v6896_v42, %v7388_v9  ;;  %v922_v9 = vunpack.c.0.s8 %v921_v3 }
 0x1af   : > { %v609_v47 = vmul.f32 %v5703_v44, %v601_v43  ;;  %v7459_v17 = vsub.s32 %v922_v9, %v7451_v6 }
 0x1b0   : > { %v6898_v45 = vpop.eup %6897 }
 0x1b1   : > { %v602_v46 = vmul.f32 %v6898_v45, %v7392_v13  ;;  %v617_v50 = vadd.f32 %v5704_v48, %v609_v47 }
 0x1b3   : > { %v610_v49 = vmul.f32 %v5703_v44, %v602_v46 }
 0x1b5   : > { %v618_v51 = vadd.f32 %v5704_v48, %v610_v49 }
 0x1b7   : > { %v619_v52 = vpack.c.bf16 %v618_v51, %v617_v50 }
 0x1b9   : > { %813 = vmatmul.mubr.bf16.vlgmr.msra.gmra.mrb[0].mxu0 %v619_v52  ;;  %6287 = vmatmul.mubr.bf16.vlgmr.msra.gmra.mrb[0].mxu1 %v619_v52 }
 0x1ba   : > { %6292 = vmatprep.mubr.msk.bf16.mxu0 %vm7144_vm0, %v7142_v4  ;;  %6298 = vmatprep.mubr.msk.bf16.mxu1 %vm7144_vm0, %v7142_v4 }
 0x28c   : > { %v7419_v53 = vpop.f32.mrb[0].mxu0  ;;  %v7421_v54 = vpop.f32.mrb[0].mxu1 }
 0x28d   : > { %v6288_v55 = vpop.f32.mrb[1].mxu1  ;;  %868 = vrot.lane.b32.xlu0 %v7419_v53, %s7145_s23  ;;  %v816_v56 = vpop.f32.mrb[1].mxu0 }
 0x28e   : > { %v7425_v57 = vpop.f32.mrb[2].mxu1  ;;  %1166 = vrot.lane.b32.xlu1 %v816_v56, %s7146_s20  ;;  %v7428_v58 = vpop.f32.mrb[2].mxu0 }
 0x28f   : > { %v7430_v59 = vpop.f32.mrb[3].mxu0  ;;  %v6289_v60 = vpop.f32.mrb[3].mxu1 }
 0x291   : > { %1160 = vrot.lane.b32.xlu0 %v816_v56, %s7145_s23 }
 0x292   : > { %870 = vrot.lane.b32.xlu1 %v7428_v58, %s7145_s23 }
 0x295   : > { %1172 = vrot.lane.b32.xlu0 %v816_v56, %s7147_s29 }
 0x296   : > { %1162 = vrot.lane.b32.xlu1 %v7430_v59, %s7145_s23 }
 0x299   : > { %874 = vrot.lane.b32.xlu0 %v7419_v53, %s7146_s20 }
 0x29a   : > { %1168 = vrot.lane.b32.xlu1 %v7430_v59, %s7146_s20 }
 0x29d   : > { %880 = vrot.lane.b32.xlu0 %v7419_v53, %s7147_s29 }
 0x29e   : > { %1174 = vrot.lane.b32.xlu1 %v7430_v59, %s7147_s29 }
 0x2a2   : > { %876 = vrot.lane.b32.xlu1 %v7428_v58, %s7146_s20 }
 0x2a6   : > { %882 = vrot.lane.b32.xlu1 %v7428_v58, %s7147_s29 }
 0x2ff   : > { %v869_v0 = vpop.permute.xlu0 %868 }
 0x300   : > { %v1167_v1 = vpop.permute.xlu1 %1166 }
 0x301   : > { %v1178_v11 = vcombine.low %v816_v56, %v1167_v1  ;;  %v1179_v12 = vcombine.high %v816_v56, %v1167_v1 }
 0x303   : > { %v1161_v7 = vpop.permute.xlu0 %1160  ;;  %v1186_v18 = vrot.slane %v1178_v11, %v7456_v10  ;;  %v1193_v19 = vrot.slane %v1179_v12, %v7456_v10 }
 0x304   : > { %v7453_v8 = vpop.permute.xlu1 %870 }
 0x307   : > { %v1173_v13 = vpop.permute.xlu0 %1172 }
 0x308   : > { %v1194_v14 = vcombine.low %v1161_v7, %v1173_v13  ;;  %v1195_v15 = vcombine.high %v1161_v7, %v1173_v13  ;;  %v1163_v16 = vpop.permute.xlu1 %1162 }
 0x30a   : > { %v1202_v20 = vrot.slane %v1194_v14, %v7456_v10  ;;  %v1209_v21 = vrot.slane %v1195_v15, %v7456_v10 }
 0x30b   : > { %v875_v22 = vpop.permute.xlu0 %874 }
 0x30c   : > { %v1210_v23 = vcombine.low %v1186_v18, %v1202_v20  ;;  %v1211_v24 = vcombine.high %v1186_v18, %v1202_v20  ;;  %v1226_v25 = vcombine.low %v1193_v19, %v1209_v21  ;;  %v1227_v26 = vcombine.high %v1193_v19, %v1209_v21  ;;  %v1169_v27 = vpop.permute.xlu1 %1168 }
 0x30d   : > { %v886_v28 = vcombine.low %v7419_v53, %v875_v22  ;;  %v887_v29 = vcombine.high %v7419_v53, %v875_v22  ;;  %v1246_v31 = vcombine.low %v7430_v59, %v1169_v27  ;;  %v1247_v37 = vcombine.high %v7430_v59, %v1169_v27 }
 0x30e   : > { %v1218_v32 = vrot.slane %v1210_v23, %v7459_v17  ;;  %v1225_v33 = vrot.slane %v1211_v24, %v7459_v17  ;;  %v1234_v34 = vrot.slane %v1226_v25, %v7459_v17  ;;  %v1241_v35 = vrot.slane %v1227_v26, %v7459_v17 }
 0x30f   : > { %v894_v36 = vrot.slane %v886_v28, %v7456_v10  ;;  %v881_v38 = vpop.permute.xlu0 %880  ;;  %v901_v50 = vrot.slane %v887_v29, %v7456_v10  ;;  %v1254_v51 = vrot.slane %v1246_v31, %v7456_v10  ;;  %v1261_v61 = vrot.slane %v1247_v37, %v7456_v10 }
 0x310   : > { %v1314_v39 = vcombine.low %v1218_v32, %v1225_v33  ;;  %v5733_v40 = vcombine.high %v1218_v32, %v1225_v33  ;;  %v1330_v41 = vcombine.low %v1234_v34, %v1241_v35  ;;  %v5734_v42 = vcombine.high %v1234_v34, %v1241_v35  ;;  %v1175_v43 = vpop.permute.xlu1 %1174 }
 0x311   : > { %v902_v44 = vcombine.low %v869_v0, %v881_v38  ;;  %v903_v45 = vcombine.high %v869_v0, %v881_v38  ;;  %v1262_v46 = vcombine.low %v1163_v16, %v1175_v43  ;;  %v1263_v47 = vcombine.high %v1163_v16, %v1175_v43 }
 0x312   : > { %v7475_v48 = vrot.slane %v1314_v39, %v7456_v10  ;;  %v7478_v49 = vrot.slane %v5733_v40, %v7456_v10  ;;  %v7487_v59 = vrot.slane %v1330_v41, %v7456_v10  ;;  %v7490_v60 = vrot.slane %v5734_v42, %v7456_v10 }
 0x313   : > { %v910_v52 = vrot.slane %v902_v44, %v7456_v10  ;;  %v917_v53 = vrot.slane %v903_v45, %v7456_v10  ;;  %v1270_v55 = vrot.slane %v1262_v46, %v7456_v10  ;;  %v1277_v56 = vrot.slane %v1263_v47, %v7456_v10 }
 0x314   : > { %v1346_v62 = vcombine.low %v7475_v48, %v7478_v49  ;;  %v877_v5 = vpop.permute.xlu1 %876  ;;  %v1362_v37 = vcombine.low %v7487_v59, %v7490_v60  ;;  %v1347_v38 = vcombine.high %v7475_v48, %v7478_v49  ;;  %v1363_v39 = vcombine.high %v7487_v59, %v7490_v60 }
 0x315   : > { %v918_v0 = vcombine.low %v894_v36, %v910_v52  ;;  %v919_v1 = vcombine.high %v894_v36, %v910_v52  ;;  %v934_v2 = vcombine.low %v901_v50, %v917_v53  ;;  %v935_v3 = vcombine.high %v901_v50, %v917_v53 }
 0x316   : > { %v1278_v7 = vcombine.low %v1254_v51, %v1270_v55  ;;  %v1279_v9 = vcombine.high %v1254_v51, %v1270_v55  ;;  %v1294_v11 = vcombine.low %v1261_v61, %v1277_v56  ;;  %v1295_v12 = vcombine.high %v1261_v61, %v1277_v56 }
 0x317   : > { %v926_v13 = vrot.slane %v918_v0, %v7459_v17  ;;  %v933_v14 = vrot.slane %v919_v1, %v7459_v17  ;;  %v942_v15 = vrot.slane %v934_v2, %v7459_v17  ;;  %v949_v16 = vrot.slane %v935_v3, %v7459_v17 }
 0x318   : > { %v1286_v18 = vrot.slane %v1278_v7, %v7459_v17  ;;  %v1293_v19 = vrot.slane %v1279_v9, %v7459_v17  ;;  %v1302_v20 = vrot.slane %v1294_v11, %v7459_v17  ;;  %v1309_v21 = vrot.slane %v1295_v12, %v7459_v17  ;;  %v883_v35 = vpop.permute.xlu1 %882 }
 0x319   : > { %v1022_v22 = vcombine.low %v926_v13, %v933_v14  ;;  %v5729_v23 = vcombine.high %v926_v13, %v933_v14  ;;  %v1038_v24 = vcombine.low %v942_v15, %v949_v16  ;;  %v5730_v25 = vcombine.high %v942_v15, %v949_v16 }
 0x31a   : > { %v1382_v26 = vcombine.low %v1286_v18, %v1293_v19  ;;  %v5735_v27 = vcombine.high %v1286_v18, %v1293_v19  ;;  %v1398_v28 = vcombine.low %v1302_v20, %v1309_v21  ;;  %v5736_v29 = vcombine.high %v1302_v20, %v1309_v21 }
 0x31b   : > { %v1029_v31 = vrot.slane %v1022_v22, %v7456_v10  ;;  %v1037_v32 = vrot.slane %v5729_v23, %v7456_v10  ;;  %v1045_v33 = vrot.slane %v1038_v24, %v7456_v10  ;;  %v1053_v34 = vrot.slane %v5730_v25, %v7456_v10 }
 0x31c   : > { %v7508_v36 = vrot.slane %v1382_v26, %v7456_v10  ;;  %v1397_v41 = vrot.slane %v5735_v27, %v7456_v10  ;;  %v7518_v42 = vrot.slane %v1398_v28, %v7456_v10  ;;  %v7521_v43 = vrot.slane %v5736_v29, %v7456_v10 }
 0x31d   : > { %v1054_v40 = vcombine.low %v1029_v31, %v1037_v32  ;;  %v954_v44 = vcombine.low %v7428_v58, %v877_v5  ;;  %v955_v45 = vcombine.high %v7428_v58, %v877_v5  ;;  %v970_v46 = vcombine.low %v7453_v8, %v883_v35 }
 0x31e   : > { %v971_v47 = vcombine.high %v7453_v8, %v883_v35  ;;  %v1055_v48 = vcombine.high %v1029_v31, %v1037_v32  ;;  %v1070_v50 = vcombine.low %v1045_v33, %v1053_v34  ;;  %v1071_v51 = vcombine.high %v1045_v33, %v1053_v34 }
 0x31f   : > { %v7528_v49 = vrot.slane %v1054_v40, %v7459_v17  ;;  %v962_v52 = vrot.slane %v954_v44, %v7456_v10  ;;  %v969_v53 = vrot.slane %v955_v45, %v7456_v10  ;;  %v978_v55 = vrot.slane %v970_v46, %v7456_v10 }
 0x320   : > { %v985_v56 = vrot.slane %v971_v47, %v7456_v10  ;;  %v1354_v58 = vrot.slane %v1346_v62, %v7459_v17  ;;  %v1370_v59 = vrot.slane %v1362_v37, %v7459_v17  ;;  %v1414_v8 = vcombine.low %v7508_v36, %v1397_v41 }
 0x321   : > { %v1430_v60 = vcombine.low %v7518_v42, %v7521_v43  ;;  %v986_v61 = vcombine.low %v962_v52, %v978_v55  ;;  %v987_v0 = vcombine.high %v962_v52, %v978_v55  ;;  %v1069_v3 = vrot.slane %v1055_v48, %v7459_v17 }
 0x322   : > { %v1002_v1 = vcombine.low %v969_v53, %v985_v56  ;;  %v1003_v2 = vcombine.high %v969_v53, %v985_v56  ;;  %v1078_v5 = vrot.slane %v1070_v50, %v7459_v17  ;;  %v1422_v7 = vrot.slane %v1414_v8, %v7459_v17 }
 0x323   : > { %v1438_v9 = vrot.slane %v1430_v60, %v7459_v17  ;;  %v994_v62 = vrot.slane %v986_v61, %v7459_v17  ;;  %v1001_v11 = vrot.slane %v987_v0, %v7459_v17  ;;  %v1378_v14 = vcombine.low %v1354_v58, %v1370_v59 }
 0x324   : > { %v1010_v12 = vrot.slane %v1002_v1, %v7459_v17  ;;  %v1017_v13 = vrot.slane %v1003_v2, %v7459_v17  ;;  %v1379_v16 = vcombine.high %v1354_v58, %v1370_v59  ;;  %v1085_v23 = vrot.slane %v1071_v51, %v7459_v17 }
 0x325   : > { %v1446_v15 = vcombine.low %v1422_v7, %v1438_v9  ;;  %v1447_v18 = vcombine.high %v1422_v7, %v1438_v9  ;;  %v1090_v19 = vcombine.low %v994_v62, %v1001_v11  ;;  %v5731_v20 = vcombine.high %v994_v62, %v1001_v11  ;;  %v864_v11 = vld [vmem:[%s8156_s14] sm:$0xff] }
 0x326   : > { %v1106_v21 = vcombine.low %v1010_v12, %v1017_v13  ;;  %v5732_v22 = vcombine.high %v1010_v12, %v1017_v13  ;;  %v1086_v26 = vcombine.low %v7528_v49, %v1078_v5  ;;  %v1361_v34 = vrot.slane %v1347_v38, %v7459_v17 }
 0x327   : > { %v1746_v24 = vpack.c.bf16 %v1446_v15, %v1378_v14  ;;  %v1747_v25 = vpack.c.bf16 %v1447_v18, %v1379_v16  ;;  %v1097_v27 = vrot.slane %v1090_v19, %v7456_v10  ;;  %v1105_v28 = vrot.slane %v5731_v20, %v7456_v10  ;;  %v865_v19 = vld [vmem:[%s8156_s14 + $0x8] sm:$0xff] }
 0x328   : > { %v1113_v29 = vrot.slane %v1106_v21, %v7456_v10  ;;  %v1121_v31 = vrot.slane %v5732_v22, %v7456_v10  ;;  %v1415_v35 = vcombine.high %v7508_v36, %v1397_v41  ;;  %v1377_v46 = vrot.slane %v1363_v39, %v7459_v17 }
 0x329   : > { %v1755_v32 = vsel %vm1750_vm1, %v1746_v24, 0  ;;  %v1802_v33 = vsel %vm1750_vm1, %v1747_v25, 0  ;;  %v1122_v37 = vcombine.low %v1097_v27, %v1105_v28  ;;  %v1123_v40 = vcombine.high %v1097_v27, %v1105_v28 }
 0x32a   : > { %v1138_v44 = vcombine.low %v1113_v29, %v1121_v31  ;;  %v1139_v45 = vcombine.high %v1113_v29, %v1121_v31  ;;  %6291 = vmatpush3.bf16.xpose.msra.mxu0 %v1755_v32  ;;  %6297 = vmatpush3.bf16.xpose.msra.mxu1 %v1802_v33  ;;  %v1429_v47 = vrot.slane %v1415_v35, %v7459_v17 }
 0x32b   : > { %6302 = vmatprep.subr.bf16.mxu0 %v7142_v4  ;;  %v1431_v48 = vcombine.high %v7518_v42, %v7521_v43  ;;  %v1130_v50 = vrot.slane %v1122_v37, %v7459_v17  ;;  %v1137_v38 = vrot.slane %v1123_v40, %v7459_v17  ;;  %6308 = vmatprep.subr.bf16.mxu1 %v7142_v4 }
 0x32c   : > { %v1146_v36 = vrot.slane %v1138_v44, %v7459_v17  ;;  %v1153_v41 = vrot.slane %v1139_v45, %v7459_v17  ;;  %v1087_v51 = vcombine.high %v7528_v49, %v1078_v5  ;;  %v1088_v39 = vcombine.low %v1069_v3, %v1085_v23 }
 0x32d   : > { %v1445_v52 = vrot.slane %v1431_v48, %v7459_v17  ;;  %v1089_v53 = vcombine.high %v1069_v3, %v1085_v23  ;;  %v1380_v43 = vcombine.low %v1361_v34, %v1377_v46  ;;  %v1381_v8 = vcombine.high %v1361_v34, %v1377_v46 }
 0x32e   : > { %v1154_v55 = vcombine.low %v1130_v50, %v1146_v36  ;;  %v1155_v56 = vcombine.high %v1130_v50, %v1146_v36  ;;  %v1156_v58 = vcombine.low %v1137_v38, %v1153_v41  ;;  %v1157_v42 = vcombine.high %v1137_v38, %v1153_v41 }
 0x32f   : > { %v1448_v59 = vcombine.low %v1429_v47, %v1445_v52  ;;  %v1449_v60 = vcombine.high %v1429_v47, %v1445_v52 }
 0x330   : > { %v1742_v61 = vpack.c.bf16 %v1154_v55, %v1086_v26  ;;  %v1743_v0 = vpack.c.bf16 %v1155_v56, %v1087_v51  ;;  %v1744_v1 = vpack.c.bf16 %v1156_v58, %v1088_v39  ;;  %v1745_v2 = vpack.c.bf16 %v1157_v42, %v1089_v53 }
 0x331   : > { %v1748_v7 = vpack.c.bf16 %v1448_v59, %v1380_v43  ;;  %v1749_v9 = vpack.c.bf16 %v1449_v60, %v1381_v8 }
 0x332   : > { %6293 = vmatmul.mubr.msk.bf16.vlgmr.msra.gmra.mrb[4].mxu0 %vm1750_vm1, %v1742_v61  ;;  %6299 = vmatmul.mubr.msk.bf16.vlgmr.msra.gmra.mrb[4].mxu1 %vm1750_vm1, %v1743_v0 }
 0x333   : > { %v1849_v49 = vsel %vm1750_vm1, %v1748_v7, 0  ;;  %v1896_v3 = vsel %vm1750_vm1, %v1749_v9, 0  ;;  %6304 = vmatprep.mubr.msk.bf16.mxu0 %vm7144_vm0, %v7142_v4  ;;  %6310 = vmatprep.mubr.msk.bf16.mxu1 %vm7144_vm0, %v7142_v4 }
 0x334   : > { %6303 = vmatpush3.bf16.xpose.msra.mxu0 %v1849_v49  ;;  %6309 = vmatpush3.bf16.xpose.msra.mxu1 %v1896_v3 }
 0x335   : > { %6314 = vmatprep.subr.bf16.mxu0 %v7142_v4  ;;  %6320 = vmatprep.subr.bf16.mxu1 %v7142_v4 }
 0x33b   : > { %6305 = vmatmul.mubr.msk.bf16.vlgmr.msra.gmra.mrb[8].mxu0 %vm1750_vm1, %v1744_v1  ;;  %6311 = vmatmul.mubr.msk.bf16.vlgmr.msra.gmra.mrb[8].mxu1 %vm1750_vm1, %v1745_v2 }
 0x33c   : > { %6316 = vmatprep.mubr.msk.bf16.mxu0 %vm7144_vm0, %v7142_v4  ;;  %6322 = vmatprep.mubr.msk.bf16.mxu1 %vm7144_vm0, %v7142_v4 }
 0x405   : > { %v1791_v5 = vpop.f32.mrb[4].mxu0  ;;  %v1838_v62 = vpop.f32.mrb[4].mxu1 }
 0x406   : > { %v1939_v12 = vmul.f32 0.17677669, %v1791_v5  ;;  %v1941_v13 = vmul.f32 0.17677669, %v1838_v62  ;;  %v6294_v14 = vpop.f32.mrb[5].mxu0  ;;  %v6300_v15 = vpop.f32.mrb[5].mxu1 }
 0x407   : > { %v1794_v16 = vpop.f32.mrb[6].mxu0  ;;  %v1841_v18 = vpop.f32.mrb[6].mxu1 }
 0x408   : > { %v1940_v20 = vmul.f32 0.17677669, %v1794_v16  ;;  %v6295_v21 = vpop.f32.mrb[7].mxu0  ;;  %v6301_v22 = vpop.f32.mrb[7].mxu1  ;;  %v1947_v23 = vadd.f32 %v1939_v12, %v864_v11  ;;  %v1942_v24 = vmul.f32 0.17677669, %v1841_v18  ;;  %v1949_v27 = vadd.f32 %v1941_v13, %v864_v11 }
 0x40a   : > { %v1956_v25 = vsel %vm1955_vm2, %v1947_v23, -inf  ;;  %v1948_v26 = vadd.f32 %v1940_v20, %v865_v19  ;;  %v1962_v32 = vsel %vm1955_vm2, %v1949_v27, -inf  ;;  %v1950_v33 = vadd.f32 %v1942_v24, %v865_v19 }
 0x40b   : > { %1957 = vmax.xlane.f32.xlu0 %v1956_v25 }
 0x40c   : > { %v1959_v28 = vsel %vm1955_vm2, %v1948_v26, -inf  ;;  %v1965_v48 = vsel %vm1955_vm2, %v1950_v33, -inf }
 0x40d   : > { %1960 = vmax.xlane.f32.xlu1 %v1959_v28 }
 0x40e   : > { %v1932_v29 = vpop.f32.mrb[8].mxu1  ;;  %v1885_v31 = vpop.f32.mrb[8].mxu0 }
 0x40f   : > { %v1943_v34 = vmul.f32 0.17677669, %v1885_v31  ;;  %v6306_v35 = vpop.f32.mrb[9].mxu0  ;;  %v6312_v37 = vpop.f32.mrb[9].mxu1  ;;  %1963 = vmax.xlane.f32.xlu0 %v1962_v32  ;;  %v1945_v47 = vmul.f32 0.17677669, %v1932_v29 }
 0x410   : > { %v1935_v40 = vpop.f32.mrb[10].mxu1  ;;  %v1888_v44 = vpop.f32.mrb[10].mxu0 }
 0x411   : > { %v6307_v45 = vpop.f32.mrb[11].mxu0  ;;  %v6313_v46 = vpop.f32.mrb[11].mxu1  ;;  %v1951_v50 = vadd.f32 %v1943_v34, %v864_v11  ;;  %v1953_v36 = vadd.f32 %v1945_v47, %v864_v11  ;;  %v1944_v51 = vmul.f32 0.17677669, %v1888_v44  ;;  %v1946_v52 = vmul.f32 0.17677669, %v1935_v40 }
 0x413   : > { %1966 = vmax.xlane.f32.xlu0 %v1965_v48  ;;  %v1968_v38 = vsel %vm1955_vm2, %v1951_v50, -inf  ;;  %v1974_v41 = vsel %vm1955_vm2, %v1953_v36, -inf  ;;  %v7605_v39 = vadd.f32 %v1944_v51, %v865_v19  ;;  %v7609_v55 = vadd.f32 %v1946_v52, %v865_v19 }
 0x415   : > { %v1971_v53 = vsel %vm1955_vm2, %v7605_v39, -inf  ;;  %v1977_v56 = vsel %vm1955_vm2, %v7609_v55, -inf }
 0x417   : > { %1969 = vmax.xlane.f32.xlu0 %v1968_v38 }
 0x41b   : > { %1975 = vmax.xlane.f32.xlu0 %v1974_v41 }
 0x41e   : > { %1454 = vrot.lane.b32.xlu1 %v7425_v57, %s7145_s23 }
 0x422   : > { %1458 = vrot.lane.b32.xlu1 %v7421_v54, %s7146_s20 }
 0x431   : > { %1452 = vrot.lane.b32.xlu0 %v7421_v54, %s7145_s23 }
 0x435   : > { %1464 = vrot.lane.b32.xlu0 %v7421_v54, %s7147_s29 }
 0x446   : > { %1972 = vmax.xlane.f32.xlu1 %v1971_v53 }
 0x44a   : > { %1978 = vmax.xlane.f32.xlu1 %v1977_v56 }
 0x45b   : > { %1460 = vrot.lane.b32.xlu1 %v7425_v57, %s7146_s20 }
 0x498   : > { %v1958_v58 = vpop.xlane.xlu0 %1957 }
 0x499   : > { %v1980_v42 = vsub.f32 %v1947_v23, %v1958_v58 }
 0x49a   : > { %v1961_v43 = vpop.xlane.xlu1 %1960 }
 0x49b   : > { %v1988_v59 = vmul.f32 1.442695, %v1980_v42  ;;  %v1981_v8 = vsub.f32 %v1948_v26, %v1961_v43 }
 0x49c   : > { %v1964_v60 = vpop.xlane.xlu0 %1963 }
 0x49d   : > { %6899 = vpow2.f32 %v1988_v59  ;;  %v1990_v61 = vmul.f32 1.442695, %v1981_v8  ;;  %v1982_v0 = vsub.f32 %v1949_v27, %v1964_v60 }
 0x49e   : > { %v7615_v1 = vpop.permute.xlu1 %1454 }
 0x49f   : > { %6901 = vpow2.f32 %v1990_v61  ;;  %v1992_v2 = vmul.f32 1.442695, %v1982_v0 }
 0x4a0   : > { %v1967_v7 = vpop.xlane.xlu0 %1966 }
 0x4a1   : > { %6903 = vpow2.f32 %v1992_v2  ;;  %v1983_v9 = vsub.f32 %v1950_v33, %v1967_v7 }
 0x4a2   : > { %v1459_v49 = vpop.permute.xlu1 %1458 }
 0x4a3   : > { %v1994_v3 = vmul.f32 1.442695, %v1983_v9  ;;  %v1470_v5 = vcombine.low %v7421_v54, %v1459_v49  ;;  %v1471_v62 = vcombine.high %v7421_v54, %v1459_v49 }
 0x4a4   : > { %v1970_v11 = vpop.xlane.xlu0 %1969 }
 0x4a5   : > { %6905 = vpow2.f32 %v1994_v3  ;;  %v1984_v12 = vsub.f32 %v1951_v50, %v1970_v11  ;;  %v1478_v31 = vrot.slane %v1470_v5, %v7456_v10  ;;  %v1485_v32 = vrot.slane %v1471_v62, %v7456_v10 }
 0x4a7   : > { %v7619_v13 = vpop.eup %6899  ;;  %v1996_v14 = vmul.f32 1.442695, %v1984_v12 }
 0x4a8   : > { %v1976_v15 = vpop.xlane.xlu0 %1975  ;;  %v2004_v16 = vsel %vm1955_vm2, %v7619_v13, 0.0 }
 0x4a9   : > { %v7623_v18 = vpop.eup %6901  ;;  %6907 = vpow2.f32 %v1996_v14  ;;  %v1986_v19 = vsub.f32 %v1953_v36, %v1976_v15  ;;  %2005 = vadd.xlane.f32.xlu0 %v2004_v16 }
 0x4aa   : > { %v2007_v20 = vsel %vm1955_vm2, %v7623_v18, 0.0 }
 0x4ab   : > { %v7627_v21 = vpop.eup %6903  ;;  %v2000_v54 = vmul.f32 1.442695, %v1986_v19  ;;  %2008 = vadd.xlane.f32.xlu1 %v2007_v20 }
 0x4ac   : > { %v1453_v22 = vpop.permute.xlu0 %1452  ;;  %v2010_v23 = vsel %vm1955_vm2, %v7627_v21, 0.0 }
 0x4ad   : > { %6909 = vpow2.f32 %v2000_v54  ;;  %2011 = vadd.xlane.f32.xlu0 %v2010_v23 }
 0x4af   : > { %v7631_v24 = vpop.eup %6905 }
 0x4b0   : > { %v1465_v25 = vpop.permute.xlu0 %1464  ;;  %v2013_v26 = vsel %vm1955_vm2, %v7631_v24, 0.0 }
 0x4b1   : > { %v1486_v27 = vcombine.low %v1453_v22, %v1465_v25  ;;  %v1487_v28 = vcombine.high %v1453_v22, %v1465_v25  ;;  %2014 = vadd.xlane.f32.xlu1 %v2013_v26 }
 0x4b3   : > { %v7635_v29 = vpop.eup %6907  ;;  %v1494_v33 = vrot.slane %v1486_v27, %v7456_v10  ;;  %v1501_v34 = vrot.slane %v1487_v28, %v7456_v10 }
 0x4b4   : > { %v2016_v35 = vsel %vm1955_vm2, %v7635_v29, 0.0 }
 0x4b5   : > { %v1502_v37 = vcombine.low %v1478_v31, %v1494_v33  ;;  %v1503_v40 = vcombine.high %v1478_v31, %v1494_v33  ;;  %v1518_v44 = vcombine.low %v1485_v32, %v1501_v34  ;;  %v1519_v45 = vcombine.high %v1485_v32, %v1501_v34  ;;  %2017 = vadd.xlane.f32.xlu0 %v2016_v35 }
 0x4b7   : > { %v7643_v46 = vpop.eup %6909  ;;  %v1510_v47 = vrot.slane %v1502_v37, %v7459_v17  ;;  %v1517_v48 = vrot.slane %v1503_v40, %v7459_v17  ;;  %v1526_v50 = vrot.slane %v1518_v44, %v7459_v17  ;;  %v1533_v38 = vrot.slane %v1519_v45, %v7459_v17 }
 0x4b8   : > { %v2022_v36 = vsel %vm1955_vm2, %v7643_v46, 0.0 }
 0x4b9   : > { %v1606_v41 = vcombine.low %v1510_v47, %v1517_v48  ;;  %v5737_v51 = vcombine.high %v1510_v47, %v1517_v48  ;;  %v1622_v52 = vcombine.low %v1526_v50, %v1533_v38  ;;  %v5738_v53 = vcombine.high %v1526_v50, %v1533_v38  ;;  %2023 = vadd.xlane.f32.xlu0 %v2022_v36 }
 0x4bb   : > { %v1613_v56 = vrot.slane %v1606_v41, %v7456_v10  ;;  %v1621_v58 = vrot.slane %v5737_v51, %v7456_v10  ;;  %v1629_v42 = vrot.slane %v1622_v52, %v7456_v10  ;;  %v1637_v43 = vrot.slane %v5738_v53, %v7456_v10 }
 0x4bd   : > { %v1638_v59 = vcombine.low %v1613_v56, %v1621_v58  ;;  %v1654_v8 = vcombine.low %v1629_v42, %v1637_v43  ;;  %v1639_v60 = vcombine.high %v1613_v56, %v1621_v58  ;;  %v1655_v61 = vcombine.high %v1629_v42, %v1637_v43 }
 0x4bf   : > { %v7656_v0 = vrot.slane %v1638_v59, %v7459_v17  ;;  %v7659_v2 = vrot.slane %v1654_v8, %v7459_v17  ;;  %v7662_v7 = vrot.slane %v1639_v60, %v7459_v17  ;;  %v7665_v9 = vrot.slane %v1655_v61, %v7459_v17 }
 0x4c1   : > { %v1670_v49 = vcombine.low %v7656_v0, %v7659_v2  ;;  %v1671_v3 = vcombine.high %v7656_v0, %v7659_v2  ;;  %v1672_v5 = vcombine.low %v7662_v7, %v7665_v9  ;;  %v1673_v62 = vcombine.high %v7662_v7, %v7665_v9 }
 0x4c2   : > { %1466 = vrot.lane.b32.xlu1 %v7425_v57, %s7147_s29 }
 0x4d3   : > { %v1973_v11 = vpop.xlane.xlu1 %1972 }
 0x4d4   : > { %v1985_v12 = vsub.f32 %v7605_v39, %v1973_v11 }
 0x4d6   : > { %v1998_v14 = vmul.f32 1.442695, %v1985_v12 }
 0x4d7   : > { %v1979_v15 = vpop.xlane.xlu1 %1978 }
 0x4d8   : > { %6911 = vpow2.f32 %v1998_v14  ;;  %v1987_v16 = vsub.f32 %v7609_v55, %v1979_v15 }
 0x4da   : > { %v2002_v19 = vmul.f32 1.442695, %v1987_v16 }
 0x4db   : > { %v1461_v39 = vpop.permute.xlu1 %1460 }
 0x4dc   : > { %6913 = vpow2.f32 %v2002_v19  ;;  %v1538_v55 = vcombine.low %v7425_v57, %v1461_v39  ;;  %v1539_v28 = vcombine.high %v7425_v57, %v1461_v39 }
 0x4de   : > { %v1546_v34 = vrot.slane %v1538_v55, %v7456_v10  ;;  %v1553_v35 = vrot.slane %v1539_v28, %v7456_v10 }
 0x4e2   : > { %v7679_v20 = vpop.eup %6911 }
 0x4e3   : > { %v2019_v54 = vsel %vm1955_vm2, %v7679_v20, 0.0 }
 0x4e6   : > { %v7683_v22 = vpop.eup %6913  ;;  %2020 = vadd.xlane.f32.xlu1 %v2019_v54 }
 0x4e7   : > { %v2025_v23 = vsel %vm1955_vm2, %v7683_v22, 0.0 }
 0x4e8   : > { %2026 = vadd.xlane.f32.xlu0 %v2025_v23 }
 0x536   : > { %v2006_v27 = vpop.xlane.xlu0 %2005 }
 0x537   : > { %6915 = vrcp.f32 %v2006_v27 }
 0x538   : > { %v2009_v25 = vpop.xlane.xlu1 %2008 }
 0x539   : > { %6917 = vrcp.f32 %v2009_v25 }
 0x53a   : > { %v2012_v37 = vpop.xlane.xlu0 %2011 }
 0x53e   : > { %v2015_v26 = vpop.xlane.xlu1 %2014 }
 0x53f   : > { %6919 = vrcp.f32 %v2015_v26 }
 0x540   : > { %6921 = vrcp.f32 %v2012_v37 }
 0x541   : > { %v6916_v59 = vpop.eup %6915 }
 0x542   : > { %v1467_v31 = vpop.permute.xlu1 %1466 }
 0x543   : > { %v1554_v32 = vcombine.low %v7615_v1, %v1467_v31  ;;  %v1555_v33 = vcombine.high %v7615_v1, %v1467_v31  ;;  %v6918_v8 = vpop.eup %6917 }
 0x544   : > { %v2031_v27 = vmul.f32 %v6918_v8, %v7623_v18 }
 0x545   : > { %v1562_v40 = vrot.slane %v1554_v32, %v7456_v10  ;;  %v1569_v44 = vrot.slane %v1555_v33, %v7456_v10 }
 0x547   : > { %v1570_v45 = vcombine.low %v1546_v34, %v1562_v40  ;;  %v1571_v47 = vcombine.high %v1546_v34, %v1562_v40  ;;  %v1586_v57 = vcombine.low %v1553_v35, %v1569_v44  ;;  %v1587_v48 = vcombine.high %v1553_v35, %v1569_v44 }
 0x548   : > { %v2029_v34 = vmul.f32 %v6916_v59, %v7619_v13  ;;  %v2018_v13 = vpop.xlane.xlu0 %2017 }
 0x549   : > { %v1578_v50 = vrot.slane %v1570_v45, %v7459_v17  ;;  %v1585_v1 = vrot.slane %v1571_v47, %v7459_v17  ;;  %v1594_v38 = vrot.slane %v1586_v57, %v7459_v17  ;;  %v1601_v36 = vrot.slane %v1587_v48, %v7459_v17  ;;  %v6920_v14 = vpop.eup %6919  ;;  %v6571_v57 = vld [vmem:[%s8146_s4 + $0x20] sm:$0xff]   ;;  %v6572_v48 = vld [vmem:[%s8146_s4 + $0x28] sm:$0xff]  }
 0x54a   : > { %v6922_v23 = vpop.eup %6921  ;;  %v2035_v55 = vmul.f32 %v6920_v14, %v7631_v24  ;;  %v2044_v24 = vpack.c.bf16 %v2031_v27, %v2029_v34  ;;  %6923 = vrcp.f32 %v2018_v13 }
 0x54b   : > { %v1674_v41 = vcombine.low %v1578_v50, %v1585_v1  ;;  %v5739_v51 = vcombine.high %v1578_v50, %v1585_v1  ;;  %v1690_v52 = vcombine.low %v1594_v38, %v1601_v36  ;;  %v5740_v53 = vcombine.high %v1594_v38, %v1601_v36 }
 0x54c   : > { %v2033_v35 = vmul.f32 %v6922_v23, %v7627_v21  ;;  %v2024_v21 = vpop.xlane.xlu0 %2023 }
 0x54d   : > { %v1681_v56 = vrot.slane %v1674_v41, %v7456_v10  ;;  %v1689_v58 = vrot.slane %v5739_v51, %v7456_v10  ;;  %v1697_v42 = vrot.slane %v1690_v52, %v7456_v10  ;;  %v1705_v43 = vrot.slane %v5740_v53, %v7456_v10 }
 0x54e   : > { %6925 = vrcp.f32 %v2024_v21 }
 0x54f   : > { %v1706_v60 = vcombine.low %v1681_v56, %v1689_v58  ;;  %v1722_v61 = vcombine.low %v1697_v42, %v1705_v43  ;;  %v1707_v11 = vcombine.high %v1681_v56, %v1689_v58  ;;  %v1723_v12 = vcombine.high %v1697_v42, %v1705_v43 }
 0x551   : > { %v1714_v15 = vrot.slane %v1706_v60, %v7459_v17  ;;  %v1730_v16 = vrot.slane %v1722_v61, %v7459_v17  ;;  %v1721_v19 = vrot.slane %v1707_v11, %v7459_v17  ;;  %v1737_v54 = vrot.slane %v1723_v12, %v7459_v17 }
 0x553   : > { %v1738_v39 = vcombine.low %v1714_v15, %v1730_v16  ;;  %v1739_v25 = vcombine.high %v1714_v15, %v1730_v16  ;;  %v1740_v26 = vcombine.low %v1721_v19, %v1737_v54  ;;  %v1741_v28 = vcombine.high %v1721_v19, %v1737_v54 }
 0x554   : > { %v6924_v7 = vpop.eup %6923 }
 0x555   : > { %v2048_v31 = vpack.c.bf16 %v1738_v39, %v1670_v49  ;;  %v2049_v32 = vpack.c.bf16 %v1739_v25, %v1671_v3  ;;  %v2050_v33 = vpack.c.bf16 %v1740_v26, %v1672_v5  ;;  %v2051_v18 = vpack.c.bf16 %v1741_v28, %v1673_v62 }
 0x556   : > { %v2045_v49 = vpack.c.bf16 %v2035_v55, %v2033_v35  ;;  %v2037_v5 = vmul.f32 %v6924_v7, %v7635_v29  ;;  %v6567_v29 = vld [vmem:[%s8146_s4] sm:$0xff]  }
 0x557   : > { %6315 = vmatpush3.bf16.msra.mxu0 %v2048_v31  ;;  %6321 = vmatpush3.bf16.msra.mxu1 %v2049_v32 }
 0x558   : > { %6326 = vmatprep.subr.bf16.mxu0 %v7142_v4  ;;  %6332 = vmatprep.subr.bf16.mxu1 %v7142_v4  ;;  %v6926_v9 = vpop.eup %6925 }
 0x559   : > { %v2041_v40 = vmul.f32 %v6926_v9, %v7643_v46  ;;  %v6568_v46 = vld [vmem:[%s8146_s4 + $0x8] sm:$0xff]  }
 0x55a   : > { %6317 = vmatmul.mubr.msk.bf16.vlgmr.msra.gmra.mrb[12].mxu0 %vm1955_vm2, %v2044_v24  ;;  %6323 = vmatmul.mubr.msk.bf16.vlgmr.msra.gmra.mrb[12].mxu1 %vm1955_vm2, %v2045_v49 }
 0x55b   : > { %6327 = vmatpush3.bf16.msra.mxu0 %v2050_v33  ;;  %6333 = vmatpush3.bf16.msra.mxu1 %v2051_v18 }
 0x55c   : > { %6328 = vmatprep.mubr.msk.bf16.mxu0 %vm7144_vm0, %v7142_v4  ;;  %6334 = vmatprep.mubr.msk.bf16.mxu1 %vm7144_vm0, %v7142_v4 }
 0x55d   : > { %6338 = vmatprep.subr.bf16.mxu0 %v7142_v4 }
 0x573   : > { %v2021_v0 = vpop.xlane.xlu1 %2020 }
 0x574   : > { %6927 = vrcp.f32 %v2021_v0 }
 0x575   : > { %v2027_v2 = vpop.xlane.xlu0 %2026 }
 0x576   : > { %6929 = vrcp.f32 %v2027_v2 }
 0x57e   : > { %v6928_v3 = vpop.eup %6927 }
 0x57f   : > { %v2039_v62 = vmul.f32 %v6928_v3, %v7679_v20  ;;  %v6569_v20 = vld [vmem:[%s8146_s4 + $0x10] sm:$0xff]  }
 0x580   : > { %v6930_v37 = vpop.eup %6929 }
 0x581   : > { %v2043_v44 = vmul.f32 %v6930_v37, %v7683_v22  ;;  %v2046_v45 = vpack.c.bf16 %v2039_v62, %v2037_v5  ;;  %v6570_v22 = vld [vmem:[%s8146_s4 + $0x18] sm:$0xff]  }
 0x583   : > { %6329 = vmatmul.mubr.msk.bf16.vlgmr.msra.gmra.mrb[16].mxu0 %vm1955_vm2, %v2046_v45  ;;  %v2047_v47 = vpack.c.bf16 %v2043_v44, %v2041_v40 }
 0x584   : > { %6354 = vmatprep.mubr.msk.bf16.mxu0 %vm7144_vm0, %v7142_v4  ;;  %6339 = vmatpush3.bf16.msra.mxu0 %v6567_v29 }
 0x585   : > { %6335 = vmatmul.mubr.msk.bf16.vlgmr.msra.gmra.mrb[16].mxu1 %vm1955_vm2, %v2047_v47  ;;  %6340 = vmatprep.subr.bf16.mxu0 %v7142_v4 }
 0x588   : > { %6341 = vmatpush3.bf16.msra.mxu0 %v6568_v46 }
 0x589   : > { %6342 = vmatprep.subr.bf16.mxu0 %v7142_v4 }
 0x58c   : > { %6343 = vmatpush3.bf16.msra.mxu0 %v6569_v20 }
 0x58d   : > { %6344 = vmatprep.subr.bf16.mxu0 %v7142_v4 }
 0x590   : > { %6345 = vmatpush3.bf16.msra.mxu0 %v6570_v22 }
 0x591   : > { %6346 = vmatprep.subr.bf16.mxu0 %v7142_v4 }
 0x594   : > { %6347 = vmatpush3.bf16.msra.mxu0 %v6571_v57 }
 0x595   : > { %6348 = vmatprep.subr.bf16.mxu0 %v7142_v4 }
 0x598   : > { %6349 = vmatpush3.bf16.msra.mxu0 %v6572_v48 }
 0x599   : > { %6350 = vmatprep.subr.bf16.mxu0 %v7142_v4 }
 0x62d   : > { %v2089_v50 = vpop.f32.mrb[12].mxu0  ;;  %v2133_v1 = vpop.f32.mrb[12].mxu1 }
 0x62e   : > { %v6318_v38 = vpop.f32.mrb[13].mxu0  ;;  %v6324_v36 = vpop.f32.mrb[13].mxu1 }
 0x62f   : > { %v2092_v41 = vpop.f32.mrb[14].mxu0  ;;  %v2136_v51 = vpop.f32.mrb[14].mxu1  ;;  %v6573_v38 = vld [vmem:[%s8146_s4 + $0x30] sm:$0xff]  }
 0x630   : > { %v6319_v52 = vpop.f32.mrb[15].mxu0  ;;  %v6325_v53 = vpop.f32.mrb[15].mxu1  ;;  %6351 = vmatpush3.bf16.msra.mxu0 %v6573_v38  ;;  %v2688_v38 = vld [vmem:[%s8150_s8] sm:$0xff] }
 0x631   : > { %6352 = vmatprep.subr.bf16.mxu0 %v7142_v4 }
 0x656   : > { %v2177_v56 = vpop.f32.mrb[16].mxu0 }
 0x657   : > { %v2228_v58 = vcombine.low %v2089_v50, %v2177_v56  ;;  %v2229_v42 = vcombine.high %v2089_v50, %v2177_v56  ;;  %v6330_v43 = vpop.f32.mrb[17].mxu0 }
 0x658   : > { %v2180_v59 = vpop.f32.mrb[18].mxu0  ;;  %v2221_v8 = vpop.f32.mrb[16].mxu1 }
 0x659   : > { %v2296_v60 = vcombine.low %v2092_v41, %v2180_v59  ;;  %v2297_v61 = vcombine.high %v2092_v41, %v2180_v59  ;;  %v6331_v11 = vpop.f32.mrb[19].mxu0  ;;  %v6336_v12 = vpop.f32.mrb[17].mxu1  ;;  %v2244_v14 = vcombine.low %v2133_v1, %v2221_v8  ;;  %v2245_v15 = vcombine.high %v2133_v1, %v2221_v8 }
 0x65a   : > { %v2224_v16 = vpop.f32.mrb[18].mxu1  ;;  %v2236_v39 = vrot.slane %v2228_v58, %v7456_v10  ;;  %v2243_v25 = vrot.slane %v2229_v42, %v7456_v10 }
 0x65b   : > { %v2312_v19 = vcombine.low %v2136_v51, %v2224_v16  ;;  %v2313_v54 = vcombine.high %v2136_v51, %v2224_v16  ;;  %v6337_v23 = vpop.f32.mrb[19].mxu1  ;;  %v2252_v26 = vrot.slane %v2244_v14, %v7456_v10  ;;  %v2259_v27 = vrot.slane %v2245_v15, %v7456_v10 }
 0x65c   : > { %v2304_v55 = vrot.slane %v2296_v60, %v7456_v10  ;;  %v2311_v28 = vrot.slane %v2297_v61, %v7456_v10 }
 0x65d   : > { %v2320_v31 = vrot.slane %v2312_v19, %v7456_v10  ;;  %v2327_v32 = vrot.slane %v2313_v54, %v7456_v10  ;;  %v2260_v33 = vcombine.low %v2236_v39, %v2252_v26  ;;  %v2261_v34 = vcombine.high %v2236_v39, %v2252_v26  ;;  %v6574_v54 = vld [vmem:[%s8146_s4 + $0x38] sm:$0xff]  }
 0x65e   : > { %v2276_v35 = vcombine.low %v2243_v25, %v2259_v27  ;;  %v2277_v18 = vcombine.high %v2243_v25, %v2259_v27  ;;  %6353 = vmatpush3.bf16.msra.mxu0 %v6574_v54 }
 0x65f   : > { %v2328_v24 = vcombine.low %v2304_v55, %v2320_v31  ;;  %v2329_v49 = vcombine.high %v2304_v55, %v2320_v31  ;;  %v2344_v13 = vcombine.low %v2311_v28, %v2327_v32  ;;  %v2345_v21 = vcombine.high %v2311_v28, %v2327_v32 }
 0x660   : > { %v2268_v0 = vrot.slane %v2260_v33, %v7459_v17  ;;  %v2275_v2 = vrot.slane %v2261_v34, %v7459_v17  ;;  %v2284_v7 = vrot.slane %v2276_v35, %v7459_v17  ;;  %v2291_v9 = vrot.slane %v2277_v18, %v7459_v17 }
 0x661   : > { %v2336_v3 = vrot.slane %v2328_v24, %v7459_v17  ;;  %v2343_v5 = vrot.slane %v2329_v49, %v7459_v17  ;;  %v2352_v62 = vrot.slane %v2344_v13, %v7459_v17  ;;  %v2359_v37 = vrot.slane %v2345_v21, %v7459_v17 }
 0x662   : > { %v2364_v40 = vcombine.low %v2268_v0, %v2275_v2  ;;  %v5749_v44 = vcombine.high %v2268_v0, %v2275_v2  ;;  %v2380_v45 = vcombine.low %v2284_v7, %v2291_v9  ;;  %v5750_v47 = vcombine.high %v2284_v7, %v2291_v9 }
 0x663   : > { %v2432_v29 = vcombine.low %v2336_v3, %v2343_v5  ;;  %v5751_v46 = vcombine.high %v2336_v3, %v2343_v5  ;;  %v2448_v20 = vcombine.low %v2352_v62, %v2359_v37  ;;  %v5752_v22 = vcombine.high %v2352_v62, %v2359_v37 }
 0x664   : > { %v2371_v57 = vrot.slane %v2364_v40, %v7456_v10  ;;  %v2379_v48 = vrot.slane %v5749_v44, %v7456_v10  ;;  %v2387_v50 = vrot.slane %v2380_v45, %v7456_v10  ;;  %v2395_v1 = vrot.slane %v5750_v47, %v7456_v10  ;;  %v5753_v44 = vld [vmem:[%s8147_s5] ss:$0 sm:$0xff] }
 0x665   : > { %v2439_v36 = vrot.slane %v2432_v29, %v7456_v10  ;;  %v2447_v41 = vrot.slane %v5751_v46, %v7456_v10  ;;  %v2455_v51 = vrot.slane %v2448_v20, %v7456_v10  ;;  %v2463_v52 = vrot.slane %v5752_v22, %v7456_v10  ;;  %v6943_v20 = vld [vmem:[%s7382_s30] sm:$0xff] }
 0x666   : > { %v2397_v53 = vcombine.high %v2371_v57, %v2379_v48  ;;  %v2413_v56 = vcombine.high %v2387_v50, %v2395_v1  ;;  %v2396_v58 = vcombine.low %v2371_v57, %v2379_v48  ;;  %v2412_v42 = vcombine.low %v2387_v50, %v2395_v1  ;;  %v6944_v50 = vld [vmem:[%s7382_s30 + $0x8] sm:$0xff]  ;;  %s6037_s30 = sshll.u32 %s7260_s25, 5 }
 0x667   : > { %v2465_v43 = vcombine.high %v2439_v36, %v2447_v41  ;;  %v2481_v59 = vcombine.high %v2455_v51, %v2463_v52  ;;  %v2464_v8 = vcombine.low %v2439_v36, %v2447_v41  ;;  %v2480_v60 = vcombine.low %v2455_v51, %v2463_v52  ;;  %v2689_v36 = vld [vmem:[%s8150_s8 + $0x8] sm:$0xff]  ;;  %v6575_v41 = vld [vmem:[#allocation5] ss:$16 sps:$4 sm:$0xff]   ;;  %v6577_v52 = vld [vmem:[#allocation5 + $0x4] ss:$16 sps:$4 sm:$0xff]   ;;  %s8062_s22 = scalar_lea.hbm %s8199_s15, %s6037_s30 }
 0x668   : > { %v2411_v61 = vrot.slane %v2397_v53, %v7459_v17  ;;  %v2427_v11 = vrot.slane %v2413_v56, %v7459_v17  ;;  %v2404_v12 = vrot.slane %v2396_v58, %v7459_v17  ;;  %v2420_v14 = vrot.slane %v2412_v42, %v7459_v17  ;;  %v2690_v53 = vld [vmem:[%s8150_s8 + $0x10] sm:$0xff]  ;;  %v2691_v56 = vld [vmem:[%s8150_s8 + $0x18] sm:$0xff]  ;;  %3072 = vmatprep.subr.bf16.mxu0 %v6577_v52 }
 0x669   : > { %v2479_v10 = vrot.slane %v2465_v43, %v7459_v17  ;;  %v2495_v15 = vrot.slane %v2481_v59, %v7459_v17  ;;  %v2472_v16 = vrot.slane %v2464_v8, %v7459_v17  ;;  %v2488_v19 = vrot.slane %v2480_v60, %v7459_v17  ;;  %v6580_v42 = vld [vmem:[#allocation5 + $0x24] ss:$16 sps:$4 sm:$0xff]   ;;  %v6578_v43 = vld [vmem:[#allocation5 + $0x20] ss:$16 sps:$4 sm:$0xff]  }
 0x66a   : > { %v2430_v23 = vcombine.low %v2411_v61, %v2427_v11  ;;  %v2428_v39 = vcombine.low %v2404_v12, %v2420_v14  ;;  %v2429_v25 = vcombine.high %v2404_v12, %v2420_v14  ;;  %v2431_v26 = vcombine.high %v2411_v61, %v2427_v11 }
 0x66b   : > { %v2498_v27 = vcombine.low %v2479_v10, %v2495_v15  ;;  %v2497_v55 = vcombine.high %v2472_v16, %v2488_v19  ;;  %v2496_v28 = vcombine.low %v2472_v16, %v2488_v19  ;;  %v2499_v31 = vcombine.high %v2479_v10, %v2495_v15  ;;  %v2692_v15 = vld [vmem:[%s8150_s8 + $0x20] sm:$0xff]  ;;  %v2693_v16 = vld [vmem:[%s8150_s8 + $0x28] sm:$0xff] }
 0x66c   : > { %v6393_v51 = vpack.c.bf16 %v2689_v36, %v2688_v38  ;;  %v6397_v58 = vpack.c.bf16 %v2691_v56, %v2690_v53  ;;  %v6581_v19 = vld [vmem:[#allocation5 + $0x40] ss:$16 sps:$4 sm:$0xff]   ;;  %v6401_v54 = vpack.c.bf16 %v2693_v16, %v2692_v15  ;;  %v6610_v15 = vld [vmem:[#allocation5 + $0x6c] ss:$16 sps:$4 sm:$0xff]  }
 0x66d   : > { %v6525_v32 = vpack.i.bf16 %v2498_v27, %v2430_v23  ;;  %v6520_v33 = vpack.i.bf16 %v2497_v55, %v2429_v25  ;;  %v6530_v34 = vpack.i.bf16 %v2499_v31, %v2431_v26  ;;  %v6583_v23 = vld [vmem:[#allocation5 + $0x44] ss:$16 sps:$4 sm:$0xff]   ;;  %v2695_v25 = vld [vmem:[%s8150_s8 + $0x38] sm:$0xff]  ;;  %v6584_v26 = vld [vmem:[#allocation5 + $0x60] ss:$16 sps:$4 sm:$0xff]  }
 0x66e   : > { %6394 = vmatprep.subr.bf16.mxu1 %v6393_v51  ;;  %v6586_v55 = vld [vmem:[#allocation5 + $0x64] ss:$16 sps:$4 sm:$0xff]   ;;  %v2697_v31 = vld [vmem:[%s8150_s8 + $0x48] sm:$0xff]  ;;  %v5763_v36 = vld [vmem:[%s8149_s7] ss:$0 sm:$0xff] }
 0x66f   : > { %6526 = vrot.lane.b32.xlu1 %v6525_v32, %s7146_s20  ;;  %6521 = vrot.lane.b32.xlu0 %v6520_v33, %s7147_s29  ;;  %v6589_v33 = vld [vmem:[#allocation5 + $0x84] ss:$16 sps:$4 sm:$0xff]  }
 0x670   : > { %6396 = vmatpush3.bf16.msra.mxu1 %v6393_v51  ;;  %v6628_v16 = vld [vmem:[#allocation7 + $0x10] sm:$0xff]  }
 0x671   : > { %6398 = vmatprep.subr.bf16.mxu1 %v6397_v58 }
 0x673   : > { %6531 = vrot.lane.b32.xlu1 %v6530_v34, %s7145_s23  ;;  %v2698_v34 = vld [vmem:[%s8150_s8 + $0x50] sm:$0xff]  ;;  %s8032_s23 = sand.u32 1, %s8197_s0   ;;  %s7150_s0 = smov [#allocation9]  }
 0x674   : > { %6400 = vmatpush3.bf16.msra.mxu1 %v6397_v58  ;;  %v6599_v58 = vld [vmem:[#allocation5 + $0x8] ss:$16 sps:$4 sm:$0xff]   ;;  %s5700_s20 = sshll.u32 %s8032_s23, 1  ;;  %s5538_s26 = scalar_lea.sflag [#allocation10], %s8032_s23 }
 0x675   : > { %6402 = vmatprep.subr.bf16.mxu1 %v6401_v54  ;;  %s8035_s29 = scalar_lea.vmem [#allocation9], %s5700_s20  ;;  %s7033_s20 = sshll.u32 %s7150_s0, 4  ;;  %s7034_s20 = int_to_ptr.vmem [resolvable:$false] %s7033_s20 }
 0x676   : > { %s5567_s10 = sshll.u32 %s8035_s29, 4  ;;  %s7035_s18 = scalar_lea.vmem %s7034_s20, 64  ;;  %s5568_s10 = int_to_ptr.vmem [resolvable:$true] %s5567_s10 }
 0x677   : > { %s7029_s19 = scalar_lea.vmem %s5568_s10, 32  ;;  %p7036_p4 = scmp.lt.s32.totalorder %s5568_s10, %s7034_s20 }
 0x678   : > { %6404 = vmatpush3.bf16.msra.mxu1 %v6401_v54  ;;  %v6608_v54 = vld [vmem:[#allocation5 + $0x68] ss:$16 sps:$4 sm:$0xff]   ;;  %p7030_p12 = scmp.ne.s32.totalorder %s5568_s10, %s7029_s19  ;;  %p7037_p7 = scmp.lt.s32.totalorder %s7035_s18, %s7029_s19 }
 0x67a   : > { %p7031_p2 = pnand %p7030_p12, %p8200_p1  ;;  %p7038_p8 = por %p7037_p7, %p7036_p4 }
 0x67c   : > { %p7032_p3 = pneg %p7031_p2 }
 0x67e   : > { %p7039_p11 = pnand %p7038_p8, %p7032_p3 }
 0x6e1   : > { %v6527_v17 = vpop.permute.xlu1 %6526  ;;  %v6522_v35 = vpop.permute.xlu0 %6521 }
 0x6e2   : > { %v6524_v18 = vunpack.i.h.bf16 %v6522_v35  ;;  %v6523_v24 = vunpack.i.l.bf16 %v6522_v35  ;;  %v6529_v49 = vunpack.i.h.bf16 %v6527_v17  ;;  %v6528_v13 = vunpack.i.l.bf16 %v6527_v17  ;;  %v2699_v17 = vld [vmem:[%s8150_s8 + $0x58] sm:$0xff]  ;;  %v6587_v35 = vld [vmem:[#allocation5 + $0x80] ss:$16 sps:$4 sm:$0xff]  }
 0x6e4   : > { %v2524_v21 = vsel %vm1750_vm1, %v2428_v39, %v6523_v24  ;;  %v2525_v0 = vsel %vm1750_vm1, %v2496_v28, %v6524_v18  ;;  %v2694_v39 = vld [vmem:[%s8150_s8 + $0x30] sm:$0xff]  ;;  %v2696_v28 = vld [vmem:[%s8150_s8 + $0x40] sm:$0xff]  ;;  %v6413_v18 = vpack.c.bf16 %v2699_v17, %v2698_v34  ;;  %v6620_v34 = vld [vmem:[#allocation5 + $0xe8] ss:$16 sps:$4 sm:$0xff]  }
 0x6e5   : > { %v6532_v2 = vpop.permute.xlu1 %6531  ;;  %v2527_v3 = vsel %vm2526_vm3, %v2524_v21, %v6528_v13  ;;  %v2528_v5 = vsel %vm2526_vm3, %v2525_v0, %v6529_v49  ;;  %v6405_v27 = vpack.c.bf16 %v2695_v25, %v2694_v39  ;;  %v6409_v32 = vpack.c.bf16 %v2697_v31, %v2696_v28  ;;  %v6592_v24 = vld [vmem:[#allocation5 + $0xa4] ss:$16 sps:$4 sm:$0xff]   ;;  %v2701_v13 = vld [vmem:[%s8150_s8 + $0x68] sm:$0xff]  ;;  %v6590_v21 = vld [vmem:[#allocation5 + $0xa0] ss:$16 sps:$4 sm:$0xff]  }
 0x6e6   : > { %v6534_v7 = vunpack.i.h.bf16 %v6532_v2  ;;  %v6533_v9 = vunpack.i.l.bf16 %v6532_v2  ;;  %v2700_v49 = vld [vmem:[%s8150_s8 + $0x60] sm:$0xff]  ;;  %v6630_v39 = vld [vmem:[#allocation7 + $0x18] sm:$0xff]   ;;  %v6633_v17 = vld [vmem:[#allocation7 + $0x68] sm:$0xff]  }
 0x6e7   : > { %6406 = vmatprep.subr.bf16.mxu1 %v6405_v27  ;;  %v6417_v0 = vpack.c.bf16 %v2701_v13, %v2700_v49  ;;  %v6595_v2 = vld [vmem:[#allocation5 + $0xc4] ss:$16 sps:$4 sm:$0xff]   ;;  %v6614_v28 = vld [vmem:[#allocation5 + $0xa8] ss:$16 sps:$4 sm:$0xff]   ;;  %v6619_v31 = vld [vmem:[#allocation5 + $0xcc] ss:$16 sps:$4 sm:$0xff]  }
 0x6e8   : > { %v2530_v62 = vsel %vm2529_vm4, %v2527_v3, %v6533_v9  ;;  %v2531_v37 = vsel %vm2529_vm4, %v2528_v5, %v6534_v7  ;;  %6408 = vmatpush3.bf16.msra.mxu1 %v6405_v27  ;;  %v2702_v7 = vld [vmem:[%s8150_s8 + $0x70] sm:$0xff]  ;;  %v2703_v9 = vld [vmem:[%s8150_s8 + $0x78] sm:$0xff]  ;;  %v6631_v25 = vld [vmem:[#allocation7 + $0x60] sm:$0xff]  }
 0x6e9   : > { %v2532_v40 = vpack.c.bf16 %v2531_v37, %v2530_v62  ;;  %6410 = vmatprep.subr.bf16.mxu1 %v6409_v32  ;;  %v6593_v3 = vld [vmem:[#allocation5 + $0xc0] ss:$16 sps:$4 sm:$0xff]   ;;  %v6421_v5 = vpack.c.bf16 %v2703_v9, %v2702_v7  ;;  %v6598_v37 = vld [vmem:[#allocation5 + $0xe4] ss:$16 sps:$4 sm:$0xff]   ;;  %v6616_v27 = vld [vmem:[#allocation5 + $0xac] ss:$16 sps:$4 sm:$0xff]  }
 0x6ea   : > { %v6596_v62 = vld [vmem:[#allocation5 + $0xe0] ss:$16 sps:$4 sm:$0xff]   ;;  %v6637_v49 = vld [vmem:[#allocation7 + $0x78] sm:$0xff]   ;;  %v6644_v7 = vld [vmem:[#allocation7 + $0xc8] sm:$0xff]  }
 0x6eb   : > { %6355 = vmatmul.mubr.bf16.vlgmr.msra.gmra.mrb[20].mxu0 %v2532_v40  ;;  %v6601_v40 = vld [vmem:[#allocation5 + $0xc] ss:$16 sps:$4 sm:$0xff]   ;;  %v6639_v13 = vld [vmem:[#allocation7 + $0xc0] sm:$0xff]  }
 0x6ec   : > { %3104 = vmatprep.mubr.bf16.mxu0 %v7143_v30  ;;  %3073 = vmatpush1.bf16.msra.mxu0 %v6575_v41  ;;  %v6645_v9 = vld [vmem:[#allocation7 + $0x88] sm:$0xff]  }
 0x6ed   : > { %3074 = vmatprep.subr.bf16.mxu0 %v6580_v42  ;;  %6412 = vmatpush3.bf16.msra.mxu1 %v6409_v32  ;;  %v6617_v32 = vld [vmem:[#allocation5 + $0xc8] ss:$16 sps:$4 sm:$0xff]  }
 0x6ee   : > { %6414 = vmatprep.subr.bf16.mxu1 %v6413_v18 }
 0x6f0   : > { %3075 = vmatpush1.bf16.msra.mxu0 %v6578_v43  ;;  %v6604_v43 = vld [vmem:[#allocation5 + $0x2c] ss:$16 sps:$4 sm:$0xff]  }
 0x6f1   : > { %3076 = vmatprep.subr.bf16.mxu0 %v6583_v23  ;;  %6416 = vmatpush3.bf16.msra.mxu1 %v6413_v18  ;;  %v6613_v23 = vld [vmem:[#allocation5 + $0x8c] ss:$16 sps:$4 sm:$0xff]   ;;  %v6635_v18 = vld [vmem:[#allocation7 + $0x70] sm:$0xff]  }
 0x6f2   : > { %6418 = vmatprep.subr.bf16.mxu1 %v6417_v0 }
 0x6f4   : > { %3077 = vmatpush1.bf16.msra.mxu0 %v6581_v19  ;;  %v6629_v19 = vld [vmem:[#allocation7 + $0x58] sm:$0xff]  }
 0x6f5   : > { %3078 = vmatprep.subr.bf16.mxu0 %v6586_v55  ;;  %6420 = vmatpush3.bf16.msra.mxu1 %v6417_v0  ;;  %v6632_v55 = vld [vmem:[#allocation7 + $0x20] sm:$0xff]   ;;  %v6638_v0 = vld [vmem:[#allocation7 + $0x38] sm:$0xff]  }
 0x6f6   : > { %6422 = vmatprep.subr.bf16.mxu1 %v6421_v5 }
 0x6f8   : > { %3079 = vmatpush1.bf16.msra.mxu0 %v6584_v26  ;;  %v6611_v26 = vld [vmem:[#allocation5 + $0x88] ss:$16 sps:$4 sm:$0xff]  }
 0x6f9   : > { %3080 = vmatprep.subr.bf16.mxu0 %v6589_v33  ;;  %6424 = vmatpush3.bf16.msra.mxu1 %v6421_v5  ;;  %v6622_v33 = vld [vmem:[#allocation5 + $0xec] ss:$16 sps:$4 sm:$0xff]   ;;  %v6650_v5 = vld [vmem:[#allocation7 + $0x90] sm:$0xff]  }
 0x6fa   : > { %3115 = vmatprep.subr.bf16.mxu1 %v6601_v40  ;;  %v6659_v40 = vld [vmem:[#allocation7 + $0xe0] sm:$0xff]  }
 0x6fc   : > { %3081 = vmatpush1.bf16.msra.mxu0 %v6587_v35  ;;  %v6634_v35 = vld [vmem:[#allocation7 + $0x28] sm:$0xff]  }
 0x6fd   : > { %3082 = vmatprep.subr.bf16.mxu0 %v6592_v24  ;;  %v6636_v24 = vld [vmem:[#allocation7 + $0x30] sm:$0xff]  }
 0x700   : > { %3083 = vmatpush1.bf16.msra.mxu0 %v6590_v21  ;;  %v6640_v21 = vld [vmem:[#allocation7 + $0x80] sm:$0xff]  }
 0x701   : > { %3084 = vmatprep.subr.bf16.mxu0 %v6595_v2  ;;  %v6643_v2 = vld [vmem:[#allocation5 + $0x104] ss:$16 sps:$4 sm:$0xff]  }
 0x704   : > { %3085 = vmatpush1.bf16.msra.mxu0 %v6593_v3  ;;  %v6649_v3 = vld [vmem:[#allocation7 + $0xd0] sm:$0xff]  }
 0x705   : > { %3086 = vmatprep.subr.bf16.mxu0 %v6598_v37  ;;  %v6655_v37 = vld [vmem:[#allocation7 + $0x98] sm:$0xff]  }
 0x708   : > { %3087 = vmatpush1.bf16.msra.mxu0 %v6596_v62  ;;  %v6654_v62 = vld [vmem:[#allocation7 + $0xd8] sm:$0xff]  }
 0x7be   : > { %v2638_v45 = vpop.f32.mrb[20].mxu0 }
 0x7bf   : > { %v2639_v47 = vadd.f32 %v5753_v44, %v2638_v45  ;;  %v6356_v29 = vpop.f32.mrb[21].mxu0 }
 0x7c0   : > { %v2641_v46 = vpop.f32.mrb[22].mxu0 }
 0x7c1   : > { %v7813_v22 = vadd.f32 %v6943_v20, %v2639_v47  ;;  %v2642_v57 = vadd.f32 %v5753_v44, %v2641_v46  ;;  %v6357_v48 = vpop.f32.mrb[23].mxu0  ;;  %v6623_v44 = vld [vmem:[#allocation7 + $0x40] sm:$0xff]  }
 0x7c2   : > { %6094 = vmatprep.subr.bf16.mxu0 %v6623_v44  ;;  %v6660_v44 = vld [vmem:[#allocation7 + $0xa0] sm:$0xff]  }
 0x7c3   : > { %v7816_v1 = vadd.f32 %v6944_v50, %v2642_v57  ;;  %2649 = vadd.xlane.f32.xlu1 %v7813_v22  ;;  %v5762_v50 = vld [vmem:[%s8148_s6] ss:$0 sm:$0xff] }
 0x7c5   : > { %2651 = vadd.xlane.f32.xlu0 %v7816_v1 }
 0x850   : > { %v2650_v59 = vpop.xlane.xlu1 %2649 }
 0x851   : > { %v2653_v8 = vmul.f32 0.0078125, %v2650_v59  ;;  %v6624_v59 = vld [vmem:[#allocation7] sm:$0xff]  }
 0x852   : > { %v2652_v60 = vpop.xlane.xlu0 %2651 }
 0x853   : > { %v7833_v61 = vsub.f32 %v7813_v22, %v2653_v8  ;;  %v2654_v11 = vmul.f32 0.0078125, %v2652_v60  ;;  %v6625_v60 = vld [vmem:[#allocation7 + $0x48] sm:$0xff]  }
 0x855   : > { %v7836_v12 = vsub.f32 %v7816_v1, %v2654_v11  ;;  %v2657_v14 = vmul.f32 %v7833_v61, %v7833_v61  ;;  %v6607_v11 = vld [vmem:[#allocation5 + $0x4c] ss:$16 sps:$4 sm:$0xff]  }
 0x857   : > { %2659 = vadd.xlane.f32.xlu0 %v2657_v14  ;;  %v2658_v10 = vmul.f32 %v7836_v12, %v7836_v12  ;;  %v6627_v14 = vld [vmem:[#allocation7 + $0x50] sm:$0xff]  }
 0x85b   : > { %2661 = vadd.xlane.f32.xlu0 %v2658_v10  ;;  %v6605_v10 = vld [vmem:[#allocation5 + $0x48] ss:$16 sps:$4 sm:$0xff]  }
 0x8e4   : > { %v2660_v45 = vpop.xlane.xlu0 %2659 }
 0x8e5   : > { %v2663_v47 = vmul.f32 0.0078125, %v2660_v45  ;;  %v6664_v45 = vld [vmem:[#allocation7 + $0xe8] sm:$0xff]  }
 0x8e7   : > { %v2665_v29 = vadd.f32 1e-05, %v2663_v47  ;;  %v6665_v47 = vld [vmem:[#allocation7 + $0xa8] sm:$0xff]  }
 0x8e8   : > { %v2662_v46 = vpop.xlane.xlu0 %2661 }
 0x8e9   : > { %6931 = vrsqrt.f32 %v2665_v29  ;;  %v2664_v20 = vmul.f32 0.0078125, %v2662_v46  ;;  %v6669_v29 = vld [vmem:[#allocation7 + $0xf0] sm:$0xff]  }
 0x8ea   : > { %v6670_v46 = vld [vmem:[#allocation7 + $0xb0] sm:$0xff]  }
 0x8eb   : > { %v2666_v57 = vadd.f32 1e-05, %v2664_v20  ;;  %v6674_v20 = vld [vmem:[#allocation7 + $0xf8] sm:$0xff]  }
 0x8ed   : > { %6933 = vrsqrt.f32 %v2666_v57  ;;  %v6675_v57 = vld [vmem:[#allocation7 + $0xb8] sm:$0xff]  }
 0x8f3   : > { %v6932_v48 = vpop.eup %6931 }
 0x8f4   : > { %v2669_v38 = vmul.f32 %v6932_v48, %v7833_v61  ;;  %v6602_v61 = vld [vmem:[#allocation5 + $0x28] ss:$16 sps:$4 sm:$0xff]   ;;  %v6681_v48 = vld [vmem:[#allocation5 + $0x10c] ss:$16 sps:$4 sm:$0xff]  }
 0x8f6   : > { %v2677_v41 = vmul.f32 %v5762_v50, %v2669_v38  ;;  %v2890_v38 = vld [vmem:[%s8153_s11] sm:$0xf] }
 0x8f7   : > { %v6934_v51 = vpop.eup %6933 }
 0x8f8   : > { %v2670_v52 = vmul.f32 %v6934_v51, %v7836_v12  ;;  %v2685_v53 = vadd.f32 %v5763_v36, %v2677_v41  ;;  %v6626_v12 = vld [vmem:[#allocation7 + $0x8] sm:$0xff]   ;;  %v5764_v41 = vld [vmem:[%s8151_s9] ss:$0 sm:$0xff] }
 0x8fa   : > { %v2678_v56 = vmul.f32 %v5762_v50, %v2670_v52  ;;  %6390 = vmatprep.mubr.f32.mxu1 %v2685_v53  ;;  %v7892_v50 = vsub.s32 0, %v7451_v6 }
 0x8fc   : > { %v2686_v42 = vadd.f32 %v5763_v36, %v2678_v56  ;;  %v7898_v36 = vsub.s32 1, %v7451_v6  ;;  %v2895_v51 = vrot.slane %v2890_v38, %v7892_v50 }
 0x8fe   : > { %v7886_v8 = vpack.c.bf16 %v2686_v42, %v2685_v53  ;;  %6391 = vmatmul.mubr.f32.vlgmr.msra.gmra.mrb[20].mxu1 %v2686_v42  ;;  %v2899_v53 = vrot.slane %v2890_v38, %v7898_v36 }
 0x8ff   : > { %3116 = vmatpush1.bf16.msra.mxu1 %v6599_v58  ;;  %3147 = vmatprep.mubr.bf16.mxu1 %v7143_v30 }
 0x900   : > { %3105 = vmatmul.mubr.bf16.vlgmr.msra.gmra.mrb[24].mxu0 %v7886_v8  ;;  %3117 = vmatprep.subr.bf16.mxu1 %v6604_v43 }
 0x901   : > { %6095 = vmatpush3.bf16.msra.mxu0 %v6624_v59 }
 0x902   : > { %6096 = vmatprep.subr.bf16.mxu0 %v6625_v60 }
 0x903   : > { %3118 = vmatpush1.bf16.msra.mxu1 %v6602_v61 }
 0x904   : > { %3119 = vmatprep.subr.bf16.mxu1 %v6607_v11 }
 0x905   : > { %6097 = vmatpush3.bf16.msra.mxu0 %v6626_v12 }
 0x906   : > { %6098 = vmatprep.subr.bf16.mxu0 %v6627_v14 }
 0x907   : > { %3120 = vmatpush1.bf16.msra.mxu1 %v6605_v10 }
 0x908   : > { %3121 = vmatprep.subr.bf16.mxu1 %v6610_v15 }
 0x909   : > { %6099 = vmatpush3.bf16.msra.mxu0 %v6628_v16 }
 0x90a   : > { %6100 = vmatprep.subr.bf16.mxu0 %v6629_v19 }
 0x90b   : > { %3122 = vmatpush1.bf16.msra.mxu1 %v6608_v54 }
 0x90c   : > { %3123 = vmatprep.subr.bf16.mxu1 %v6613_v23 }
 0x90d   : > { %6101 = vmatpush3.bf16.msra.mxu0 %v6630_v39 }
 0x90e   : > { %6102 = vmatprep.subr.bf16.mxu0 %v6631_v25 }
 0x90f   : > { %3124 = vmatpush1.bf16.msra.mxu1 %v6611_v26 }
 0x910   : > { %3125 = vmatprep.subr.bf16.mxu1 %v6616_v27  ;;  %v6641_v27 = vld [vmem:[#allocation5 + $0x100] ss:$16 sps:$4 sm:$0xff]  }
 0x911   : > { %6103 = vmatpush3.bf16.msra.mxu0 %v6632_v55  ;;  %v6648_v55 = vld [vmem:[#allocation5 + $0x124] ss:$16 sps:$4 sm:$0xff]  }
 0x912   : > { %6104 = vmatprep.subr.bf16.mxu0 %v6633_v17  ;;  %v6663_v17 = vld [vmem:[#allocation5 + $0x184] ss:$16 sps:$4 sm:$0xff]  }
 0x913   : > { %3126 = vmatpush1.bf16.msra.mxu1 %v6614_v28  ;;  %v6646_v28 = vld [vmem:[#allocation5 + $0x120] ss:$16 sps:$4 sm:$0xff]  }
 0x914   : > { %3127 = vmatprep.subr.bf16.mxu1 %v6619_v31  ;;  %v6653_v31 = vld [vmem:[#allocation5 + $0x144] ss:$16 sps:$4 sm:$0xff]  }
 0x915   : > { %6105 = vmatpush3.bf16.msra.mxu0 %v6634_v35  ;;  %v7915_v35 = vsub.s32 2, %v7451_v6 }
 0x916   : > { %6106 = vmatprep.subr.bf16.mxu0 %v6635_v18  ;;  %v6661_v18 = vld [vmem:[#allocation5 + $0x180] ss:$16 sps:$4 sm:$0xff]  }
 0x917   : > { %3128 = vmatpush1.bf16.msra.mxu1 %v6617_v32  ;;  %v6651_v32 = vld [vmem:[#allocation5 + $0x140] ss:$16 sps:$4 sm:$0xff]  }
 0x918   : > { %3129 = vmatprep.subr.bf16.mxu1 %v6622_v33  ;;  %v6658_v33 = vld [vmem:[#allocation5 + $0x164] ss:$16 sps:$4 sm:$0xff]  }
 0x919   : > { %6107 = vmatpush3.bf16.msra.mxu0 %v6636_v24  ;;  %v7918_v24 = vsub.s32 3, %v7451_v6 }
 0x91a   : > { %6108 = vmatprep.subr.bf16.mxu0 %v6637_v49  ;;  %v6668_v49 = vld [vmem:[#allocation5 + $0x1a4] ss:$16 sps:$4 sm:$0xff]  }
 0x91b   : > { %3130 = vmatpush1.bf16.msra.mxu1 %v6620_v34  ;;  %v6656_v34 = vld [vmem:[#allocation5 + $0x160] ss:$16 sps:$4 sm:$0xff]  }
 0x91c   : > { %6116 = vmatprep.subr.bf16.mxu1 %v6639_v13  ;;  %v2903_v13 = vrot.slane %v2890_v38, %v7915_v35 }
 0x91d   : > { %6109 = vmatpush3.bf16.msra.mxu0 %v6638_v0  ;;  %v6666_v0 = vld [vmem:[#allocation5 + $0x1a0] ss:$16 sps:$4 sm:$0xff]  }
 0x91e   : > { %3148 = vmatmul.mubr.bf16.vlgmr.msra.gmra.mrb[24].mxu1 %v7886_v8  ;;  %3739 = vmatprep.subr.bf16.mxu0 %v6643_v2  ;;  %v6673_v2 = vld [vmem:[#allocation5 + $0x1c4] ss:$16 sps:$4 sm:$0xff]  }
 0x91f   : > { %6117 = vmatpush3.bf16.msra.mxu1 %v6640_v21  ;;  %v2907_v21 = vrot.slane %v2890_v38, %v7918_v24 }
 0x920   : > { %6118 = vmatprep.subr.bf16.mxu1 %v6644_v7 }
 0x923   : > { %6119 = vmatpush3.bf16.msra.mxu1 %v6645_v9 }
 0x924   : > { %6120 = vmatprep.subr.bf16.mxu1 %v6649_v3 }
 0x927   : > { %6121 = vmatpush3.bf16.msra.mxu1 %v6650_v5 }
 0x928   : > { %6122 = vmatprep.subr.bf16.mxu1 %v6654_v62 }
 0x92b   : > { %6123 = vmatpush3.bf16.msra.mxu1 %v6655_v37  ;;  %v6671_v37 = vld [vmem:[#allocation5 + $0x1c0] ss:$16 sps:$4 sm:$0xff]  }
 0x92c   : > { %6124 = vmatprep.subr.bf16.mxu1 %v6659_v40 }
 0x92f   : > { %6125 = vmatpush3.bf16.msra.mxu1 %v6660_v44  ;;  %v6678_v44 = vld [vmem:[#allocation5 + $0x1e4] ss:$16 sps:$4 sm:$0xff]  }
 0x930   : > { %6126 = vmatprep.subr.bf16.mxu1 %v6664_v45 }
 0x933   : > { %6127 = vmatpush3.bf16.msra.mxu1 %v6665_v47 }
 0x934   : > { %6128 = vmatprep.subr.bf16.mxu1 %v6669_v29 }
 0x937   : > { %6129 = vmatpush3.bf16.msra.mxu1 %v6670_v46 }
 0x938   : > { %6130 = vmatprep.subr.bf16.mxu1 %v6674_v20 }
 0x93b   : > { %6131 = vmatpush3.bf16.msra.mxu1 %v6675_v57  ;;  %v6676_v57 = vld [vmem:[#allocation5 + $0x1e0] ss:$16 sps:$4 sm:$0xff]  }
 0x93c   : > { %3782 = vmatprep.subr.bf16.mxu1 %v6681_v48 }
 0x9d1   : > { %v6392_v52 = vpop.f32.mrb[20].mxu1 }
 0x9d2   : > { %v7905_v56 = vadd.f32 %v6392_v52, %v5764_v41  ;;  %v2777_v58 = vpop.f32.mrb[21].mxu1  ;;  %v6682_v52 = vld [vmem:[#allocation5 + $0x128] ss:$16 sps:$4 sm:$0xff]  }
 0x9d3   : > { %v7907_v42 = vadd.f32 %v5764_v41, %v2777_v58  ;;  %v3106_v43 = vpop.f32.mrb[24].mxu0  ;;  %v6679_v41 = vld [vmem:[#allocation5 + $0x108] ss:$16 sps:$4 sm:$0xff]  }
 0x9d4   : > { %v3107_v59 = vadd.f32 %v3106_v43, %v2895_v51  ;;  %v3108_v60 = vpop.f32.mrb[25].mxu0  ;;  %v2790_v61 = vsel %vm2786_vm5, %v7905_v56, -inf  ;;  %v6685_v58 = vld [vmem:[#allocation5 + $0x148] ss:$16 sps:$4 sm:$0xff]   ;;  %v6690_v43 = vld [vmem:[#allocation5 + $0x16c] ss:$16 sps:$4 sm:$0xff]  }
 0x9d5   : > { %v3109_v11 = vadd.f32 %v3108_v60, %v2899_v53  ;;  %2791 = vmax.xlane.f32.xlu0 %v2790_v61  ;;  %v3110_v12 = vpop.f32.mrb[26].mxu0  ;;  %v2787_v14 = vsel %vm2786_vm5, %v7907_v42, -inf  ;;  %v6693_v60 = vld [vmem:[#allocation5 + $0x18c] ss:$16 sps:$4 sm:$0xff]   ;;  %v6691_v61 = vld [vmem:[#allocation5 + $0x188] ss:$16 sps:$4 sm:$0xff]  }
 0x9d6   : > { %v3111_v10 = vadd.f32 %v3110_v12, %v2895_v51  ;;  %2788 = vmax.xlane.f32.xlu1 %v2787_v14  ;;  %v3112_v15 = vpop.f32.mrb[27].mxu0  ;;  %v3158_v19 = vmax.f32 %v3107_v59, 0.0  ;;  %v6684_v51 = vld [vmem:[#allocation5 + $0x12c] ss:$16 sps:$4 sm:$0xff]   ;;  %v6688_v59 = vld [vmem:[#allocation5 + $0x168] ss:$16 sps:$4 sm:$0xff]  }
 0x9d7   : > { %v3113_v16 = vadd.f32 %v3112_v15, %v2899_v53  ;;  %v3159_v23 = vmax.f32 %v3109_v11, 0.0  ;;  %v6687_v53 = vld [vmem:[#allocation5 + $0x14c] ss:$16 sps:$4 sm:$0xff]   ;;  %v6694_v12 = vld [vmem:[#allocation5 + $0x1a8] ss:$16 sps:$4 sm:$0xff]  }
 0x9d8   : > { %v3162_v54 = vmax.f32 %v3111_v10, 0.0  ;;  %v6696_v11 = vld [vmem:[#allocation5 + $0x1ac] ss:$16 sps:$4 sm:$0xff]   ;;  %v6697_v10 = vld [vmem:[#allocation5 + $0x1c8] ss:$16 sps:$4 sm:$0xff]  }
 0x9d9   : > { %v3163_v39 = vmax.f32 %v3113_v16, 0.0  ;;  %v6699_v14 = vld [vmem:[#allocation5 + $0x1cc] ss:$16 sps:$4 sm:$0xff]   ;;  %v6700_v16 = vld [vmem:[#allocation5 + $0x1e8] ss:$16 sps:$4 sm:$0xff]  }
 0x9da   : > { %v3166_v25 = vpack.c.bf16 %v3162_v54, %v3158_v19  ;;  %v6702_v15 = vld [vmem:[#allocation5 + $0x1ec] ss:$16 sps:$4 sm:$0xff]   ;;  %v6703_v19 = vld [vmem:[#allocation7 + $0x140] sm:$0xff]  }
 0x9db   : > { %v3167_v26 = vpack.c.bf16 %v3163_v39, %v3159_v23  ;;  %v6704_v54 = vld [vmem:[#allocation7 + $0x100] sm:$0xff]   ;;  %v6705_v23 = vld [vmem:[#allocation7 + $0x148] sm:$0xff]  }
 0x9dc   : > { %v6706_v39 = vld [vmem:[#allocation7 + $0x108] sm:$0xff]  }
 0x9dd   : > { %3465 = vmatprep.mubr.bf16.mxu0 %v3167_v26  ;;  %v6708_v26 = vld [vmem:[#allocation7 + $0x110] sm:$0xff]  }
 0x9de   : > { %3466 = vmatmul.mubr.bf16.vlgmr.msra.gmra.mrb[28].mxu0 %v3166_v25  ;;  %v6707_v25 = vld [vmem:[#allocation7 + $0x150] sm:$0xff]  }
 0x9df   : > { %3740 = vmatpush1.bf16.msra.mxu0 %v6641_v27  ;;  %3771 = vmatprep.mubr.bf16.mxu0 %v7143_v30  ;;  %v6709_v27 = vld [vmem:[#allocation7 + $0x158] sm:$0xff]  }
 0x9e0   : > { %3741 = vmatprep.subr.bf16.mxu0 %v6648_v55  ;;  %v6710_v55 = vld [vmem:[#allocation7 + $0x118] sm:$0xff]  }
 0x9e3   : > { %3742 = vmatpush1.bf16.msra.mxu0 %v6646_v28  ;;  %v6711_v28 = vld [vmem:[#allocation7 + $0x160] sm:$0xff]  }
 0x9e4   : > { %3743 = vmatprep.subr.bf16.mxu0 %v6653_v31  ;;  %v6712_v31 = vld [vmem:[#allocation7 + $0x120] sm:$0xff]  }
 0x9e7   : > { %3744 = vmatpush1.bf16.msra.mxu0 %v6651_v32  ;;  %v6713_v32 = vld [vmem:[#allocation7 + $0x168] sm:$0xff]  }
 0x9e8   : > { %3745 = vmatprep.subr.bf16.mxu0 %v6658_v33  ;;  %v6714_v33 = vld [vmem:[#allocation7 + $0x128] sm:$0xff]  }
 0x9eb   : > { %3746 = vmatpush1.bf16.msra.mxu0 %v6656_v34  ;;  %v6715_v34 = vld [vmem:[#allocation7 + $0x170] sm:$0xff]  }
 0x9ec   : > { %3747 = vmatprep.subr.bf16.mxu0 %v6663_v17  ;;  %v6716_v17 = vld [vmem:[#allocation7 + $0x130] sm:$0xff]  }
 0x9ef   : > { %3748 = vmatpush1.bf16.msra.mxu0 %v6661_v18  ;;  %v6717_v18 = vld [vmem:[#allocation7 + $0x178] sm:$0xff]  }
 0x9f0   : > { %3749 = vmatprep.subr.bf16.mxu0 %v6668_v49  ;;  %v6719_v49 = vld [vmem:[#allocation7 + $0x1c0] sm:$0xff]  }
 0x9f1   : > { %v3149_v7 = vpop.f32.mrb[24].mxu1 }
 0x9f2   : > { %v3150_v9 = vadd.f32 %v3149_v7, %v2903_v13  ;;  %v3151_v3 = vpop.f32.mrb[25].mxu1  ;;  %v6725_v7 = vld [vmem:[#allocation7 + $0x188] sm:$0xff]  }
 0x9f3   : > { %v3152_v5 = vadd.f32 %v3151_v3, %v2907_v21  ;;  %v3153_v62 = vpop.f32.mrb[26].mxu1  ;;  %3750 = vmatpush1.bf16.msra.mxu0 %v6666_v0  ;;  %v6723_v0 = vld [vmem:[#allocation5 + $0x204] ss:$16 sps:$4 sm:$0xff]  }
 0x9f4   : > { %v3154_v40 = vadd.f32 %v3153_v62, %v2903_v13  ;;  %v3155_v6 = vpop.f32.mrb[27].mxu1  ;;  %3751 = vmatprep.subr.bf16.mxu0 %v6673_v2  ;;  %v3160_v47 = vmax.f32 %v3150_v9, 0.0  ;;  %v6720_v13 = vld [vmem:[#allocation7 + $0x180] sm:$0xff]   ;;  %v6724_v2 = vld [vmem:[#allocation7 + $0x1c8] sm:$0xff]   ;;  %v6729_v9 = vld [vmem:[#allocation7 + $0x1d0] sm:$0xff]  }
 0x9f5   : > { %v3156_v45 = vadd.f32 %v3155_v6, %v2907_v21  ;;  %v3161_v46 = vmax.f32 %v3152_v5, 0.0  ;;  %v6718_v21 = vld [vmem:[#allocation7 + $0x138] sm:$0xff]   ;;  %v6730_v3 = vld [vmem:[#allocation7 + $0x190] sm:$0xff]  }
 0x9f6   : > { %v3164_v29 = vmax.f32 %v3154_v40, 0.0  ;;  %v6734_v62 = vld [vmem:[#allocation7 + $0x1d8] sm:$0xff]  }
 0x9f7   : > { %v3165_v20 = vmax.f32 %v3156_v45, 0.0  ;;  %3752 = vmatpush1.bf16.msra.mxu0 %v6671_v37  ;;  %v6735_v45 = vld [vmem:[#allocation7 + $0x198] sm:$0xff]  }
 0x9f8   : > { %v3168_v48 = vpack.c.bf16 %v3164_v29, %v3160_v47  ;;  %3753 = vmatprep.subr.bf16.mxu0 %v6678_v44  ;;  %v6739_v29 = vld [vmem:[#allocation7 + $0x1e0] sm:$0xff]  }
 0x9f9   : > { %v3169_v38 = vpack.c.bf16 %v3165_v20, %v3161_v46  ;;  %v6740_v46 = vld [vmem:[#allocation7 + $0x1a0] sm:$0xff]   ;;  %v6744_v20 = vld [vmem:[#allocation7 + $0x1e8] sm:$0xff]  }
 0x9fb   : > { %3506 = vmatprep.mubr.bf16.mxu1 %v3169_v38  ;;  %3754 = vmatpush1.bf16.msra.mxu0 %v6676_v57  ;;  %v6745_v57 = vld [vmem:[#allocation7 + $0x1a8] sm:$0xff]  }
 0x9fc   : > { %3507 = vmatmul.mubr.bf16.vlgmr.msra.gmra.mrb[28].mxu1 %v3168_v48  ;;  %6138 = vmatprep.subr.bf16.mxu0 %v6703_v19 }
 0x9fd   : > { %3783 = vmatpush1.bf16.msra.mxu1 %v6679_v41  ;;  %3814 = vmatprep.mubr.bf16.mxu1 %v7143_v30  ;;  %v6749_v41 = vld [vmem:[#allocation7 + $0x1f0] sm:$0xff]  }
 0x9fe   : > { %3772 = vmatmul.mubr.bf16.vlgmr.msra.gmra.mrb[32].mxu0 %v7886_v8  ;;  %3784 = vmatprep.subr.bf16.mxu1 %v6684_v51  ;;  %v6750_v51 = vld [vmem:[#allocation7 + $0x1b0] sm:$0xff]  }
 0x9ff   : > { %6139 = vmatpush3.bf16.msra.mxu0 %v6704_v54 }
 0xa00   : > { %6140 = vmatprep.subr.bf16.mxu0 %v6705_v23 }
 0xa01   : > { %3785 = vmatpush1.bf16.msra.mxu1 %v6682_v52  ;;  %v6754_v52 = vld [vmem:[#allocation7 + $0x1f8] sm:$0xff]  }
 0xa02   : > { %3786 = vmatprep.subr.bf16.mxu1 %v6687_v53  ;;  %v6755_v53 = vld [vmem:[#allocation7 + $0x1b8] sm:$0xff]  }
 0xa03   : > { %6141 = vmatpush3.bf16.msra.mxu0 %v6706_v39 }
 0xa04   : > { %6142 = vmatprep.subr.bf16.mxu0 %v6707_v25 }
 0xa05   : > { %3787 = vmatpush1.bf16.msra.mxu1 %v6685_v58  ;;  %v6761_v58 = vld [vmem:[#allocation5 + $0x20c] ss:$16 sps:$4 sm:$0xff]  }
 0xa06   : > { %3788 = vmatprep.subr.bf16.mxu1 %v6690_v43 }
 0xa07   : > { %6143 = vmatpush3.bf16.msra.mxu0 %v6708_v26 }
 0xa08   : > { %6144 = vmatprep.subr.bf16.mxu0 %v6709_v27 }
 0xa09   : > { %3789 = vmatpush1.bf16.msra.mxu1 %v6688_v59 }
 0xa0a   : > { %3790 = vmatprep.subr.bf16.mxu1 %v6693_v60 }
 0xa0b   : > { %6145 = vmatpush3.bf16.msra.mxu0 %v6710_v55 }
 0xa0c   : > { %6146 = vmatprep.subr.bf16.mxu0 %v6711_v28 }
 0xa0d   : > { %3791 = vmatpush1.bf16.msra.mxu1 %v6691_v61 }
 0xa0e   : > { %3792 = vmatprep.subr.bf16.mxu1 %v6696_v11 }
 0xa0f   : > { %6147 = vmatpush3.bf16.msra.mxu0 %v6712_v31 }
 0xa10   : > { %6148 = vmatprep.subr.bf16.mxu0 %v6713_v32 }
 0xa11   : > { %3793 = vmatpush1.bf16.msra.mxu1 %v6694_v12 }
 0xa12   : > { %3794 = vmatprep.subr.bf16.mxu1 %v6699_v14  ;;  %v5832_v14 = vld [vmem:[%s8153_s11 + $0x4] sm:$0xf] }
 0xa13   : > { %6149 = vmatpush3.bf16.msra.mxu0 %v6714_v33  ;;  %v3566_v19 = vrot.slane %v5832_v14, %v7898_v36 }
 0xa14   : > { %6150 = vmatprep.subr.bf16.mxu0 %v6715_v34 }
 0xa15   : > { %3795 = vmatpush1.bf16.msra.mxu1 %v6697_v10  ;;  %v5799_v10 = vld [vmem:[%s8155_s13] ss:$0 sm:$0xff] }
 0xa16   : > { %3796 = vmatprep.subr.bf16.mxu1 %v6702_v15  ;;  %v3562_v15 = vrot.slane %v5832_v14, %v7892_v50 }
 0xa17   : > { %6151 = vmatpush3.bf16.msra.mxu0 %v6716_v17 }
 0xa18   : > { %6152 = vmatprep.subr.bf16.mxu0 %v6717_v18 }
 0xa19   : > { %3797 = vmatpush1.bf16.msra.mxu1 %v6700_v16 }
 0xa1a   : > { %6160 = vmatprep.subr.bf16.mxu1 %v6719_v49 }
 0xa1b   : > { %6153 = vmatpush3.bf16.msra.mxu0 %v6718_v21 }
 0xa1c   : > { %3815 = vmatmul.mubr.bf16.vlgmr.msra.gmra.mrb[32].mxu1 %v7886_v8  ;;  %4408 = vmatprep.subr.bf16.mxu0 %v6723_v0 }
 0xa1d   : > { %6161 = vmatpush3.bf16.msra.mxu1 %v6720_v13 }
 0xa1e   : > { %6162 = vmatprep.subr.bf16.mxu1 %v6724_v2 }
 0xa21   : > { %6163 = vmatpush3.bf16.msra.mxu1 %v6725_v7 }
 0xa22   : > { %6164 = vmatprep.subr.bf16.mxu1 %v6729_v9 }
 0xa25   : > { %6165 = vmatpush3.bf16.msra.mxu1 %v6730_v3 }
 0xa26   : > { %6166 = vmatprep.subr.bf16.mxu1 %v6734_v62  ;;  %v6721_v62 = vld [vmem:[#allocation5 + $0x200] ss:$16 sps:$4 sm:$0xff]  }
 0xa29   : > { %6167 = vmatpush3.bf16.msra.mxu1 %v6735_v45  ;;  %v6738_v45 = vld [vmem:[#allocation5 + $0x264] ss:$16 sps:$4 sm:$0xff]  }
 0xa2a   : > { %6168 = vmatprep.subr.bf16.mxu1 %v6739_v29  ;;  %v6743_v29 = vld [vmem:[#allocation5 + $0x284] ss:$16 sps:$4 sm:$0xff]  }
 0xa2d   : > { %6169 = vmatpush3.bf16.msra.mxu1 %v6740_v46  ;;  %v6741_v46 = vld [vmem:[#allocation5 + $0x280] ss:$16 sps:$4 sm:$0xff]  }
 0xa2e   : > { %6170 = vmatprep.subr.bf16.mxu1 %v6744_v20  ;;  %v6748_v20 = vld [vmem:[#allocation5 + $0x2a4] ss:$16 sps:$4 sm:$0xff]  }
 0xa31   : > { %6171 = vmatpush3.bf16.msra.mxu1 %v6745_v57  ;;  %v3570_v57 = vrot.slane %v5832_v14, %v7915_v35 }
 0xa32   : > { %6172 = vmatprep.subr.bf16.mxu1 %v6749_v41  ;;  %v6753_v41 = vld [vmem:[#allocation5 + $0x2c4] ss:$16 sps:$4 sm:$0xff]  }
 0xa35   : > { %6173 = vmatpush3.bf16.msra.mxu1 %v6750_v51 }
 0xa36   : > { %6174 = vmatprep.subr.bf16.mxu1 %v6754_v52 }
 0xa39   : > { %6175 = vmatpush3.bf16.msra.mxu1 %v6755_v53 }
 0xa3a   : > { %4451 = vmatprep.subr.bf16.mxu1 %v6761_v58 }
 0xa62   : > { %v2792_v5 = vpop.xlane.xlu0 %2791 }
 0xa63   : > { %v2794_v37 = vsub.f32 %v7905_v56, %v2792_v5  ;;  %v2789_v40 = vpop.xlane.xlu1 %2788 }
 0xa64   : > { %v2793_v6 = vsub.f32 %v7907_v42, %v2789_v40  ;;  %v6726_v40 = vld [vmem:[#allocation5 + $0x220] ss:$16 sps:$4 sm:$0xff]  }
 0xa65   : > { %v2797_v44 = vmul.f32 1.442695, %v2794_v37  ;;  %v6728_v37 = vld [vmem:[#allocation5 + $0x224] ss:$16 sps:$4 sm:$0xff]  }
 0xa66   : > { %v2795_v47 = vmul.f32 1.442695, %v2793_v6  ;;  %v6733_v6 = vld [vmem:[#allocation5 + $0x244] ss:$16 sps:$4 sm:$0xff]  }
 0xa67   : > { %6935 = vpow2.f32 %v2797_v44  ;;  %v6731_v44 = vld [vmem:[#allocation5 + $0x240] ss:$16 sps:$4 sm:$0xff]  }
 0xa68   : > { %6937 = vpow2.f32 %v2795_v47  ;;  %v6736_v47 = vld [vmem:[#allocation5 + $0x260] ss:$16 sps:$4 sm:$0xff]  }
 0xa71   : > { %v7927_v48 = vpop.eup %6935 }
 0xa72   : > { %v7929_v56 = vpop.eup %6937  ;;  %v2802_v42 = vsel %vm2786_vm5, %v7927_v48, 0.0 }
 0xa73   : > { %2803 = vadd.xlane.f32.xlu0 %v2802_v42  ;;  %v2799_v38 = vsel %vm2786_vm5, %v7929_v56, 0.0  ;;  %v3574_v42 = vrot.slane %v5832_v14, %v7918_v24  ;;  %v6756_v14 = vld [vmem:[#allocation5 + $0x2e0] ss:$16 sps:$4 sm:$0xff]  }
 0xa74   : > { %2800 = vadd.xlane.f32.xlu1 %v2799_v38  ;;  %v6746_v38 = vld [vmem:[#allocation5 + $0x2a0] ss:$16 sps:$4 sm:$0xff]  }
 0xab1   : > { %v6110_v43 = vpop.f32.mrb[28].mxu0 }
 0xab2   : > { %v6111_v59 = vpop.f32.mrb[29].mxu0 }
 0xab3   : > { %v6112_v60 = vadd.f32 %v6111_v59, %v6110_v43  ;;  %v6113_v61 = vpop.f32.mrb[30].mxu0  ;;  %v6751_v59 = vld [vmem:[#allocation5 + $0x2c0] ss:$16 sps:$4 sm:$0xff]  }
 0xab4   : > { %v6114_v11 = vpop.f32.mrb[31].mxu0 }
 0xab5   : > { %v6115_v12 = vadd.f32 %v6114_v11, %v6113_v61  ;;  %v3468_v23 = vadd.f32 %v6112_v60, %v5799_v10  ;;  %v6758_v11 = vld [vmem:[#allocation5 + $0x2e4] ss:$16 sps:$4 sm:$0xff]  }
 0xab7   : > { %v3471_v31 = vadd.f32 %v6115_v12, %v5799_v10 }
 0xacf   : > { %v6132_v16 = vpop.f32.mrb[28].mxu1 }
 0xad0   : > { %v6133_v54 = vpop.f32.mrb[29].mxu1 }
 0xad1   : > { %v6134_v39 = vadd.f32 %v6133_v54, %v6132_v16  ;;  %v6135_v25 = vpop.f32.mrb[30].mxu1  ;;  %v3773_v26 = vpop.f32.mrb[32].mxu0 }
 0xad2   : > { %v3774_v27 = vadd.f32 %v3773_v26, %v3562_v15  ;;  %v6136_v55 = vpop.f32.mrb[31].mxu1  ;;  %v3775_v28 = vpop.f32.mrb[33].mxu0  ;;  %v6762_v26 = vld [vmem:[#allocation5 + $0x228] ss:$16 sps:$4 sm:$0xff]  }
 0xad3   : > { %v7943_v32 = vadd.f32 %v6134_v39, %v3468_v23  ;;  %v6137_v33 = vadd.f32 %v6136_v55, %v6135_v25  ;;  %v3776_v34 = vadd.f32 %v3775_v28, %v3566_v19  ;;  %v3777_v17 = vpop.f32.mrb[34].mxu0  ;;  %v6759_v39 = vld [vmem:[#allocation5 + $0x208] ss:$16 sps:$4 sm:$0xff]   ;;  %v6764_v25 = vld [vmem:[#allocation5 + $0x22c] ss:$16 sps:$4 sm:$0xff]  }
 0xad4   : > { %v3778_v18 = vadd.f32 %v3777_v17, %v3562_v15  ;;  %v3779_v49 = vpop.f32.mrb[35].mxu0  ;;  %v3825_v0 = vmax.f32 %v3774_v27, 0.0  ;;  %v6767_v27 = vld [vmem:[#allocation5 + $0x24c] ss:$16 sps:$4 sm:$0xff]   ;;  %v6765_v55 = vld [vmem:[#allocation5 + $0x248] ss:$16 sps:$4 sm:$0xff]  }
 0xad5   : > { %v7945_v13 = vadd.f32 %v6137_v33, %v3471_v31  ;;  %v3780_v21 = vadd.f32 %v3779_v49, %v3566_v19  ;;  %v3826_v7 = vmax.f32 %v3776_v34, 0.0  ;;  %v6770_v31 = vld [vmem:[#allocation5 + $0x26c] ss:$16 sps:$4 sm:$0xff]   ;;  %v6768_v34 = vld [vmem:[#allocation5 + $0x268] ss:$16 sps:$4 sm:$0xff]  }
 0xad6   : > { %v3829_v2 = vmax.f32 %v3778_v18, 0.0  ;;  %v6773_v17 = vld [vmem:[#allocation5 + $0x28c] ss:$16 sps:$4 sm:$0xff]   ;;  %v6771_v18 = vld [vmem:[#allocation5 + $0x288] ss:$16 sps:$4 sm:$0xff]  }
 0xad7   : > { %v3830_v9 = vmax.f32 %v3780_v21, 0.0  ;;  %v6776_v49 = vld [vmem:[#allocation5 + $0x2ac] ss:$16 sps:$4 sm:$0xff]  }
 0xad8   : > { %v3833_v3 = vpack.c.bf16 %v3829_v2, %v3825_v0  ;;  %v6774_v0 = vld [vmem:[#allocation5 + $0x2a8] ss:$16 sps:$4 sm:$0xff]  }
 0xad9   : > { %v3834_v5 = vpack.c.bf16 %v3830_v9, %v3826_v7  ;;  %v6779_v9 = vld [vmem:[#allocation5 + $0x2cc] ss:$16 sps:$4 sm:$0xff]  }
 0xadb   : > { %4134 = vmatprep.mubr.bf16.mxu0 %v3834_v5 }
 0xadc   : > { %4135 = vmatmul.mubr.bf16.vlgmr.msra.gmra.mrb[36].mxu0 %v3833_v3 }
 0xadd   : > { %4409 = vmatpush1.bf16.msra.mxu0 %v6721_v62  ;;  %4440 = vmatprep.mubr.bf16.mxu0 %v7143_v30  ;;  %v6777_v62 = vld [vmem:[#allocation5 + $0x2c8] ss:$16 sps:$4 sm:$0xff]  }
 0xade   : > { %4410 = vmatprep.subr.bf16.mxu0 %v6728_v37 }
 0xae1   : > { %4411 = vmatpush1.bf16.msra.mxu0 %v6726_v40  ;;  %v6782_v40 = vld [vmem:[#allocation5 + $0x2ec] ss:$16 sps:$4 sm:$0xff]  }
 0xae2   : > { %4412 = vmatprep.subr.bf16.mxu0 %v6733_v6  ;;  %v6780_v6 = vld [vmem:[#allocation5 + $0x2e8] ss:$16 sps:$4 sm:$0xff]  }
 0xae5   : > { %4413 = vmatpush1.bf16.msra.mxu0 %v6731_v44  ;;  %v6785_v44 = vld [vmem:[#allocation7 + $0x248] sm:$0xff]  }
 0xae6   : > { %4414 = vmatprep.subr.bf16.mxu0 %v6738_v45  ;;  %v6786_v45 = vld [vmem:[#allocation7 + $0x208] sm:$0xff]  }
 0xae9   : > { %4415 = vmatpush1.bf16.msra.mxu0 %v6736_v47  ;;  %v6787_v47 = vld [vmem:[#allocation7 + $0x250] sm:$0xff]  }
 0xaea   : > { %4416 = vmatprep.subr.bf16.mxu0 %v6743_v29  ;;  %v6788_v29 = vld [vmem:[#allocation7 + $0x210] sm:$0xff]  }
 0xaed   : > { %4417 = vmatpush1.bf16.msra.mxu0 %v6741_v46  ;;  %v6789_v46 = vld [vmem:[#allocation7 + $0x258] sm:$0xff]  }
 0xaee   : > { %4418 = vmatprep.subr.bf16.mxu0 %v6748_v20  ;;  %v6790_v20 = vld [vmem:[#allocation7 + $0x218] sm:$0xff]  }
 0xaef   : > { %v3816_v51 = vpop.f32.mrb[32].mxu1 }
 0xaf0   : > { %v3817_v52 = vadd.f32 %v3816_v51, %v3570_v57  ;;  %v3818_v53 = vpop.f32.mrb[33].mxu1  ;;  %v6795_v51 = vld [vmem:[#allocation7 + $0x270] sm:$0xff]  }
 0xaf1   : > { %v3819_v58 = vadd.f32 %v3818_v53, %v3574_v42  ;;  %v3820_v43 = vpop.f32.mrb[34].mxu1  ;;  %4419 = vmatpush1.bf16.msra.mxu0 %v6746_v38  ;;  %v6793_v38 = vld [vmem:[#allocation7 + $0x268] sm:$0xff]   ;;  %v6797_v53 = vld [vmem:[#allocation7 + $0x278] sm:$0xff]  }
 0xaf2   : > { %v3821_v60 = vadd.f32 %v3820_v43, %v3570_v57  ;;  %v3822_v61 = vpop.f32.mrb[35].mxu1  ;;  %4420 = vmatprep.subr.bf16.mxu0 %v6753_v41  ;;  %v3827_v10 = vmax.f32 %v3817_v52, 0.0  ;;  %v6791_v57 = vld [vmem:[#allocation7 + $0x260] sm:$0xff]   ;;  %v6794_v41 = vld [vmem:[#allocation7 + $0x228] sm:$0xff]   ;;  %v6796_v52 = vld [vmem:[#allocation7 + $0x230] sm:$0xff]  }
 0xaf3   : > { %v3823_v12 = vadd.f32 %v3822_v61, %v3574_v42  ;;  %v3828_v16 = vmax.f32 %v3819_v58, 0.0  ;;  %v6792_v42 = vld [vmem:[#allocation7 + $0x220] sm:$0xff]   ;;  %v6804_v61 = vld [vmem:[#allocation7 + $0x2c8] sm:$0xff]  }
 0xaf4   : > { %v3831_v15 = vmax.f32 %v3821_v60, 0.0  ;;  %v6799_v58 = vld [vmem:[#allocation7 + $0x2c0] sm:$0xff]  }
 0xaf5   : > { %v3832_v19 = vmax.f32 %v3823_v12, 0.0  ;;  %4421 = vmatpush1.bf16.msra.mxu0 %v6751_v59  ;;  %v6800_v43 = vld [vmem:[#allocation7 + $0x280] sm:$0xff]   ;;  %v6798_v59 = vld [vmem:[#allocation7 + $0x238] sm:$0xff]   ;;  %v6809_v12 = vld [vmem:[#allocation7 + $0x2d0] sm:$0xff]  }
 0xaf6   : > { %v3835_v54 = vpack.c.bf16 %v3831_v15, %v3827_v10  ;;  %4422 = vmatprep.subr.bf16.mxu0 %v6758_v11  ;;  %v6803_v60 = vld [vmem:[#allocation5 + $0x304] ss:$16 sps:$4 sm:$0xff]   ;;  %v6805_v11 = vld [vmem:[#allocation7 + $0x288] sm:$0xff]   ;;  %v6814_v15 = vld [vmem:[#allocation7 + $0x2d8] sm:$0xff]  }
 0xaf7   : > { %v3836_v23 = vpack.c.bf16 %v3832_v19, %v3828_v16  ;;  %v6810_v10 = vld [vmem:[#allocation7 + $0x290] sm:$0xff]   ;;  %v6815_v16 = vld [vmem:[#allocation7 + $0x298] sm:$0xff]   ;;  %v6819_v19 = vld [vmem:[#allocation7 + $0x2e0] sm:$0xff]  }
 0xaf9   : > { %4175 = vmatprep.mubr.bf16.mxu1 %v3836_v23  ;;  %4423 = vmatpush1.bf16.msra.mxu0 %v6756_v14  ;;  %v6820_v14 = vld [vmem:[#allocation7 + $0x2a0] sm:$0xff]   ;;  %v6825_v23 = vld [vmem:[#allocation7 + $0x2a8] sm:$0xff]  }
 0xafa   : > { %4176 = vmatmul.mubr.bf16.vlgmr.msra.gmra.mrb[36].mxu1 %v3835_v54  ;;  %v6824_v54 = vld [vmem:[#allocation7 + $0x2e8] sm:$0xff]  }
 0xafb   : > { %4452 = vmatpush1.bf16.msra.mxu1 %v6759_v39  ;;  %4483 = vmatprep.mubr.bf16.mxu1 %v7143_v30  ;;  %v6829_v39 = vld [vmem:[#allocation7 + $0x2f0] sm:$0xff]  }
 0xafc   : > { %4441 = vmatmul.mubr.bf16.vlgmr.msra.gmra.mrb[40].mxu0 %v7886_v8  ;;  %4453 = vmatprep.subr.bf16.mxu1 %v6764_v25  ;;  %v6830_v25 = vld [vmem:[#allocation7 + $0x2b0] sm:$0xff]  }
 0xaff   : > { %4454 = vmatpush1.bf16.msra.mxu1 %v6762_v26  ;;  %v6834_v26 = vld [vmem:[#allocation7 + $0x2f8] sm:$0xff]  }
 0xb00   : > { %4455 = vmatprep.subr.bf16.mxu1 %v6767_v27  ;;  %v2804_v28 = vpop.xlane.xlu0 %2803  ;;  %v6835_v27 = vld [vmem:[#allocation7 + $0x2b8] sm:$0xff]  }
 0xb01   : > { %6939 = vrcp.f32 %v2804_v28  ;;  %v2801_v33 = vpop.xlane.xlu1 %2800  ;;  %v7964_v28 = vand.u32 127, %v891_v63 }
 0xb02   : > { %6941 = vrcp.f32 %v2801_v33 }
 0xb03   : > { %4456 = vmatpush1.bf16.msra.mxu1 %v6765_v55  ;;  %v6841_v55 = vld [vmem:[#allocation5 + $0x30c] ss:$16 sps:$4 sm:$0xff]  }
 0xb04   : > { %4457 = vmatprep.subr.bf16.mxu1 %v6770_v31  ;;  %v2819_v31 = vcvt.s32.f32 %v7964_v28 }
 0xb07   : > { %4458 = vmatpush1.bf16.msra.mxu1 %v6768_v34 }
 0xb08   : > { %4459 = vmatprep.subr.bf16.mxu1 %v6773_v17 }
 0xb0b   : > { %v6940_v21 = vpop.eup %6939  ;;  %4460 = vmatpush1.bf16.msra.mxu1 %v6771_v18 }
 0xb0c   : > { %v6942_v2 = vpop.eup %6941  ;;  %4461 = vmatprep.subr.bf16.mxu1 %v6776_v49  ;;  %v7953_v7 = vmul.f32 %v6940_v21, %v7927_v48  ;;  %v6783_v48 = vld [vmem:[#allocation7 + $0x240] sm:$0xff]  }
 0xb0d   : > { %v7956_v3 = vmul.f32 %v6942_v2, %v7929_v56  ;;  %v6784_v56 = vld [vmem:[#allocation7 + $0x200] sm:$0xff]   ;;  %6182 = vmatprep.subr.bf16.mxu0 %v6783_v48 }
 0xb0e   : > { %v2812_v5 = vsel %vm2786_vm5, %v7953_v7, -inf  ;;  %6183 = vmatpush3.bf16.msra.mxu0 %v6784_v56 }
 0xb0f   : > { %4462 = vmatpush1.bf16.msra.mxu1 %v6774_v0  ;;  %2813 = vmax.xlane.f32.xlu0 %v2812_v5  ;;  %v2809_v37 = vsel %vm2786_vm5, %v7956_v3, -inf }
 0xb10   : > { %4463 = vmatprep.subr.bf16.mxu1 %v6779_v9  ;;  %2810 = vmax.xlane.f32.xlu1 %v2809_v37  ;;  %v5899_v37 = vld [vmem:[%s8153_s11 + $0x8] sm:$0xf] }
 0xb11   : > { %6184 = vmatprep.subr.bf16.mxu0 %v6785_v44  ;;  %v4235_v56 = vrot.slane %v5899_v37, %v7898_v36 }
 0xb12   : > { %6185 = vmatpush3.bf16.msra.mxu0 %v6786_v45 }
 0xb13   : > { %4464 = vmatpush1.bf16.msra.mxu1 %v6777_v62  ;;  %6186 = vmatprep.subr.bf16.mxu0 %v6787_v47 }
 0xb14   : > { %4465 = vmatprep.subr.bf16.mxu1 %v6782_v40  ;;  %v5866_v40 = vld [vmem:[%s8155_s13 + $0x1] ss:$0 sm:$0xff] }
 0xb16   : > { %6187 = vmatpush3.bf16.msra.mxu0 %v6788_v29 }
 0xb17   : > { %4466 = vmatpush1.bf16.msra.mxu1 %v6780_v6  ;;  %6188 = vmatprep.subr.bf16.mxu0 %v6789_v46  ;;  %v4231_v6 = vrot.slane %v5899_v37, %v7892_v50 }
 0xb18   : > { %6204 = vmatprep.subr.bf16.mxu1 %v6799_v58 }
 0xb1a   : > { %4484 = vmatmul.mubr.bf16.vlgmr.msra.gmra.mrb[40].mxu1 %v7886_v8  ;;  %6189 = vmatpush3.bf16.msra.mxu0 %v6790_v20 }
 0xb1b   : > { %6190 = vmatprep.subr.bf16.mxu0 %v6791_v57  ;;  %6205 = vmatpush3.bf16.msra.mxu1 %v6800_v43 }
 0xb1c   : > { %6206 = vmatprep.subr.bf16.mxu1 %v6804_v61 }
 0xb1e   : > { %6191 = vmatpush3.bf16.msra.mxu0 %v6792_v42 }
 0xb1f   : > { %6192 = vmatprep.subr.bf16.mxu0 %v6793_v38  ;;  %6207 = vmatpush3.bf16.msra.mxu1 %v6805_v11 }
 0xb20   : > { %6208 = vmatprep.subr.bf16.mxu1 %v6809_v12 }
 0xb22   : > { %6193 = vmatpush3.bf16.msra.mxu0 %v6794_v41 }
 0xb23   : > { %6194 = vmatprep.subr.bf16.mxu0 %v6795_v51  ;;  %6209 = vmatpush3.bf16.msra.mxu1 %v6810_v10 }
 0xb24   : > { %6210 = vmatprep.subr.bf16.mxu1 %v6814_v15 }
 0xb26   : > { %6195 = vmatpush3.bf16.msra.mxu0 %v6796_v52 }
 0xb27   : > { %6196 = vmatprep.subr.bf16.mxu0 %v6797_v53  ;;  %6211 = vmatpush3.bf16.msra.mxu1 %v6815_v16 }
 0xb28   : > { %6212 = vmatprep.subr.bf16.mxu1 %v6819_v19  ;;  %v6801_v19 = vld [vmem:[#allocation5 + $0x300] ss:$16 sps:$4 sm:$0xff]  }
 0xb2a   : > { %6197 = vmatpush3.bf16.msra.mxu0 %v6798_v59 }
 0xb2b   : > { %5077 = vmatprep.subr.bf16.mxu0 %v6803_v60  ;;  %6213 = vmatpush3.bf16.msra.mxu1 %v6820_v14  ;;  %v6808_v14 = vld [vmem:[#allocation5 + $0x324] ss:$16 sps:$4 sm:$0xff]  }
 0xb2c   : > { %6214 = vmatprep.subr.bf16.mxu1 %v6824_v54  ;;  %v6806_v54 = vld [vmem:[#allocation5 + $0x320] ss:$16 sps:$4 sm:$0xff]  }
 0xb2f   : > { %6215 = vmatpush3.bf16.msra.mxu1 %v6825_v23  ;;  %v6813_v23 = vld [vmem:[#allocation5 + $0x344] ss:$16 sps:$4 sm:$0xff]  }
 0xb30   : > { %6216 = vmatprep.subr.bf16.mxu1 %v6829_v39  ;;  %v6811_v39 = vld [vmem:[#allocation5 + $0x340] ss:$16 sps:$4 sm:$0xff]  }
 0xb33   : > { %6217 = vmatpush3.bf16.msra.mxu1 %v6830_v25  ;;  %v6818_v25 = vld [vmem:[#allocation5 + $0x364] ss:$16 sps:$4 sm:$0xff]  }
 0xb34   : > { %6218 = vmatprep.subr.bf16.mxu1 %v6834_v26  ;;  %v6816_v26 = vld [vmem:[#allocation5 + $0x360] ss:$16 sps:$4 sm:$0xff]  }
 0xb37   : > { %6219 = vmatpush3.bf16.msra.mxu1 %v6835_v27  ;;  %v6823_v27 = vld [vmem:[#allocation5 + $0x384] ss:$16 sps:$4 sm:$0xff]  }
 0xb38   : > { %5120 = vmatprep.subr.bf16.mxu1 %v6841_v55  ;;  %v6821_v55 = vld [vmem:[#allocation5 + $0x380] ss:$16 sps:$4 sm:$0xff]  }
 0xb9c   : > { %v7967_v33 = vpop.xlane.xlu0 %2813 }
 0xb9d   : > { %v7969_v34 = vpop.xlane.xlu1 %2810  ;;  %vm2818_vm6 = vcmp.eq.f32.partialorder %v7953_v7, %v7967_v33 }
 0xb9e   : > { %v2821_v17 = vsel %vm2818_vm6, %v2819_v31, 4.0  ;;  %vm2817_vm7 = vcmp.eq.f32.partialorder %v7956_v3, %v7969_v34 }
 0xb9f   : > { %v2825_v18 = vsel %vm2786_vm5, %v2821_v17, inf  ;;  %v2820_v49 = vsel %vm2817_vm7, %v2819_v31, 4.0  ;;  %v6828_v31 = vld [vmem:[#allocation5 + $0x3a4] ss:$16 sps:$4 sm:$0xff]   ;;  %v4239_v17 = vrot.slane %v5899_v37, %v7915_v35 }
 0xba0   : > { %2826 = vmin.xlane.f32.xlu0 %v2825_v18  ;;  %v2822_v63 = vsel %vm2786_vm5, %v2820_v49, inf  ;;  %v4243_v18 = vrot.slane %v5899_v37, %v7918_v24  ;;  %v6826_v49 = vld [vmem:[#allocation5 + $0x3a0] ss:$16 sps:$4 sm:$0xff]  }
 0xba1   : > { %2823 = vmin.xlane.f32.xlu1 %v2822_v63  ;;  %v6833_v63 = vld [vmem:[#allocation5 + $0x3c4] ss:$16 sps:$4 sm:$0xff]   ;;  %v6836_v37 = vld [vmem:[#allocation5 + $0x3e0] ss:$16 sps:$4 sm:$0xff]  }
 0xbaf   : > { %v6154_v21 = vpop.f32.mrb[36].mxu0 }
 0xbb0   : > { %v6155_v0 = vpop.f32.mrb[37].mxu0 }
 0xbb1   : > { %v6156_v2 = vadd.f32 %v6155_v0, %v6154_v21  ;;  %v6157_v9 = vpop.f32.mrb[38].mxu0 }
 0xbb2   : > { %v6158_v5 = vpop.f32.mrb[39].mxu0 }
 0xbb3   : > { %v6159_v62 = vadd.f32 %v6158_v5, %v6157_v9  ;;  %v4137_v45 = vadd.f32 %v6156_v2, %v5866_v40 }
 0xbb5   : > { %v4140_v38 = vadd.f32 %v6159_v62, %v5866_v40  ;;  %v6831_v62 = vld [vmem:[#allocation5 + $0x3c0] ss:$16 sps:$4 sm:$0xff]  }
 0xbcd   : > { %v6176_v48 = vpop.f32.mrb[36].mxu1 }
 0xbce   : > { %v6177_v44 = vpop.f32.mrb[37].mxu1 }
 0xbcf   : > { %v6178_v47 = vadd.f32 %v6177_v44, %v6176_v48  ;;  %v6179_v29 = vpop.f32.mrb[38].mxu1  ;;  %v4442_v46 = vpop.f32.mrb[40].mxu0  ;;  %v6838_v48 = vld [vmem:[#allocation5 + $0x3e4] ss:$16 sps:$4 sm:$0xff]  }
 0xbd0   : > { %v4443_v20 = vadd.f32 %v4442_v46, %v4231_v6  ;;  %v6180_v57 = vpop.f32.mrb[39].mxu1  ;;  %v4444_v42 = vpop.f32.mrb[41].mxu0 }
 0xbd1   : > { %v7985_v41 = vadd.f32 %v6178_v47, %v4137_v45  ;;  %v6181_v51 = vadd.f32 %v6180_v57, %v6179_v29  ;;  %v4445_v52 = vadd.f32 %v4444_v42, %v4235_v56  ;;  %v4446_v53 = vpop.f32.mrb[42].mxu0  ;;  %v6839_v57 = vld [vmem:[#allocation5 + $0x308] ss:$16 sps:$4 sm:$0xff]   ;;  %v6844_v42 = vld [vmem:[#allocation5 + $0x32c] ss:$16 sps:$4 sm:$0xff]  }
 0xbd2   : > { %v4447_v58 = vadd.f32 %v4446_v53, %v4231_v6  ;;  %v4448_v43 = vpop.f32.mrb[43].mxu0  ;;  %v4494_v61 = vmax.f32 %v4443_v20, 0.0  ;;  %v6850_v53 = vld [vmem:[#allocation5 + $0x36c] ss:$16 sps:$4 sm:$0xff]  }
 0xbd3   : > { %v7987_v59 = vadd.f32 %v6181_v51, %v4140_v38  ;;  %v4449_v60 = vadd.f32 %v4448_v43, %v4235_v56  ;;  %v4495_v12 = vmax.f32 %v4445_v52, 0.0  ;;  %v6842_v38 = vld [vmem:[#allocation5 + $0x328] ss:$16 sps:$4 sm:$0xff]   ;;  %v6847_v51 = vld [vmem:[#allocation5 + $0x34c] ss:$16 sps:$4 sm:$0xff]  }
 0xbd4   : > { %v4498_v11 = vmax.f32 %v4447_v58, 0.0  ;;  %v6845_v52 = vld [vmem:[#allocation5 + $0x348] ss:$16 sps:$4 sm:$0xff]   ;;  %v6853_v43 = vld [vmem:[#allocation5 + $0x38c] ss:$16 sps:$4 sm:$0xff]  }
 0xbd5   : > { %v4499_v10 = vmax.f32 %v4449_v60, 0.0  ;;  %v6848_v58 = vld [vmem:[#allocation5 + $0x368] ss:$16 sps:$4 sm:$0xff]  }
 0xbd6   : > { %v4502_v15 = vpack.c.bf16 %v4498_v11, %v4494_v61  ;;  %v6851_v60 = vld [vmem:[#allocation5 + $0x388] ss:$16 sps:$4 sm:$0xff]   ;;  %v6856_v61 = vld [vmem:[#allocation5 + $0x3ac] ss:$16 sps:$4 sm:$0xff]  }
 0xbd7   : > { %v4503_v16 = vpack.c.bf16 %v4499_v10, %v4495_v12  ;;  %v6854_v11 = vld [vmem:[#allocation5 + $0x3a8] ss:$16 sps:$4 sm:$0xff]   ;;  %v6862_v10 = vld [vmem:[#allocation5 + $0x3ec] ss:$16 sps:$4 sm:$0xff]  }
 0xbd8   : > { %v6857_v12 = vld [vmem:[#allocation5 + $0x3c8] ss:$16 sps:$4 sm:$0xff]  }
 0xbd9   : > { %4803 = vmatprep.mubr.bf16.mxu0 %v4503_v16  ;;  %v2837_v16 = vsel %vm2786_vm5, %v7953_v7, 0.0  ;;  %v6863_v7 = vld [vmem:[#allocation7 + $0x340] sm:$0xff]  }
 0xbda   : > { %4804 = vmatmul.mubr.bf16.vlgmr.msra.gmra.mrb[44].mxu0 %v4502_v15  ;;  %v6860_v15 = vld [vmem:[#allocation5 + $0x3e8] ss:$16 sps:$4 sm:$0xff]  }
 0xbdb   : > { %5078 = vmatpush1.bf16.msra.mxu0 %v6801_v19  ;;  %5109 = vmatprep.mubr.bf16.mxu0 %v7143_v30  ;;  %v2836_v19 = vsel %vm2786_vm5, %v7956_v3, 0.0  ;;  %v6864_v3 = vld [vmem:[#allocation7 + $0x300] sm:$0xff]  }
 0xbdc   : > { %5079 = vmatprep.subr.bf16.mxu0 %v6808_v14  ;;  %v2838_v14 = vadd.f32 %v2837_v16, %v2836_v19  ;;  %v6878_v16 = vld [vmem:[#allocation7 + $0x338] sm:$0xff]   ;;  %v6883_v19 = vld [vmem:[#allocation7 + $0x3d0] sm:$0xff]  }
 0xbdf   : > { %5080 = vmatpush1.bf16.msra.mxu0 %v6806_v54 }
 0xbe0   : > { %5081 = vmatprep.subr.bf16.mxu0 %v6813_v23  ;;  %v2839_v23 = vrot.slane %v2838_v14, 4 }
 0xbe3   : > { %5082 = vmatpush1.bf16.msra.mxu0 %v6811_v39 }
 0xbe4   : > { %5083 = vmatprep.subr.bf16.mxu0 %v6818_v25 }
 0xbe7   : > { %5084 = vmatpush1.bf16.msra.mxu0 %v6816_v26 }
 0xbe8   : > { %5085 = vmatprep.subr.bf16.mxu0 %v6823_v27 }
 0xbeb   : > { %5086 = vmatpush1.bf16.msra.mxu0 %v6821_v55 }
 0xbec   : > { %5087 = vmatprep.subr.bf16.mxu0 %v6828_v31  ;;  %v2840_v31 = vadd.f32 %v2839_v23, %v2838_v14  ;;  %v6884_v14 = vld [vmem:[#allocation7 + $0x390] sm:$0xff]   ;;  %v6886_v23 = vld [vmem:[#allocation7 + $0x398] sm:$0xff]  }
 0xbed   : > { %v4485_v21 = vpop.f32.mrb[40].mxu1 }
 0xbee   : > { %v4486_v0 = vadd.f32 %v4485_v21, %v4239_v17  ;;  %v4487_v2 = vpop.f32.mrb[41].mxu1 }
 0xbef   : > { %v4488_v9 = vadd.f32 %v4487_v2, %v4243_v18  ;;  %v4489_v5 = vpop.f32.mrb[42].mxu1  ;;  %5088 = vmatpush1.bf16.msra.mxu0 %v6826_v49  ;;  %v2841_v2 = vrot.slane %v2840_v31, 2 }
 0xbf0   : > { %v4490_v40 = vadd.f32 %v4489_v5, %v4239_v17  ;;  %v4491_v6 = vpop.f32.mrb[43].mxu1  ;;  %5089 = vmatprep.subr.bf16.mxu0 %v6833_v63  ;;  %v4496_v44 = vmax.f32 %v4486_v0, 0.0  ;;  %v6865_v17 = vld [vmem:[#allocation7 + $0x348] sm:$0xff]  }
 0xbf1   : > { %v4492_v56 = vadd.f32 %v4491_v6, %v4243_v18  ;;  %v4497_v47 = vmax.f32 %v4488_v9, 0.0  ;;  %v6866_v5 = vld [vmem:[#allocation7 + $0x308] sm:$0xff]  }
 0xbf2   : > { %v4500_v45 = vmax.f32 %v4490_v40, 0.0  ;;  %v6867_v40 = vld [vmem:[#allocation7 + $0x350] sm:$0xff]  }
 0xbf3   : > { %v4501_v29 = vmax.f32 %v4492_v56, 0.0  ;;  %5090 = vmatpush1.bf16.msra.mxu0 %v6831_v62 }
 0xbf4   : > { %v4504_v46 = vpack.c.bf16 %v4500_v45, %v4496_v44  ;;  %5091 = vmatprep.subr.bf16.mxu0 %v6838_v48 }
 0xbf5   : > { %v4505_v20 = vpack.c.bf16 %v4501_v29, %v4497_v47  ;;  %v2842_v47 = vadd.f32 %v2841_v2, %v2840_v31  ;;  %v6890_v31 = vld [vmem:[#allocation7 + $0x3a8] sm:$0xff]  }
 0xbf6   : > { %v5966_v2 = vld [vmem:[%s8153_s11 + $0xc] sm:$0xf] }
 0xbf7   : > { %4844 = vmatprep.mubr.bf16.mxu1 %v4505_v20  ;;  %5092 = vmatpush1.bf16.msra.mxu0 %v6836_v37  ;;  %v6868_v37 = vld [vmem:[#allocation7 + $0x310] sm:$0xff]  }
 0xbf8   : > { %4845 = vmatmul.mubr.bf16.vlgmr.msra.gmra.mrb[44].mxu1 %v4504_v46  ;;  %6226 = vmatprep.subr.bf16.mxu0 %v6863_v7  ;;  %v6869_v46 = vld [vmem:[#allocation7 + $0x358] sm:$0xff]   ;;  %v6892_v7 = vld [vmem:[#allocation7 + $0x3b0] sm:$0xff]  }
 0xbf9   : > { %5121 = vmatpush1.bf16.msra.mxu1 %v6839_v57  ;;  %5152 = vmatprep.mubr.bf16.mxu1 %v7143_v30  ;;  %v6859_v30 = vld [vmem:[#allocation5 + $0x3cc] ss:$16 sps:$4 sm:$0xff]   ;;  %v2843_v57 = vrot.slane %v2842_v47, 1 }
 0xbfa   : > { %5110 = vmatmul.mubr.bf16.vlgmr.msra.gmra.mrb[48].mxu0 %v7886_v8  ;;  %5122 = vmatprep.subr.bf16.mxu1 %v6844_v42  ;;  %v6871_v42 = vld [vmem:[#allocation7 + $0x360] sm:$0xff]  }
 0xbfb   : > { %6227 = vmatpush3.bf16.msra.mxu0 %v6864_v3  ;;  %v6893_v3 = vld [vmem:[#allocation7 + $0x3f8] sm:$0xff]  }
 0xbfc   : > { %6228 = vmatprep.subr.bf16.mxu0 %v6865_v17  ;;  %v6894_v17 = vld [vmem:[#allocation7 + $0x3b8] sm:$0xff]  }
 0xbfd   : > { %5123 = vmatpush1.bf16.msra.mxu1 %v6842_v38  ;;  %v6872_v38 = vld [vmem:[#allocation7 + $0x320] sm:$0xff]  }
 0xbfe   : > { %5124 = vmatprep.subr.bf16.mxu1 %v6847_v51  ;;  %v2844_v51 = vadd.f32 %v2843_v57, %v2842_v47 }
 0xbff   : > { %6229 = vmatpush3.bf16.msra.mxu0 %v6866_v5  ;;  %v4900_v5 = vrot.slane %v5966_v2, %v7892_v50 }
 0xc00   : > { %6230 = vmatprep.subr.bf16.mxu0 %v6867_v40 }
 0xc01   : > { %5125 = vmatpush1.bf16.msra.mxu1 %v6845_v52 }
 0xc02   : > { %5126 = vmatprep.subr.bf16.mxu1 %v6850_v53 }
 0xc03   : > { %6231 = vmatpush3.bf16.msra.mxu0 %v6868_v37 }
 0xc04   : > { %6232 = vmatprep.subr.bf16.mxu0 %v6869_v46 }
 0xc05   : > { %5127 = vmatpush1.bf16.msra.mxu1 %v6848_v58  ;;  %v6873_v58 = vld [vmem:[#allocation7 + $0x368] sm:$0xff]  }
 0xc06   : > { %5128 = vmatprep.subr.bf16.mxu1 %v6853_v43  ;;  %v6874_v43 = vld [vmem:[#allocation7 + $0x328] sm:$0xff]  }
 0xc09   : > { %5129 = vmatpush1.bf16.msra.mxu1 %v6851_v60  ;;  %v6875_v60 = vld [vmem:[#allocation7 + $0x370] sm:$0xff]  }
 0xc0a   : > { %5130 = vmatprep.subr.bf16.mxu1 %v6856_v61  ;;  %v6876_v61 = vld [vmem:[#allocation7 + $0x330] sm:$0xff]  }
 0xc0d   : > { %5131 = vmatpush1.bf16.msra.mxu1 %v6854_v11  ;;  %v6879_v11 = vld [vmem:[#allocation7 + $0x3c0] sm:$0xff]  }
 0xc0e   : > { %5132 = vmatprep.subr.bf16.mxu1 %v6859_v30  ;;  %v6880_v30 = vld [vmem:[#allocation7 + $0x380] sm:$0xff]  }
 0xc11   : > { %5133 = vmatpush1.bf16.msra.mxu1 %v6857_v12  ;;  %v6877_v12 = vld [vmem:[#allocation7 + $0x378] sm:$0xff]  }
 0xc12   : > { %5134 = vmatprep.subr.bf16.mxu1 %v6862_v10  ;;  %v6881_v10 = vld [vmem:[#allocation7 + $0x3c8] sm:$0xff]  }
 0xc15   : > { %5135 = vmatpush1.bf16.msra.mxu1 %v6860_v15  ;;  %v6882_v15 = vld [vmem:[#allocation7 + $0x388] sm:$0xff]  }
 0xc16   : > { %6248 = vmatprep.subr.bf16.mxu1 %v6879_v11 }
 0xc18   : > { %5153 = vmatmul.mubr.bf16.vlgmr.msra.gmra.mrb[48].mxu1 %v7886_v8 }
 0xc19   : > { %6249 = vmatpush3.bf16.msra.mxu1 %v6880_v30 }
 0xc1a   : > { %6250 = vmatprep.subr.bf16.mxu1 %v6881_v10  ;;  %v4912_v10 = vrot.slane %v5966_v2, %v7918_v24 }
 0xc1d   : > { %6251 = vmatpush3.bf16.msra.mxu1 %v6882_v15 }
 0xc1e   : > { %6252 = vmatprep.subr.bf16.mxu1 %v6883_v19 }
 0xc21   : > { %6253 = vmatpush3.bf16.msra.mxu1 %v6884_v14 }
 0xc2d   : > { %v2827_v54 = vpop.xlane.xlu0 %2826 }
 0xc2e   : > { %v6427_v39 = vtrunc.f32 %v2827_v54  ;;  %v2824_v25 = vpop.xlane.xlu1 %2823  ;;  %v6885_v54 = vld [vmem:[#allocation7 + $0x3d8] sm:$0xff]  }
 0xc2f   : > { %v6425_v26 = vtrunc.f32 %v2824_v25  ;;  %6254 = vmatprep.subr.bf16.mxu1 %v6885_v54  ;;  %v6888_v25 = vld [vmem:[#allocation7 + $0x3a0] sm:$0xff]  }
 0xc30   : > { %v7999_v27 = vcvt.f32.s32 %v6427_v39  ;;  %v6887_v39 = vld [vmem:[#allocation7 + $0x3e0] sm:$0xff]   ;;  %6255 = vmatpush3.bf16.msra.mxu1 %v6886_v23 }
 0xc31   : > { %v8001_v55 = vcvt.f32.s32 %v6425_v26  ;;  %6256 = vmatprep.subr.bf16.mxu1 %v6887_v39  ;;  %v6889_v26 = vld [vmem:[#allocation7 + $0x3e8] sm:$0xff]  }
 0xc32   : > { %vm2831_vm8 = vcmp.eq.s32.totalorder %v7964_v28, %v7999_v27  ;;  %vm3516_vm9 = vcmp.eq.s32.totalorder %v7999_v27, 0  ;;  %vm4185_vm13 = vcmp.eq.s32.totalorder %v7999_v27, 1  ;;  %vm4854_vm1 = vcmp.eq.s32.totalorder %v7999_v27, 2 }
 0xc33   : > { %v5766_v8 = vsel %vm2831_vm8, 1.0, %v7142_v4  ;;  %vm2830_vm10 = vcmp.eq.s32.totalorder %v7964_v28, %v8001_v55  ;;  %vm3515_vm11 = vcmp.eq.s32.totalorder %v8001_v55, 0  ;;  %vm4184_vm12 = vcmp.eq.s32.totalorder %v8001_v55, 1 }
 0xc34   : > { %v2846_v18 = vsel %vm2786_vm5, %v5766_v8, 0.0  ;;  %v5765_v49 = vsel %vm2830_vm10, 1.0, %v7142_v4  ;;  %v3517_v63 = vsel %vm3515_vm11, %v7969_v34, 0.0  ;;  %v4186_v0 = vsel %vm4184_vm12, %v7969_v34, 0.0  ;;  %6257 = vmatpush3.bf16.msra.mxu1 %v6888_v25  ;;  %v6891_v8 = vld [vmem:[#allocation7 + $0x3f0] sm:$0xff]  }
 0xc35   : > { %v2845_v21 = vsel %vm2786_vm5, %v5765_v49, 0.0  ;;  %v3519_v28 = vmul.f32 %v3517_v63, %v7943_v32  ;;  %v4188_v62 = vmul.f32 %v4186_v0, %v7985_v41  ;;  %v3518_v4 = vsel %vm3516_vm9, %v7967_v33, 0.0  ;;  %6258 = vmatprep.subr.bf16.mxu1 %v6889_v26 }
 0xc36   : > { %v2847_v9 = vadd.f32 %v2846_v18, %v2845_v21  ;;  %v3520_v48 = vmul.f32 %v3518_v4, %v7945_v13  ;;  %v4187_v32 = vsel %vm4185_vm13, %v7967_v33, 0.0  ;;  %v6870_v13 = vld [vmem:[#allocation7 + $0x318] sm:$0xff]   ;;  %v4904_v4 = vrot.slane %v5966_v2, %v7898_v36 }
 0xc37   : > { %v3521_v6 = vadd.f32 %v3519_v28, %v7813_v22  ;;  %v4189_v44 = vmul.f32 %v4187_v32, %v7987_v59  ;;  %6233 = vmatpush3.bf16.msra.mxu0 %v6870_v13  ;;  %vm4853_vm0 = vcmp.eq.s32.totalorder %v8001_v55, 2 }
 0xc38   : > { %v2848_v56 = vrot.slane %v2847_v9, 4  ;;  %v3522_v41 = vadd.f32 %v3520_v48, %v7816_v1  ;;  %6234 = vmatprep.subr.bf16.mxu0 %v6871_v42  ;;  %6259 = vmatpush3.bf16.msra.mxu1 %v6890_v31  ;;  %v4855_v13 = vsel %vm4853_vm0, %v7969_v34, 0.0 }
 0xc39   : > { %v8026_v45 = vadd.f32 %v4188_v62, %v3521_v6  ;;  %6260 = vmatprep.subr.bf16.mxu1 %v6891_v8 }
 0xc3a   : > { %v2849_v29 = vadd.f32 %v2848_v56, %v2847_v9  ;;  %v8029_v20 = vadd.f32 %v4189_v44, %v3522_v41  ;;  %v5933_v9 = vld [vmem:[%s8155_s13 + $0x2] ss:$0 sm:$0xff] }
 0xc3b   : > { %6235 = vmatpush3.bf16.msra.mxu0 %v6872_v38 }
 0xc3c   : > { %v2850_v22 = vrot.slane %v2849_v29, 2  ;;  %6236 = vmatprep.subr.bf16.mxu0 %v6873_v58  ;;  %6261 = vmatpush3.bf16.msra.mxu1 %v6892_v7 }
 0xc3d   : > { %6262 = vmatprep.subr.bf16.mxu1 %v6893_v3 }
 0xc3e   : > { %v2851_v59 = vadd.f32 %v2850_v22, %v2849_v29 }
 0xc3f   : > { %6237 = vmatpush3.bf16.msra.mxu0 %v6874_v43 }
 0xc40   : > { %v2852_v1 = vrot.slane %v2851_v59, 1  ;;  %6238 = vmatprep.subr.bf16.mxu0 %v6875_v60  ;;  %6263 = vmatpush3.bf16.msra.mxu1 %v6894_v17 }
 0xc42   : > { %v2853_v52 = vadd.f32 %v2852_v1, %v2851_v59 }
 0xc43   : > { %6239 = vmatpush3.bf16.msra.mxu0 %v6876_v61 }
 0xc44   : > { %v2855_v53 = vsel %vm2854_vm14, %v2844_v51, %v2853_v52  ;;  %6240 = vmatprep.subr.bf16.mxu0 %v6877_v12  ;;  %v4856_v51 = vsel %vm4854_vm1, %v7967_v33, 0.0  ;;  %v4908_v12 = vrot.slane %v5966_v2, %v7915_v35 }
 0xc45   : > { %2857 = vst.msk [vmem:[%s8035_s29] sm:$0x3] %vm2856_vm15, %v2855_v53 }
 0xc47   : > { %6241 = vmatpush3.bf16.msra.mxu0 %v6878_v16 }
 0xcad   : > { %v6198_v18 = vpop.f32.mrb[44].mxu0 }
 0xcae   : > { %v6199_v49 = vpop.f32.mrb[45].mxu0 }
 0xcaf   : > { %v6200_v63 = vadd.f32 %v6199_v49, %v6198_v18  ;;  %v6201_v21 = vpop.f32.mrb[46].mxu0 }
 0xcb0   : > { %v6202_v28 = vpop.f32.mrb[47].mxu0 }
 0xcb1   : > { %v6203_v0 = vadd.f32 %v6202_v28, %v6201_v21  ;;  %v4806_v6 = vadd.f32 %v6200_v63, %v5933_v9 }
 0xcb3   : > { %v4809_v29 = vadd.f32 %v6203_v0, %v5933_v9 }
 0xccb   : > { %v6220_v62 = vpop.f32.mrb[44].mxu1 }
 0xccc   : > { %v6221_v40 = vpop.f32.mrb[45].mxu1 }
 0xccd   : > { %v6222_v48 = vadd.f32 %v6221_v40, %v6220_v62  ;;  %v6223_v32 = vpop.f32.mrb[46].mxu1  ;;  %v5111_v56 = vpop.f32.mrb[48].mxu0 }
 0xcce   : > { %v5112_v44 = vadd.f32 %v5111_v56, %v4900_v5  ;;  %v6224_v41 = vpop.f32.mrb[47].mxu1  ;;  %v5113_v47 = vpop.f32.mrb[49].mxu0 }
 0xccf   : > { %v4847_v37 = vadd.f32 %v6222_v48, %v4806_v6  ;;  %v6225_v46 = vadd.f32 %v6224_v41, %v6223_v32  ;;  %v5114_v22 = vadd.f32 %v5113_v47, %v4904_v4  ;;  %v5115_v50 = vpop.f32.mrb[50].mxu0 }
 0xcd0   : > { %v5116_v36 = vadd.f32 %v5115_v50, %v4900_v5  ;;  %v5117_v57 = vpop.f32.mrb[51].mxu0  ;;  %v5163_v38 = vmax.f32 %v5112_v44, 0.0 }
 0xcd1   : > { %v4857_v59 = vmul.f32 %v4855_v13, %v4847_v37  ;;  %v4850_v42 = vadd.f32 %v6225_v46, %v4809_v29  ;;  %v5118_v1 = vadd.f32 %v5117_v57, %v4904_v4  ;;  %v5164_v43 = vmax.f32 %v5114_v22, 0.0 }
 0xcd2   : > { %v5167_v52 = vmax.f32 %v5116_v36, 0.0 }
 0xcd3   : > { %v8051_v53 = vadd.f32 %v4857_v59, %v8026_v45  ;;  %v4858_v58 = vmul.f32 %v4856_v51, %v4850_v42  ;;  %v5168_v60 = vmax.f32 %v5118_v1, 0.0 }
 0xcd4   : > { %v5171_v61 = vpack.c.bf16 %v5167_v52, %v5163_v38 }
 0xcd5   : > { %v8054_v11 = vadd.f32 %v4858_v58, %v8029_v20  ;;  %v5172_v30 = vpack.c.bf16 %v5168_v60, %v5164_v43 }
 0xcd7   : > { %5472 = vmatprep.mubr.bf16.mxu0 %v5172_v30 }
 0xcd8   : > { %5473 = vmatmul.mubr.bf16.vlgmr.msra.gmra.mrb[52].mxu0 %v5171_v61 }
 0xceb   : > { %v5154_v15 = vpop.f32.mrb[48].mxu1 }
 0xcec   : > { %v5155_v16 = vadd.f32 %v5154_v15, %v4908_v12  ;;  %v5156_v19 = vpop.f32.mrb[49].mxu1 }
 0xced   : > { %v5157_v45 = vadd.f32 %v5156_v19, %v4912_v10  ;;  %v5158_v14 = vpop.f32.mrb[50].mxu1 }
 0xcee   : > { %v5159_v54 = vadd.f32 %v5158_v14, %v4908_v12  ;;  %v5160_v23 = vpop.f32.mrb[51].mxu1  ;;  %v5165_v20 = vmax.f32 %v5155_v16, 0.0 }
 0xcef   : > { %v5161_v39 = vadd.f32 %v5160_v23, %v4912_v10  ;;  %v5166_v26 = vmax.f32 %v5157_v45, 0.0 }
 0xcf0   : > { %v5169_v25 = vmax.f32 %v5159_v54, 0.0 }
 0xcf1   : > { %v5170_v31 = vmax.f32 %v5161_v39, 0.0 }
 0xcf2   : > { %v5173_v8 = vpack.c.bf16 %v5169_v25, %v5165_v20 }
 0xcf3   : > { %v5174_v35 = vpack.c.bf16 %v5170_v31, %v5166_v26 }
 0xcf5   : > { %5513 = vmatprep.mubr.bf16.mxu1 %v5174_v35 }
 0xcf6   : > { %5514 = vmatmul.mubr.bf16.vlgmr.msra.gmra.mrb[52].mxu1 %v5173_v8 }
 0xcf7   : > { %7042 = shalt.err (!%p7039_p11)
}
 0xcf8   : > { %s7043_s29 = scalar_lea.hbm %s8062_s22, 32  ;;  %s7047_s27 = scalar_lea.hbm %s8199_s15, 64 }
 0xcf9   : > { %p7044_p13 = scmp.ne.s32.totalorder %s8062_s22, %s7043_s29  ;;  %p7048_p6 = scmp.lt.u32.totalorder %s8062_s22, %s8199_s15 }
 0xcfa   : > { %p7049_p9 = scmp.lt.u32.totalorder %s7047_s27, %s7043_s29  ;;  %p7051_p12 = scmp.lt.u32.totalorder %s7043_s29, %s8062_s22 }
 0xcfb   : > { %p7045_p5 = pnand %p7044_p13, %p8200_p1 }
 0xcfc   : > { %p7050_p10 = por %p7049_p9, %p7048_p6 }
 0xcfd   : > { %p7046_p0 = pneg %p7045_p5 }
 0xcfe   : > { %p7052_p2 = por %p7051_p12, %p7050_p10 }
 0xd00   : > { %p7053_p3 = pnand %p7052_p2, %p7046_p0 }
 0xd02   : > { %7056 = shalt.err (!%p7053_p3)
}
 0xd03   : > { %6442 = dma.vmem_to_hbm [thread:$0]  (%p8200_p1), %s5568_s10, 32, %s8062_s22, %s5538_s26   ;;  %v6000_v63 = vld [vmem:[%s8155_s13 + $0x3] ss:$0 sm:$0xff]  ;;  %vm5522_vm2 = vcmp.eq.s32.totalorder %v8001_v55, 3  ;;  %vm5523_vm3 = vcmp.eq.s32.totalorder %v7999_v27, 3 }
 0xd04   : > { %s5699_s0 = sshll.u32 %s8032_s23, 4  ;;  %v5524_v6 = vsel %vm5522_vm2, %v7969_v34, 0.0  ;;  %s6041_s26 = sshll.u32 %s7260_s25, 8  ;;  %v5525_v56 = vsel %vm5523_vm3, %v7967_v33, 0.0 }
 0xd05   : > { %s562_s22 = scalar_lea.vmem [#allocation8], %s5699_s0  ;;  %s8201_s29 = sld [smem:[#allocation25_spill]] }
 0xd06   : > { %s5551_s10 = sshll.u32 %s562_s22, 4  ;;  %s5533_s25 = scalar_lea.sflag [#allocation4], %s8032_s23  ;;  %s8098_s10 = int_to_ptr.vmem [resolvable:$true] %s5551_s10 }
 0xd07   : > { %s7057_s24 = scalar_lea.vmem %s8098_s10, 256  ;;  %s7151_s27 = smov [#allocation8]  }
 0xd08   : > { %p7058_p4 = scmp.ne.s32.totalorder %s8098_s10, %s7057_s24  ;;  %s7061_s30 = sshll.u32 %s7151_s27, 4  ;;  %s7062_s30 = int_to_ptr.vmem [resolvable:$false] %s7061_s30 }
 0xd09   : > { %s7063_s28 = scalar_lea.vmem %s7062_s30, 512  ;;  %p7064_p11 = scmp.lt.s32.totalorder %s8098_s10, %s7062_s30 }
 0xd0a   : > { %p7059_p7 = pnand %p7058_p4, %p8200_p1  ;;  %p7065_p13 = scmp.lt.s32.totalorder %s7063_s28, %s7057_s24 }
 0xd0b   : > { %s8096_s21 = scalar_lea.hbm %s8201_s29, %s6041_s26 }
 0xd0c   : > { %p7060_p8 = pneg %p7059_p7  ;;  %p7066_p5 = por %p7065_p13, %p7064_p11 }
 0xd0e   : > { %p7067_p0 = pnand %p7066_p5, %p7060_p8 }
 0xdab   : > { %v6242_v24 = vpop.f32.mrb[52].mxu0 }
 0xdac   : > { %v6243_v7 = vpop.f32.mrb[53].mxu0 }
 0xdad   : > { %v6244_v3 = vadd.f32 %v6243_v7, %v6242_v24  ;;  %v6245_v17 = vpop.f32.mrb[54].mxu0 }
 0xdae   : > { %v6246_v18 = vpop.f32.mrb[55].mxu0 }
 0xdaf   : > { %v6247_v49 = vadd.f32 %v6246_v18, %v6245_v17  ;;  %v5475_v0 = vadd.f32 %v6244_v3, %v6000_v63 }
 0xdb1   : > { %v5478_v62 = vadd.f32 %v6247_v49, %v6000_v63 }
 0xdc9   : > { %v6264_v21 = vpop.f32.mrb[52].mxu1 }
 0xdca   : > { %v6265_v28 = vpop.f32.mrb[53].mxu1 }
 0xdcb   : > { %v6266_v2 = vadd.f32 %v6265_v28, %v6264_v21  ;;  %v6267_v9 = vpop.f32.mrb[54].mxu1 }
 0xdcc   : > { %v6268_v5 = vpop.f32.mrb[55].mxu1 }
 0xdcd   : > { %v5516_v4 = vadd.f32 %v6266_v2, %v5475_v0  ;;  %v6269_v40 = vadd.f32 %v6268_v5, %v6267_v9 }
 0xdcf   : > { %v5526_v48 = vmul.f32 %v5524_v6, %v5516_v4  ;;  %v5519_v32 = vadd.f32 %v6269_v40, %v5478_v62 }
 0xdd1   : > { %v5528_v55 = vadd.f32 %v5526_v48, %v8051_v53  ;;  %v5527_v44 = vmul.f32 %v5525_v56, %v5519_v32 }
 0xdd3   : > { %5530 = vst [vmem:[%s562_s22] sm:$0xff] %v5528_v55  ;;  %v5529_v34 = vadd.f32 %v5527_v44, %v8054_v11 }
 0xdd5   : > { %5531 = vst [vmem:[%s562_s22 + $0x8] sm:$0xff] %v5529_v34 }
 0xdd6   : > { %7070 = shalt.err (!%p7067_p0)
}
 0xdd7   : > { %s7071_s16 = scalar_lea.hbm %s8096_s21, 256  ;;  %s7075_s22 = scalar_lea.hbm %s8201_s29, 512 }
 0xdd8   : > { %p7072_p6 = scmp.ne.s32.totalorder %s8096_s21, %s7071_s16  ;;  %p7076_p12 = scmp.lt.u32.totalorder %s8096_s21, %s8201_s29 }
 0xdd9   : > { %p7077_p2 = scmp.lt.u32.totalorder %s7075_s22, %s7071_s16  ;;  %p7079_p4 = scmp.lt.u32.totalorder %s7071_s16, %s8096_s21 }
 0xdda   : > { %p7073_p9 = pnand %p7072_p6, %p8200_p1 }
 0xddb   : > { %p7078_p3 = por %p7077_p2, %p7076_p12 }
 0xddc   : > { %p7074_p10 = pneg %p7073_p9 }
 0xddd   : > { %p7080_p7 = por %p7079_p4, %p7078_p3 }
 0xddf   : > { %p7081_p8 = pnand %p7080_p7, %p7074_p10 }
 0xde1   : > { %7084 = shalt.err (!%p7081_p8)
}
 0xde2   : > { %s7152_s18 = smov 128   ;;  %s7153_s24 = smov 8  }
 0xde3   : > { %6441 = dma.vmem_to_hbm [thread:$0]  (%p8200_p1), %s8098_s10, 256, %s8096_s21, %s5533_s25, %s7152_s18, %s7152_s18, %s7153_s24  }
 0xde4 PF: > { %s8202_s27 = sld [smem:[#allocation18_spill]]  ;;  %s8203_s30 = sld [smem:[#allocation15_spill]] }
 0xde5   : > { %s8204_s28 = sld [smem:[#allocation22_spill]] }
 0xdea   : > { %p6468_p11 = scmp.ge.s32.totalorder %s8202_s27, 2  ;;  %s5579_s19 = sand.u32 1, %s8203_s30  }
 0xdeb   : > { %p8205_p13 = scmp.ne.s32.totalorder %s8204_s28, 0  ;;  %s5580_s16 = scalar_lea.sflag [#allocation4], %s5579_s19 }
 0xded   : > { %p6456_p5 = pnand %p6468_p11, %p8205_p13 }
 0xdef   : > { %7110 = dma.done.wait (!%p6456_p5), %s5580_s16, 256  }
 0xdf0   : > { %7112 = vsyncadd (!%p6456_p5), %s5580_s16, 4294967040  ;;  %s5589_s0 = scalar_lea.sflag [#allocation10], %s5579_s19 }
 0xdf1   : > { %7114 = dma.done.wait (!%p6456_p5), %s5589_s0, 32  }
 0xdf2   : > { %7116 = vsyncadd (!%p6456_p5), %s5589_s0, 4294967264  ;;  %s8206_s24 = sld [smem:[#allocation19_spill]]  ;;  %s8207_s21 = sld [smem:[#allocation16_spill]] }
 0xdf3   : > { %s8208_s22 = sld [smem:[#allocation17_spill]]  ;;  %s8209_s23 = sld [smem:[#allocation20_spill]] }
 0xdf8   : > { %p32_p1 = scmp.ge.s32.totalorder %s8206_s24, 4  }
 0xdfa   :  { %34 = sbr.rel (!%p32_p1) target bundleno = 12 (0xc), region = 157 }
 0xe01   :  { %5594 = vsyncpa [#allocation3], 1 }
 0xe02   :  { %5596 = vsyncpa [#allocation3 + $0x1], 1 }
 0xe03   :  { %5597 = vsyncpa [#allocation6], 1 }
 0xe04   :  { %5598 = vsyncpa [#allocation4], 1 }
 0xe05   :  { %5600 = vsyncpa [#allocation4 + $0x1], 1 }
 0xe06   :  { %5601 = vsyncpa [#allocation10], 1 }
 0xe07   :  { %5603 = vsyncpa [#allocation10 + $0x1], 1 }

</bundles_post_ra>
